<compile_context>
chip_gen: v7x
topology: tpu7x:2x2x1
jax: 0.10.0
libtpu: 0.0.40
codegen_flags: <defaults>
</compile_context>

<pallas_src>
import functools

import numpy as np
import jax
import jax.numpy as jnp
from jax.experimental import pallas as pl
from jax.experimental.pallas import tpu as pltpu


def _lrelu(y):
    return jnp.maximum(y, 0.2 * y)            # LeakyReLU(0.2), f32 epilogue


def _round_up(x, m):
    return (x + m - 1) // m * m


# ---------------------------------------------------------------------------
# Fused trunk kernel: DB1 -> DB2 -> R1 -> R2 for one block of `nb` images.
#   p1_ref   : (nb*m1, k1)   bf16  K-stacked DB1 patch (built in the wrapper)
#   g_ref    : (9, m2, m1)   bf16  0/1 selection matrices (pad + stride-2 gather)
#   w*_ref   : (K, Cout)     bf16  K-stacked conv weights ; b*_ref (1, Cout) f32
#   out_ref  : (nb*m2, 128)  f32   R2 output rows in wp-wide convention
#   scratches: patch2 / patch3 (bf16 K-stacked patches), aimg / himg
#              (bf16 zero-padded flat images, persistent, border-zeroed only)
# ---------------------------------------------------------------------------
def _trunk_kernel(p1_ref, g_ref,
                  w1_ref, b1_ref, w2_ref, b2_ref,
                  r1w1_ref, r1b1_ref, r1w2_ref, r1b2_ref,
                  r2w1_ref, r2b1_ref, r2w2_ref, r2b2_ref,
                  out_ref,
                  patch2_ref, patch3_ref, aimg_ref, himg_ref,
                  *, nb, m1, m2, wp, w_valid, c1, c2, pre, f2):
    store_off = pre + wp + 1                  # multiple of 8 by construction

    # ---- DB1: stride-2 3x3 conv as ONE K-stacked matmul + bias + LeakyReLU.
    y1 = jnp.dot(p1_ref[...], w1_ref[...], preferred_element_type=jnp.float32)
    a_db1 = _lrelu(y1 + b1_ref[...]).astype(jnp.bfloat16)       # (nb*m1, c1)

    # ---- DB2 patch: zero-padding + stride-2 gather of the DB1 output done
    #      on the MXU with 0/1 selection matrices; one 64-lane block per tap.
    for n in range(nb):
        hn = a_db1[n * m1:(n + 1) * m1, :]
        for t in range(9):
            piece = jnp.dot(g_ref[t], hn, preferred_element_type=jnp.float32)
            patch2_ref[n * m2:(n + 1) * m2, t * c1:(t + 1) * c1] = (
                piece.astype(jnp.bfloat16))

    # ---- DB2: ONE K-stacked matmul (K = 9*64) + bias + LeakyReLU.
    y2 = jnp.dot(patch2_ref[...], w2_ref[...],
                 preferred_element_type=jnp.float32)
    a0 = _lrelu(y2 + b2_ref[...])                               # (nb*m2, c2)

    # ---- zero ONLY the border rows of the padded-image scratches; the data
    #      region is fully overwritten below and junk cols are where()-zeroed.
    ztop = jnp.zeros((store_off, c2), jnp.bfloat16)
    nbot = f2 - (store_off + m2)
    zbot = jnp.zeros((max(nbot, 1), c2), jnp.bfloat16)
    for n in range(nb):
        aimg_ref[n, 0:store_off, :] = ztop
        himg_ref[n, 0:store_off, :] = ztop
        if nbot > 0:
            aimg_ref[n, store_off + m2:f2, :] = zbot
            himg_ref[n, store_off + m2:f2, :] = zbot

    # rows whose x coordinate >= w_valid are junk (wp-wide row convention);
    # zeroing them makes them the conv zero padding when repacked.
    keep = (jax.lax.broadcasted_iota(jnp.int32, (nb * m2, c2), 0) % wp) < w_valid

    def repack(val_f32, img_ref):
        v = jnp.where(keep, val_f32, 0.0).astype(jnp.bfloat16)   # cast ONCE
        for n in range(nb):
            img_ref[n, store_off:store_off + m2, :] = v[n * m2:(n + 1) * m2, :]

    def conv3x3(img_ref, w_ref, b_ref):
        # bf16 (nb*m2, 9*c2) patch from 9 shifted slice copies (no recast) ...
        for n in range(nb):
            for t in range(9):
                dy, dx = t // 3, t % 3
                off = pre + dy * wp + dx
                patch3_ref[n * m2:(n + 1) * m2, t * c2:(t + 1) * c2] = (
                    img_ref[n, off:off + m2, :])
        # ... then ONE matmul with K = 9*128 = 1152.
        y = jnp.dot(patch3_ref[...], w_ref[...],
                    preferred_element_type=jnp.float32)
        return y + b_ref[...]

    def res_block(a_in, w1r, b1r, w2r, b2r):
        repack(a_in, aimg_ref)
        h = _lrelu(conv3x3(aimg_ref, w1r, b1r))
        repack(h, himg_ref)
        return a_in + conv3x3(himg_ref, w2r, b2r)     # residual add in f32

    a1 = res_block(a0, r1w1_ref, r1b1_ref, r1w2_ref, r1b2_ref)
    a2 = res_block(a1, r2w1_ref, r2b1_ref, r2w2_ref, r2b2_ref)
    out_ref[...] = a2.astype(out_ref.dtype)


# ---------------------------------------------------------------------------
# Wrapper-side layout plumbing (runs once per call, all tiny tensors).
# ---------------------------------------------------------------------------
def _build_db1_patch(x_nhwc, k1):
    """K-stacked stride-2 patch of the tiny raw input: (B*(H/2)*(W/2), k1) bf16."""
    B, H, W, C = x_nhwc.shape
    xp = jnp.pad(x_nhwc, ((0, 0), (1, 1), (1, 1), (0, 0)))
    taps = []
    for dy in range(3):
        for dx in range(3):
            taps.append(xp[:, dy:dy + H:2, dx:dx + W:2, :])      # (B, H/2, W/2, C)
    p = jnp.concatenate(taps, axis=-1)                           # cols = t*C + c
    p = p.reshape(B, (H // 2) * (W // 2), 9 * C)
    if k1 > 9 * C:
        p = jnp.pad(p, ((0, 0), (0, 0), (0, k1 - 9 * C)))
    return p.astype(jnp.bfloat16).reshape(B * (H // 2) * (W // 2), k1)


def _build_selection(h2, w2, h4, w4):
    """0/1 matrices doing pad+stride-2 gather of the DB1 output, per tap."""
    wp = w4 + 2
    g = np.zeros((9, h4 * wp, h2 * w2), np.float32)
    for t in range(9):
        dy, dx = t // 3, t % 3
        for oy in range(h4):
            for ox in range(w4):
                iy, ix = 2 * oy + dy - 1, 2 * ox + dx - 1
                if 0 <= iy < h2 and 0 <= ix < w2:
                    g[t, oy * wp + ox, iy * w2 + ix] = 1.0
    return jnp.asarray(g, jnp.bfloat16)


def _stack_conv_w(w_oihw, k_pad=None):
    """OIHW conv weight -> K-stacked (9*Cin, Cout) bf16, rows ordered [tap, cin]."""
    co, ci = w_oihw.shape[0], w_oihw.shape[1]
    w = jnp.transpose(w_oihw, (2, 3, 1, 0)).reshape(9 * ci, co)
    if k_pad is not None and k_pad > 9 * ci:
        w = jnp.pad(w, ((0, k_pad - 9 * ci), (0, 0)))
    return w.astype(jnp.bfloat16)


def trunk_forward(params, x_nhwc, images_per_block=1):
    """DB1 -> DB2 -> R1 -> R2 fused in one pallas_call. Returns (B, H/4, W/4, 128)."""
    B, H, W, Cin = x_nhwc.shape
    assert H % 4 == 0 and W % 4 == 0
    nb = images_per_block
    assert B % nb == 0

    c1 = params["db1_w"].shape[0]             # 64
    c2 = params["db2_w"].shape[0]             # 128
    h2, w2 = H // 2, W // 2
    h4, w4 = H // 4, W // 4
    wp = w4 + 2                               # row width incl. 2 junk cols
    m1, m2 = h2 * w2, h4 * wp
    pre = (-(wp + 1)) % 8                     # aligns the data-store offset
    f2 = _round_up(pre + 2 * wp + 2 + m2, 8)  # padded-image scratch rows
    k1 = _round_up(9 * Cin, 8)
    assert (nb * m1) % 8 == 0 and (nb * m2) % 8 == 0

    p1 = _build_db1_patch(x_nhwc, k1)                      # (B*m1, k1) bf16
    g = _build_selection(h2, w2, h4, w4)                   # (9, m2, m1) bf16

    w1 = _stack_conv_w(params["db1_w"], k_pad=k1)
    b1 = params["db1_b"].reshape(1, c1).astype(jnp.float32)
    w2s = _stack_conv_w(params["db2_w"])
    b2 = params["db2_b"].reshape(1, c2).astype(jnp.float32)
    r1w1 = _stack_conv_w(params["r1_w1"])
    r1b1 = params["r1_b1"].reshape(1, c2).astype(jnp.float32)
    r1w2 = _stack_conv_w(params["r1_w2"])
    r1b2 = params["r1_b2"].reshape(1, c2).astype(jnp.float32)
    r2w1 = _stack_conv_w(params["r2_w1"])
    r2b1 = params["r2_b1"].reshape(1, c2).astype(jnp.float32)
    r2w2 = _stack_conv_w(params["r2_w2"])
    r2b2 = params["r2_b2"].reshape(1, c2).astype(jnp.float32)

    flops = int(2 * B * (m1 * k1 * c1 + 9 * m2 * m1 * c1
                         + m2 * 9 * c1 * c2 + 4 * m2 * 9 * c2 * c2))
    bytes_accessed = int(B * m1 * k1 * 2 + B * m2 * c2 * 4 + g.size * 2
                         + 2 * (w1.size + w2s.size + r1w1.size + r1w2.size
                                + r2w1.size + r2w2.size))
    cost = pl.CostEstimate(flops=flops, transcendentals=0,
                           bytes_accessed=bytes_accessed)

    const2 = lambda i: (0, 0)
    const3 = lambda i: (0, 0, 0)

    out = pl.pallas_call(
        functools.partial(_trunk_kernel, nb=nb, m1=m1, m2=m2, wp=wp,
                          w_valid=w4, c1=c1, c2=c2, pre=pre, f2=f2),
        out_shape=jax.ShapeDtypeStruct((B * m2, c2), jnp.float32),
        grid=(B // nb,),
        in_specs=[
            pl.BlockSpec((nb * m1, k1), lambda i: (i, 0)),     # DB1 patch
            pl.BlockSpec((9, m2, m1), const3),                 # selection G
            pl.BlockSpec((k1, c1), const2),                    # DB1 w / b
            pl.BlockSpec((1, c1), const2),
            pl.BlockSpec((9 * c1, c2), const2),                # DB2 w / b
            pl.BlockSpec((1, c2), const2),
            pl.BlockSpec((9 * c2, c2), const2),                # R1 conv1 w / b
            pl.BlockSpec((1, c2), const2),
            pl.BlockSpec((9 * c2, c2), const2),                # R1 conv2 w / b
            pl.BlockSpec((1, c2), const2),
            pl.BlockSpec((9 * c2, c2), const2),                # R2 conv1 w / b
            pl.BlockSpec((1, c2), const2),
            pl.BlockSpec((9 * c2, c2), const2),                # R2 conv2 w / b
            pl.BlockSpec((1, c2), const2),
        ],
        out_specs=pl.BlockSpec((nb * m2, c2), lambda i: (i, 0)),
        scratch_shapes=[
            pltpu.VMEM((nb * m2, 9 * c1), jnp.bfloat16),       # DB2 patch
            pltpu.VMEM((nb * m2, 9 * c2), jnp.bfloat16),       # ResBlock patch
            pltpu.VMEM((nb, f2, c2), jnp.bfloat16),            # padded x image
            pltpu.VMEM((nb, f2, c2), jnp.bfloat16),            # padded h1 image
        ],
        compiler_params=pltpu.CompilerParams(
            dimension_semantics=("parallel",),
            vmem_limit_bytes=32 * 1024 * 1024),
        cost_estimate=cost,
    )(p1, g, w1, b1, w2s, b2,
      r1w1, r1b1, r1w2, r1b2, r2w1, r2b1, r2w2, r2b2)

    return out.reshape(B, h4, wp, c2)[:, :, :w4, :]            # (B, h4, w4, 128)


# ---------------------------------------------------------------------------
# Spectral norm (parameter setup time) and parameter init
# ---------------------------------------------------------------------------
def spectral_normalize(w2d, iters=5):
    u = jnp.full((w2d.shape[0],), 1.0 / jnp.sqrt(float(w2d.shape[0])),
                 dtype=w2d.dtype)
    v = None
    for _ in range(iters):
        v = w2d.T @ u
        v = v / (jnp.linalg.norm(v) + 1e-12)
        u = w2d @ v
        u = u / (jnp.linalg.norm(u) + 1e-12)
    sigma = u @ (w2d @ v)
    return w2d / sigma


def init_params(key, in_channels, emb_dim, h, w):
    ks = jax.random.split(key, 16)

    def conv_w(k, co, ci):
        wt = jax.random.normal(k, (co, ci, 3, 3), jnp.float32) * 0.05
        return spectral_normalize(wt.reshape(co, -1)).reshape(co, ci, 3, 3)

    def bias(k, n):
        return jax.random.normal(k, (n,), jnp.float32) * 0.01

    in_feat = 128 * h * w + emb_dim
    d1_w = jax.random.normal(ks[10], (1, in_feat), jnp.float32) * 0.05
    d1_w = spectral_normalize(d1_w)

    return {
        "db1_w": conv_w(ks[0], 64, in_channels), "db1_b": bias(ks[1], 64),
        "db2_w": conv_w(ks[2], 128, 64),          "db2_b": bias(ks[3], 128),
        "r1_w1": conv_w(ks[4], 128, 128),         "r1_b1": bias(ks[5], 128),
        "r1_w2": conv_w(ks[6], 128, 128),         "r1_b2": bias(ks[7], 128),
        "r2_w1": conv_w(ks[8], 128, 128),         "r2_b1": bias(ks[9], 128),
        "r2_w2": conv_w(ks[11], 128, 128),        "r2_b2": bias(ks[12], 128),
        "d1_w": d1_w.T,                           "d1_b": bias(ks[13], 1),
    }


# ---------------------------------------------------------------------------
# Forward pass (mirrors cResNet_Discriminator.forward)
# ---------------------------------------------------------------------------
def discriminator_forward(params, x_nchw, c, noise_key):
    kx, kc = jax.random.split(noise_key)
    x = x_nchw + 0.001 * jax.random.normal(kx, x_nchw.shape, x_nchw.dtype)
    c = c + 0.001 * jax.random.normal(kc, c.shape, c.dtype)

    x = jnp.transpose(x, (0, 2, 3, 1))            # NCHW -> NHWC
    feat = trunk_forward(params, x)               # (B, h, w, 128), one kernel

    # flatten in NCHW order to match torch .view(-1, 128*h*w)
    B = feat.shape[0]
    feat = jnp.transpose(feat, (0, 3, 1, 2)).reshape(B, -1)
    feat = jnp.concatenate([feat, c], axis=1)

    # Final dense (M=batch, N=1): plain XLA dot per the perf review.
    return feat @ params["d1_w"] + params["d1_b"]


# ---------------------------------------------------------------------------
if __name__ == "__main__":
    key = jax.random.PRNGKey(0)
    k_param, k_x, k_c, k_noise = jax.random.split(key, 4)

    image_size = (16, 16)
    in_channels = 3
    emb_dim = 8
    batch = 2
    h, w = image_size[0] // 4, image_size[1] // 4

    params = init_params(k_param, in_channels, emb_dim, h, w)
    x = jax.random.normal(k_x, (batch, in_channels) + image_size, jnp.float32)
    c = jax.random.normal(k_c, (batch, emb_dim), jnp.float32)

    fwd = jax.jit(discriminator_forward)
    out = jax.block_until_ready(fwd(params, x, c, k_noise))
    assert out.shape == (batch, 1), out.shape
    assert bool(jnp.all(jnp.isfinite(out)))
    print("KERNEL_OK")
</pallas_src>

<mosaic_0001>
module attributes {stable_mosaic.version = 11 : i64} {
  func.func @_trunk_kernel(%arg0: i32, %arg1: memref<64x32xbf16, #tpu.memory_space<vmem>>, %arg2: memref<9x24x64xbf16, #tpu.memory_space<vmem>>, %arg3: memref<32x64xbf16, #tpu.memory_space<vmem>>, %arg4: memref<1x64xf32, #tpu.memory_space<vmem>>, %arg5: memref<576x128xbf16, #tpu.memory_space<vmem>>, %arg6: memref<1x128xf32, #tpu.memory_space<vmem>>, %arg7: memref<1152x128xbf16, #tpu.memory_space<vmem>>, %arg8: memref<1x128xf32, #tpu.memory_space<vmem>>, %arg9: memref<1152x128xbf16, #tpu.memory_space<vmem>>, %arg10: memref<1x128xf32, #tpu.memory_space<vmem>>, %arg11: memref<1152x128xbf16, #tpu.memory_space<vmem>>, %arg12: memref<1x128xf32, #tpu.memory_space<vmem>>, %arg13: memref<1152x128xbf16, #tpu.memory_space<vmem>>, %arg14: memref<1x128xf32, #tpu.memory_space<vmem>>, %arg15: memref<24x128xf32, #tpu.memory_space<vmem>>, %arg16: memref<24x576xbf16, #tpu.memory_space<vmem>>, %arg17: memref<24x1152xbf16, #tpu.memory_space<vmem>>, %arg18: memref<1x40x128xbf16, #tpu.memory_space<vmem>>, %arg19: memref<1x40x128xbf16, #tpu.memory_space<vmem>>) attributes {dimension_semantics = [#tpu.dimension_semantics<parallel>], iteration_bounds = array<i64: 2>, scalar_prefetch = 0 : i64, scratch_operands = 4 : i64, tpu.core_type = #tpu.core_type<tc>, window_params = [{transform_indices = @transform_0, window_bounds = array<i64: 64, 32>}, {pipeline_mode = #tpu.pipeline_mode<synchronous>, transform_indices = @transform_1, window_bounds = array<i64: 9, 24, 64>}, {pipeline_mode = #tpu.pipeline_mode<synchronous>, transform_indices = @transform_2, window_bounds = array<i64: 32, 64>}, {pipeline_mode = #tpu.pipeline_mode<synchronous>, transform_indices = @transform_3, window_bounds = array<i64: 1, 64>}, {pipeline_mode = #tpu.pipeline_mode<synchronous>, transform_indices = @transform_4, window_bounds = array<i64: 576, 128>}, {pipeline_mode = #tpu.pipeline_mode<synchronous>, transform_indices = @transform_5, window_bounds = array<i64: 1, 128>}, {pipeline_mode = #tpu.pipeline_mode<synchronous>, transform_indices = @transform_6, window_bounds = array<i64: 1152, 128>}, {pipeline_mode = #tpu.pipeline_mode<synchronous>, transform_indices = @transform_7, window_bounds = array<i64: 1, 128>}, {pipeline_mode = #tpu.pipeline_mode<synchronous>, transform_indices = @transform_8, window_bounds = array<i64: 1152, 128>}, {pipeline_mode = #tpu.pipeline_mode<synchronous>, transform_indices = @transform_9, window_bounds = array<i64: 1, 128>}, {pipeline_mode = #tpu.pipeline_mode<synchronous>, transform_indices = @transform_10, window_bounds = array<i64: 1152, 128>}, {pipeline_mode = #tpu.pipeline_mode<synchronous>, transform_indices = @transform_11, window_bounds = array<i64: 1, 128>}, {pipeline_mode = #tpu.pipeline_mode<synchronous>, transform_indices = @transform_12, window_bounds = array<i64: 1152, 128>}, {pipeline_mode = #tpu.pipeline_mode<synchronous>, transform_indices = @transform_13, window_bounds = array<i64: 1, 128>}, {transform_indices = @transform_14, window_bounds = array<i64: 24, 128>}]} {
    %c0 = arith.constant 0 : index
    %c0_0 = arith.constant 0 : index
    %0 = vector.load %arg1[%c0, %c0_0] : memref<64x32xbf16, #tpu.memory_space<vmem>>, vector<64x32xbf16>
    %c0_1 = arith.constant 0 : index
    %c0_2 = arith.constant 0 : index
    %1 = vector.load %arg3[%c0_1, %c0_2] : memref<32x64xbf16, #tpu.memory_space<vmem>>, vector<32x64xbf16>
    %cst = arith.constant dense<0.000000e+00> : vector<64x64xf32>
    %2 = tpu.matmul %0, %1, %cst {dimension_numbers = #tpu.dot_dimension_numbers<[1], [0], [0], [1], [0, 0, 1, 1], [], []>} : vector<64x32xbf16>, vector<32x64xbf16>, vector<64x64xf32> -> vector<64x64xf32>
    %c0_3 = arith.constant 0 : index
    %c0_4 = arith.constant 0 : index
    %3 = vector.load %arg4[%c0_3, %c0_4] : memref<1x64xf32, #tpu.memory_space<vmem>>, vector<1x64xf32>
    %4 = vector.broadcast %3 : vector<1x64xf32> to vector<64x64xf32>
    %5 = arith.addf %2, %4 : vector<64x64xf32>
    %cst_5 = arith.constant 2.000000e-01 : f32
    %6 = vector.broadcast %cst_5 : f32 to vector<64x64xf32>
    %7 = arith.mulf %6, %5 : vector<64x64xf32>
    %8 = arith.maximumf %5, %7 : vector<64x64xf32>
    %9 = arith.truncf %8 : vector<64x64xf32> to vector<64x64xbf16>
    %c0_6 = arith.constant 0 : index
    %c0_7 = arith.constant 0 : index
    %c0_8 = arith.constant 0 : index
    %10 = vector.load %arg2[%c0_6, %c0_7, %c0_8] : memref<9x24x64xbf16, #tpu.memory_space<vmem>>, vector<1x24x64xbf16>
    %11 = vector.shape_cast %10 : vector<1x24x64xbf16> to vector<24x64xbf16>
    %cst_9 = arith.constant dense<0.000000e+00> : vector<24x64xf32>
    %12 = tpu.matmul %11, %9, %cst_9 {dimension_numbers = #tpu.dot_dimension_numbers<[1], [0], [0], [1], [0, 0, 1, 1], [], []>} : vector<24x64xbf16>, vector<64x64xbf16>, vector<24x64xf32> -> vector<24x64xf32>
    %13 = arith.truncf %12 : vector<24x64xf32> to vector<24x64xbf16>
    %c0_10 = arith.constant 0 : index
    %c0_11 = arith.constant 0 : index
    %14 = vector.load %arg16[%c0_10, %c0_11] : memref<24x576xbf16, #tpu.memory_space<vmem>>, vector<24x64xbf16>
    tpu.vector_store %arg16[%c0_10, %c0_11], %13 {strides = array<i32>} : memref<24x576xbf16, #tpu.memory_space<vmem>>, vector<24x64xbf16>,
    %c1 = arith.constant 1 : index
    %c0_12 = arith.constant 0 : index
    %c0_13 = arith.constant 0 : index
    %15 = vector.load %arg2[%c1, %c0_12, %c0_13] : memref<9x24x64xbf16, #tpu.memory_space<vmem>>, vector<1x24x64xbf16>
    %16 = vector.shape_cast %15 : vector<1x24x64xbf16> to vector<24x64xbf16>
    %cst_14 = arith.constant dense<0.000000e+00> : vector<24x64xf32>
    %17 = tpu.matmul %16, %9, %cst_14 {dimension_numbers = #tpu.dot_dimension_numbers<[1], [0], [0], [1], [0, 0, 1, 1], [], []>} : vector<24x64xbf16>, vector<64x64xbf16>, vector<24x64xf32> -> vector<24x64xf32>
    %18 = arith.truncf %17 : vector<24x64xf32> to vector<24x64xbf16>
    %c0_15 = arith.constant 0 : index
    %c64 = arith.constant 64 : index
    %19 = vector.load %arg16[%c0_15, %c64] : memref<24x576xbf16, #tpu.memory_space<vmem>>, vector<24x64xbf16>
    tpu.vector_store %arg16[%c0_15, %c64], %18 {strides = array<i32>} : memref<24x576xbf16, #tpu.memory_space<vmem>>, vector<24x64xbf16>,
    %c2 = arith.constant 2 : index
    %c0_16 = arith.constant 0 : index
    %c0_17 = arith.constant 0 : index
    %20 = vector.load %arg2[%c2, %c0_16, %c0_17] : memref<9x24x64xbf16, #tpu.memory_space<vmem>>, vector<1x24x64xbf16>
    %21 = vector.shape_cast %20 : vector<1x24x64xbf16> to vector<24x64xbf16>
    %cst_18 = arith.constant dense<0.000000e+00> : vector<24x64xf32>
    %22 = tpu.matmul %21, %9, %cst_18 {dimension_numbers = #tpu.dot_dimension_numbers<[1], [0], [0], [1], [0, 0, 1, 1], [], []>} : vector<24x64xbf16>, vector<64x64xbf16>, vector<24x64xf32> -> vector<24x64xf32>
    %23 = arith.truncf %22 : vector<24x64xf32> to vector<24x64xbf16>
    %c0_19 = arith.constant 0 : index
    %c128 = arith.constant 128 : index
    %24 = vector.load %arg16[%c0_19, %c128] : memref<24x576xbf16, #tpu.memory_space<vmem>>, vector<24x64xbf16>
    tpu.vector_store %arg16[%c0_19, %c128], %23 {strides = array<i32>} : memref<24x576xbf16, #tpu.memory_space<vmem>>, vector<24x64xbf16>,
    %c3 = arith.constant 3 : index
    %c0_20 = arith.constant 0 : index
    %c0_21 = arith.constant 0 : index
    %25 = vector.load %arg2[%c3, %c0_20, %c0_21] : memref<9x24x64xbf16, #tpu.memory_space<vmem>>, vector<1x24x64xbf16>
    %26 = vector.shape_cast %25 : vector<1x24x64xbf16> to vector<24x64xbf16>
    %cst_22 = arith.constant dense<0.000000e+00> : vector<24x64xf32>
    %27 = tpu.matmul %26, %9, %cst_22 {dimension_numbers = #tpu.dot_dimension_numbers<[1], [0], [0], [1], [0, 0, 1, 1], [], []>} : vector<24x64xbf16>, vector<64x64xbf16>, vector<24x64xf32> -> vector<24x64xf32>
    %28 = arith.truncf %27 : vector<24x64xf32> to vector<24x64xbf16>
    %c0_23 = arith.constant 0 : index
    %c192 = arith.constant 192 : index
    %29 = vector.load %arg16[%c0_23, %c192] : memref<24x576xbf16, #tpu.memory_space<vmem>>, vector<24x64xbf16>
    tpu.vector_store %arg16[%c0_23, %c192], %28 {strides = array<i32>} : memref<24x576xbf16, #tpu.memory_space<vmem>>, vector<24x64xbf16>,
    %c4 = arith.constant 4 : index
    %c0_24 = arith.constant 0 : index
    %c0_25 = arith.constant 0 : index
    %30 = vector.load %arg2[%c4, %c0_24, %c0_25] : memref<9x24x64xbf16, #tpu.memory_space<vmem>>, vector<1x24x64xbf16>
    %31 = vector.shape_cast %30 : vector<1x24x64xbf16> to vector<24x64xbf16>
    %cst_26 = arith.constant dense<0.000000e+00> : vector<24x64xf32>
    %32 = tpu.matmul %31, %9, %cst_26 {dimension_numbers = #tpu.dot_dimension_numbers<[1], [0], [0], [1], [0, 0, 1, 1], [], []>} : vector<24x64xbf16>, vector<64x64xbf16>, vector<24x64xf32> -> vector<24x64xf32>
    %33 = arith.truncf %32 : vector<24x64xf32> to vector<24x64xbf16>
    %c0_27 = arith.constant 0 : index
    %c256 = arith.constant 256 : index
    %34 = vector.load %arg16[%c0_27, %c256] : memref<24x576xbf16, #tpu.memory_space<vmem>>, vector<24x64xbf16>
    tpu.vector_store %arg16[%c0_27, %c256], %33 {strides = array<i32>} : memref<24x576xbf16, #tpu.memory_space<vmem>>, vector<24x64xbf16>,
    %c5 = arith.constant 5 : index
    %c0_28 = arith.constant 0 : index
    %c0_29 = arith.constant 0 : index
    %35 = vector.load %arg2[%c5, %c0_28, %c0_29] : memref<9x24x64xbf16, #tpu.memory_space<vmem>>, vector<1x24x64xbf16>
    %36 = vector.shape_cast %35 : vector<1x24x64xbf16> to vector<24x64xbf16>
    %cst_30 = arith.constant dense<0.000000e+00> : vector<24x64xf32>
    %37 = tpu.matmul %36, %9, %cst_30 {dimension_numbers = #tpu.dot_dimension_numbers<[1], [0], [0], [1], [0, 0, 1, 1], [], []>} : vector<24x64xbf16>, vector<64x64xbf16>, vector<24x64xf32> -> vector<24x64xf32>
    %38 = arith.truncf %37 : vector<24x64xf32> to vector<24x64xbf16>
    %c0_31 = arith.constant 0 : index
    %c320 = arith.constant 320 : index
    %39 = vector.load %arg16[%c0_31, %c320] : memref<24x576xbf16, #tpu.memory_space<vmem>>, vector<24x64xbf16>
    tpu.vector_store %arg16[%c0_31, %c320], %38 {strides = array<i32>} : memref<24x576xbf16, #tpu.memory_space<vmem>>, vector<24x64xbf16>,
    %c6 = arith.constant 6 : index
    %c0_32 = arith.constant 0 : index
    %c0_33 = arith.constant 0 : index
    %40 = vector.load %arg2[%c6, %c0_32, %c0_33] : memref<9x24x64xbf16, #tpu.memory_space<vmem>>, vector<1x24x64xbf16>
    %41 = vector.shape_cast %40 : vector<1x24x64xbf16> to vector<24x64xbf16>
    %cst_34 = arith.constant dense<0.000000e+00> : vector<24x64xf32>
    %42 = tpu.matmul %41, %9, %cst_34 {dimension_numbers = #tpu.dot_dimension_numbers<[1], [0], [0], [1], [0, 0, 1, 1], [], []>} : vector<24x64xbf16>, vector<64x64xbf16>, vector<24x64xf32> -> vector<24x64xf32>
    %43 = arith.truncf %42 : vector<24x64xf32> to vector<24x64xbf16>
    %c0_35 = arith.constant 0 : index
    %c384 = arith.constant 384 : index
    %44 = vector.load %arg16[%c0_35, %c384] : memref<24x576xbf16, #tpu.memory_space<vmem>>, vector<24x64xbf16>
    tpu.vector_store %arg16[%c0_35, %c384], %43 {strides = array<i32>} : memref<24x576xbf16, #tpu.memory_space<vmem>>, vector<24x64xbf16>,
    %c7 = arith.constant 7 : index
    %c0_36 = arith.constant 0 : index
    %c0_37 = arith.constant 0 : index
    %45 = vector.load %arg2[%c7, %c0_36, %c0_37] : memref<9x24x64xbf16, #tpu.memory_space<vmem>>, vector<1x24x64xbf16>
    %46 = vector.shape_cast %45 : vector<1x24x64xbf16> to vector<24x64xbf16>
    %cst_38 = arith.constant dense<0.000000e+00> : vector<24x64xf32>
    %47 = tpu.matmul %46, %9, %cst_38 {dimension_numbers = #tpu.dot_dimension_numbers<[1], [0], [0], [1], [0, 0, 1, 1], [], []>} : vector<24x64xbf16>, vector<64x64xbf16>, vector<24x64xf32> -> vector<24x64xf32>
    %48 = arith.truncf %47 : vector<24x64xf32> to vector<24x64xbf16>
    %c0_39 = arith.constant 0 : index
    %c448 = arith.constant 448 : index
    %49 = vector.load %arg16[%c0_39, %c448] : memref<24x576xbf16, #tpu.memory_space<vmem>>, vector<24x64xbf16>
    tpu.vector_store %arg16[%c0_39, %c448], %48 {strides = array<i32>} : memref<24x576xbf16, #tpu.memory_space<vmem>>, vector<24x64xbf16>,
    %c8 = arith.constant 8 : index
    %c0_40 = arith.constant 0 : index
    %c0_41 = arith.constant 0 : index
    %50 = vector.load %arg2[%c8, %c0_40, %c0_41] : memref<9x24x64xbf16, #tpu.memory_space<vmem>>, vector<1x24x64xbf16>
    %51 = vector.shape_cast %50 : vector<1x24x64xbf16> to vector<24x64xbf16>
    %cst_42 = arith.constant dense<0.000000e+00> : vector<24x64xf32>
    %52 = tpu.matmul %51, %9, %cst_42 {dimension_numbers = #tpu.dot_dimension_numbers<[1], [0], [0], [1], [0, 0, 1, 1], [], []>} : vector<24x64xbf16>, vector<64x64xbf16>, vector<24x64xf32> -> vector<24x64xf32>
    %53 = arith.truncf %52 : vector<24x64xf32> to vector<24x64xbf16>
    %c0_43 = arith.constant 0 : index
    %c512 = arith.constant 512 : index
    %54 = vector.load %arg16[%c0_43, %c512] : memref<24x576xbf16, #tpu.memory_space<vmem>>, vector<24x64xbf16>
    tpu.vector_store %arg16[%c0_43, %c512], %53 {strides = array<i32>} : memref<24x576xbf16, #tpu.memory_space<vmem>>, vector<24x64xbf16>,
    %c0_44 = arith.constant 0 : index
    %c0_45 = arith.constant 0 : index
    %55 = vector.load %arg16[%c0_44, %c0_45] : memref<24x576xbf16, #tpu.memory_space<vmem>>, vector<24x576xbf16>
    %c0_46 = arith.constant 0 : index
    %c0_47 = arith.constant 0 : index
    %56 = vector.load %arg5[%c0_46, %c0_47] : memref<576x128xbf16, #tpu.memory_space<vmem>>, vector<576x128xbf16>
    %cst_48 = arith.constant dense<0.000000e+00> : vector<24x128xf32>
    %57 = tpu.matmul %55, %56, %cst_48 {dimension_numbers = #tpu.dot_dimension_numbers<[1], [0], [0], [1], [0, 0, 1, 1], [], []>} : vector<24x576xbf16>, vector<576x128xbf16>, vector<24x128xf32> -> vector<24x128xf32>
    %c0_49 = arith.constant 0 : index
    %c0_50 = arith.constant 0 : index
    %58 = vector.load %arg6[%c0_49, %c0_50] : memref<1x128xf32, #tpu.memory_space<vmem>>, vector<1x128xf32>
    %59 = vector.broadcast %58 : vector<1x128xf32> to vector<24x128xf32>
    %60 = arith.addf %57, %59 : vector<24x128xf32>
    %cst_51 = arith.constant 2.000000e-01 : f32
    %61 = vector.broadcast %cst_51 : f32 to vector<24x128xf32>
    %62 = arith.mulf %61, %60 : vector<24x128xf32>
    %63 = arith.maximumf %60, %62 : vector<24x128xf32>
    %cst_52 = arith.constant 0.000000e+00 : bf16
    %64 = vector.broadcast %cst_52 : bf16 to vector<8x128xbf16>
    %cst_53 = arith.constant 0.000000e+00 : bf16
    %65 = vector.broadcast %cst_53 : bf16 to vector<8x128xbf16>
    %c0_54 = arith.constant 0 : index
    %c0_55 = arith.constant 0 : index
    %c0_56 = arith.constant 0 : index
    %66 = vector.load %arg18[%c0_54, %c0_55, %c0_56] : memref<1x40x128xbf16, #tpu.memory_space<vmem>>, vector<1x8x128xbf16>
    %67 = vector.shape_cast %66 : vector<1x8x128xbf16> to vector<8x128xbf16>
    %68 = vector.shape_cast %64 : vector<8x128xbf16> to vector<1x8x128xbf16>
    tpu.vector_store %arg18[%c0_54, %c0_55, %c0_56], %68 {strides = array<i32>} : memref<1x40x128xbf16, #tpu.memory_space<vmem>>, vector<1x8x128xbf16>,
    %c0_57 = arith.constant 0 : index
    %c0_58 = arith.constant 0 : index
    %c0_59 = arith.constant 0 : index
    %69 = vector.load %arg19[%c0_57, %c0_58, %c0_59] : memref<1x40x128xbf16, #tpu.memory_space<vmem>>, vector<1x8x128xbf16>
    %70 = vector.shape_cast %69 : vector<1x8x128xbf16> to vector<8x128xbf16>
    %71 = vector.shape_cast %64 : vector<8x128xbf16> to vector<1x8x128xbf16>
    tpu.vector_store %arg19[%c0_57, %c0_58, %c0_59], %71 {strides = array<i32>} : memref<1x40x128xbf16, #tpu.memory_space<vmem>>, vector<1x8x128xbf16>,
    %c0_60 = arith.constant 0 : index
    %c32 = arith.constant 32 : index
    %c0_61 = arith.constant 0 : index
    %72 = vector.load %arg18[%c0_60, %c32, %c0_61] : memref<1x40x128xbf16, #tpu.memory_space<vmem>>, vector<1x8x128xbf16>
    %73 = vector.shape_cast %72 : vector<1x8x128xbf16> to vector<8x128xbf16>
    %74 = vector.shape_cast %65 : vector<8x128xbf16> to vector<1x8x128xbf16>
    tpu.vector_store %arg18[%c0_60, %c32, %c0_61], %74 {strides = array<i32>} : memref<1x40x128xbf16, #tpu.memory_space<vmem>>, vector<1x8x128xbf16>,
    %c0_62 = arith.constant 0 : index
    %c32_63 = arith.constant 32 : index
    %c0_64 = arith.constant 0 : index
    %75 = vector.load %arg19[%c0_62, %c32_63, %c0_64] : memref<1x40x128xbf16, #tpu.memory_space<vmem>>, vector<1x8x128xbf16>
    %76 = vector.shape_cast %75 : vector<1x8x128xbf16> to vector<8x128xbf16>
    %77 = vector.shape_cast %65 : vector<8x128xbf16> to vector<1x8x128xbf16>
    tpu.vector_store %arg19[%c0_62, %c32_63, %c0_64], %77 {strides = array<i32>} : memref<1x40x128xbf16, #tpu.memory_space<vmem>>, vector<1x8x128xbf16>,
    %78 = tpu.iota {dimensions = array<i32: 0>} : vector<24x128xi32>
    %c6_i32 = arith.constant 6 : i32
    %c0_i32 = arith.constant 0 : i32
    %79 = arith.cmpi eq, %c6_i32, %c0_i32 : i32
    %c1_i32 = arith.constant 1 : i32
    %80 = arith.select %79, %c1_i32, %c6_i32 : i32
    %81 = vector.broadcast %80 : i32 to vector<24x128xi32>
    %82 = arith.remsi %78, %81 : vector<24x128xi32>
    %c0_i32_65 = arith.constant 0 : i32
    %83 = vector.broadcast %c0_i32_65 : i32 to vector<24x128xi32>
    %84 = arith.cmpi ne, %82, %83 : vector<24x128xi32>
    %c0_i32_66 = arith.constant 0 : i32
    %85 = vector.broadcast %c0_i32_66 : i32 to vector<24x128xi32>
    %86 = arith.cmpi slt, %82, %85 : vector<24x128xi32>
    %c0_i32_67 = arith.constant 0 : i32
    %87 = arith.cmpi slt, %80, %c0_i32_67 : i32
    %88 = vector.broadcast %87 : i1 to vector<24x128xi1>
    %89 = vector.broadcast %88 : vector<24x128xi1> to vector<24x128xi1>
    %90 = arith.xori %86, %89 : vector<24x128xi1>
    %91 = arith.andi %90, %84 : vector<24x128xi1>
    %92 = vector.broadcast %80 : i32 to vector<24x128xi32>
    %93 = arith.addi %82, %92 : vector<24x128xi32>
    %94 = arith.select %91, %93, %82 : vector<24x128xi1>, vector<24x128xi32>
    %c4_i32 = arith.constant 4 : i32
    %95 = vector.broadcast %c4_i32 : i32 to vector<24x128xi32>
    %96 = arith.cmpi slt, %94, %95 : vector<24x128xi32>
    %cst_68 = arith.constant 0.000000e+00 : f32
    %97 = vector.broadcast %cst_68 : f32 to vector<24x128xf32>
    %98 = arith.select %96, %63, %97 : vector<24x128xi1>, vector<24x128xf32>
    %99 = arith.truncf %98 : vector<24x128xf32> to vector<24x128xbf16>
    %c0_69 = arith.constant 0 : index
    %c8_70 = arith.constant 8 : index
    %c0_71 = arith.constant 0 : index
    %100 = vector.load %arg18[%c0_69, %c8_70, %c0_71] : memref<1x40x128xbf16, #tpu.memory_space<vmem>>, vector<1x24x128xbf16>
    %101 = vector.shape_cast %100 : vector<1x24x128xbf16> to vector<24x128xbf16>
    %102 = vector.shape_cast %99 : vector<24x128xbf16> to vector<1x24x128xbf16>
    tpu.vector_store %arg18[%c0_69, %c8_70, %c0_71], %102 {strides = array<i32>} : memref<1x40x128xbf16, #tpu.memory_space<vmem>>, vector<1x24x128xbf16>,
    %c0_72 = arith.constant 0 : index
    %c1_73 = arith.constant 1 : index
    %c0_74 = arith.constant 0 : index
    %103 = vector.load %arg18[%c0_72, %c1_73, %c0_74] : memref<1x40x128xbf16, #tpu.memory_space<vmem>>, vector<1x24x128xbf16>
    %104 = vector.shape_cast %103 : vector<1x24x128xbf16> to vector<24x128xbf16>
    %c0_75 = arith.constant 0 : index
    %c0_76 = arith.constant 0 : index
    %105 = vector.load %arg17[%c0_75, %c0_76] : memref<24x1152xbf16, #tpu.memory_space<vmem>>, vector<24x128xbf16>
    tpu.vector_store %arg17[%c0_75, %c0_76], %104 {strides = array<i32>} : memref<24x1152xbf16, #tpu.memory_space<vmem>>, vector<24x128xbf16>,
    %c0_77 = arith.constant 0 : index
    %c2_78 = arith.constant 2 : index
    %c0_79 = arith.constant 0 : index
    %106 = vector.load %arg18[%c0_77, %c2_78, %c0_79] : memref<1x40x128xbf16, #tpu.memory_space<vmem>>, vector<1x24x128xbf16>
    %107 = vector.shape_cast %106 : vector<1x24x128xbf16> to vector<24x128xbf16>
    %c0_80 = arith.constant 0 : index
    %c128_81 = arith.constant 128 : index
    %108 = vector.load %arg17[%c0_80, %c128_81] : memref<24x1152xbf16, #tpu.memory_space<vmem>>, vector<24x128xbf16>
    tpu.vector_store %arg17[%c0_80, %c128_81], %107 {strides = array<i32>} : memref<24x1152xbf16, #tpu.memory_space<vmem>>, vector<24x128xbf16>,
    %c0_82 = arith.constant 0 : index
    %c3_83 = arith.constant 3 : index
    %c0_84 = arith.constant 0 : index
    %109 = vector.load %arg18[%c0_82, %c3_83, %c0_84] : memref<1x40x128xbf16, #tpu.memory_space<vmem>>, vector<1x24x128xbf16>
    %110 = vector.shape_cast %109 : vector<1x24x128xbf16> to vector<24x128xbf16>
    %c0_85 = arith.constant 0 : index
    %c256_86 = arith.constant 256 : index
    %111 = vector.load %arg17[%c0_85, %c256_86] : memref<24x1152xbf16, #tpu.memory_space<vmem>>, vector<24x128xbf16>
    tpu.vector_store %arg17[%c0_85, %c256_86], %110 {strides = array<i32>} : memref<24x1152xbf16, #tpu.memory_space<vmem>>, vector<24x128xbf16>,
    %c0_87 = arith.constant 0 : index
    %c7_88 = arith.constant 7 : index
    %c0_89 = arith.constant 0 : index
    %112 = vector.load %arg18[%c0_87, %c7_88, %c0_89] : memref<1x40x128xbf16, #tpu.memory_space<vmem>>, vector<1x24x128xbf16>
    %113 = vector.shape_cast %112 : vector<1x24x128xbf16> to vector<24x128xbf16>
    %c0_90 = arith.constant 0 : index
    %c384_91 = arith.constant 384 : index
    %114 = vector.load %arg17[%c0_90, %c384_91] : memref<24x1152xbf16, #tpu.memory_space<vmem>>, vector<24x128xbf16>
    tpu.vector_store %arg17[%c0_90, %c384_91], %113 {strides = array<i32>} : memref<24x1152xbf16, #tpu.memory_space<vmem>>, vector<24x128xbf16>,
    %c0_92 = arith.constant 0 : index
    %c8_93 = arith.constant 8 : index
    %c0_94 = arith.constant 0 : index
    %115 = vector.load %arg18[%c0_92, %c8_93, %c0_94] : memref<1x40x128xbf16, #tpu.memory_space<vmem>>, vector<1x24x128xbf16>
    %116 = vector.shape_cast %115 : vector<1x24x128xbf16> to vector<24x128xbf16>
    %c0_95 = arith.constant 0 : index
    %c512_96 = arith.constant 512 : index
    %117 = vector.load %arg17[%c0_95, %c512_96] : memref<24x1152xbf16, #tpu.memory_space<vmem>>, vector<24x128xbf16>
    tpu.vector_store %arg17[%c0_95, %c512_96], %116 {strides = array<i32>} : memref<24x1152xbf16, #tpu.memory_space<vmem>>, vector<24x128xbf16>,
    %c0_97 = arith.constant 0 : index
    %c9 = arith.constant 9 : index
    %c0_98 = arith.constant 0 : index
    %118 = vector.load %arg18[%c0_97, %c9, %c0_98] : memref<1x40x128xbf16, #tpu.memory_space<vmem>>, vector<1x24x128xbf16>
    %119 = vector.shape_cast %118 : vector<1x24x128xbf16> to vector<24x128xbf16>
    %c0_99 = arith.constant 0 : index
    %c640 = arith.constant 640 : index
    %120 = vector.load %arg17[%c0_99, %c640] : memref<24x1152xbf16, #tpu.memory_space<vmem>>, vector<24x128xbf16>
    tpu.vector_store %arg17[%c0_99, %c640], %119 {strides = array<i32>} : memref<24x1152xbf16, #tpu.memory_space<vmem>>, vector<24x128xbf16>,
    %c0_100 = arith.constant 0 : index
    %c13 = arith.constant 13 : index
    %c0_101 = arith.constant 0 : index
    %121 = vector.load %arg18[%c0_100, %c13, %c0_101] : memref<1x40x128xbf16, #tpu.memory_space<vmem>>, vector<1x24x128xbf16>
    %122 = vector.shape_cast %121 : vector<1x24x128xbf16> to vector<24x128xbf16>
    %c0_102 = arith.constant 0 : index
    %c768 = arith.constant 768 : index
    %123 = vector.load %arg17[%c0_102, %c768] : memref<24x1152xbf16, #tpu.memory_space<vmem>>, vector<24x128xbf16>
    tpu.vector_store %arg17[%c0_102, %c768], %122 {strides = array<i32>} : memref<24x1152xbf16, #tpu.memory_space<vmem>>, vector<24x128xbf16>,
    %c0_103 = arith.constant 0 : index
    %c14 = arith.constant 14 : index
    %c0_104 = arith.constant 0 : index
    %124 = vector.load %arg18[%c0_103, %c14, %c0_104] : memref<1x40x128xbf16, #tpu.memory_space<vmem>>, vector<1x24x128xbf16>
    %125 = vector.shape_cast %124 : vector<1x24x128xbf16> to vector<24x128xbf16>
    %c0_105 = arith.constant 0 : index
    %c896 = arith.constant 896 : index
    %126 = vector.load %arg17[%c0_105, %c896] : memref<24x1152xbf16, #tpu.memory_space<vmem>>, vector<24x128xbf16>
    tpu.vector_store %arg17[%c0_105, %c896], %125 {strides = array<i32>} : memref<24x1152xbf16, #tpu.memory_space<vmem>>, vector<24x128xbf16>,
    %c0_106 = arith.constant 0 : index
    %c15 = arith.constant 15 : index
    %c0_107 = arith.constant 0 : index
    %127 = vector.load %arg18[%c0_106, %c15, %c0_107] : memref<1x40x128xbf16, #tpu.memory_space<vmem>>, vector<1x24x128xbf16>
    %128 = vector.shape_cast %127 : vector<1x24x128xbf16> to vector<24x128xbf16>
    %c0_108 = arith.constant 0 : index
    %c1024 = arith.constant 1024 : index
    %129 = vector.load %arg17[%c0_108, %c1024] : memref<24x1152xbf16, #tpu.memory_space<vmem>>, vector<24x128xbf16>
    tpu.vector_store %arg17[%c0_108, %c1024], %128 {strides = array<i32>} : memref<24x1152xbf16, #tpu.memory_space<vmem>>, vector<24x128xbf16>,
    %c0_109 = arith.constant 0 : index
    %c0_110 = arith.constant 0 : index
    %130 = vector.load %arg17[%c0_109, %c0_110] : memref<24x1152xbf16, #tpu.memory_space<vmem>>, vector<24x1152xbf16>
    %c0_111 = arith.constant 0 : index
    %c0_112 = arith.constant 0 : index
    %131 = vector.load %arg7[%c0_111, %c0_112] : memref<1152x128xbf16, #tpu.memory_space<vmem>>, vector<1152x128xbf16>
    %cst_113 = arith.constant dense<0.000000e+00> : vector<24x128xf32>
    %132 = tpu.matmul %130, %131, %cst_113 {dimension_numbers = #tpu.dot_dimension_numbers<[1], [0], [0], [1], [0, 0, 1, 1], [], []>} : vector<24x1152xbf16>, vector<1152x128xbf16>, vector<24x128xf32> -> vector<24x128xf32>
    %c0_114 = arith.constant 0 : index
    %c0_115 = arith.constant 0 : index
    %133 = vector.load %arg8[%c0_114, %c0_115] : memref<1x128xf32, #tpu.memory_space<vmem>>, vector<1x128xf32>
    %134 = vector.broadcast %133 : vector<1x128xf32> to vector<24x128xf32>
    %135 = arith.addf %132, %134 : vector<24x128xf32>
    %cst_116 = arith.constant 2.000000e-01 : f32
    %136 = vector.broadcast %cst_116 : f32 to vector<24x128xf32>
    %137 = arith.mulf %136, %135 : vector<24x128xf32>
    %138 = arith.maximumf %135, %137 : vector<24x128xf32>
    %cst_117 = arith.constant 0.000000e+00 : f32
    %139 = vector.broadcast %cst_117 : f32 to vector<24x128xf32>
    %140 = arith.select %96, %138, %139 : vector<24x128xi1>, vector<24x128xf32>
    %141 = arith.truncf %140 : vector<24x128xf32> to vector<24x128xbf16>
    %c0_118 = arith.constant 0 : index
    %c8_119 = arith.constant 8 : index
    %c0_120 = arith.constant 0 : index
    %142 = vector.load %arg19[%c0_118, %c8_119, %c0_120] : memref<1x40x128xbf16, #tpu.memory_space<vmem>>, vector<1x24x128xbf16>
    %143 = vector.shape_cast %142 : vector<1x24x128xbf16> to vector<24x128xbf16>
    %144 = vector.shape_cast %141 : vector<24x128xbf16> to vector<1x24x128xbf16>
    tpu.vector_store %arg19[%c0_118, %c8_119, %c0_120], %144 {strides = array<i32>} : memref<1x40x128xbf16, #tpu.memory_space<vmem>>, vector<1x24x128xbf16>,
    %c0_121 = arith.constant 0 : index
    %c1_122 = arith.constant 1 : index
    %c0_123 = arith.constant 0 : index
    %145 = vector.load %arg19[%c0_121, %c1_122, %c0_123] : memref<1x40x128xbf16, #tpu.memory_space<vmem>>, vector<1x24x128xbf16>
    %146 = vector.shape_cast %145 : vector<1x24x128xbf16> to vector<24x128xbf16>
    %c0_124 = arith.constant 0 : index
    %c0_125 = arith.constant 0 : index
    %147 = vector.load %arg17[%c0_124, %c0_125] : memref<24x1152xbf16, #tpu.memory_space<vmem>>, vector<24x128xbf16>
    tpu.vector_store %arg17[%c0_124, %c0_125], %146 {strides = array<i32>} : memref<24x1152xbf16, #tpu.memory_space<vmem>>, vector<24x128xbf16>,
    %c0_126 = arith.constant 0 : index
    %c2_127 = arith.constant 2 : index
    %c0_128 = arith.constant 0 : index
    %148 = vector.load %arg19[%c0_126, %c2_127, %c0_128] : memref<1x40x128xbf16, #tpu.memory_space<vmem>>, vector<1x24x128xbf16>
    %149 = vector.shape_cast %148 : vector<1x24x128xbf16> to vector<24x128xbf16>
    %c0_129 = arith.constant 0 : index
    %c128_130 = arith.constant 128 : index
    %150 = vector.load %arg17[%c0_129, %c128_130] : memref<24x1152xbf16, #tpu.memory_space<vmem>>, vector<24x128xbf16>
    tpu.vector_store %arg17[%c0_129, %c128_130], %149 {strides = array<i32>} : memref<24x1152xbf16, #tpu.memory_space<vmem>>, vector<24x128xbf16>,
    %c0_131 = arith.constant 0 : index
    %c3_132 = arith.constant 3 : index
    %c0_133 = arith.constant 0 : index
    %151 = vector.load %arg19[%c0_131, %c3_132, %c0_133] : memref<1x40x128xbf16, #tpu.memory_space<vmem>>, vector<1x24x128xbf16>
    %152 = vector.shape_cast %151 : vector<1x24x128xbf16> to vector<24x128xbf16>
    %c0_134 = arith.constant 0 : index
    %c256_135 = arith.constant 256 : index
    %153 = vector.load %arg17[%c0_134, %c256_135] : memref<24x1152xbf16, #tpu.memory_space<vmem>>, vector<24x128xbf16>
    tpu.vector_store %arg17[%c0_134, %c256_135], %152 {strides = array<i32>} : memref<24x1152xbf16, #tpu.memory_space<vmem>>, vector<24x128xbf16>,
    %c0_136 = arith.constant 0 : index
    %c7_137 = arith.constant 7 : index
    %c0_138 = arith.constant 0 : index
    %154 = vector.load %arg19[%c0_136, %c7_137, %c0_138] : memref<1x40x128xbf16, #tpu.memory_space<vmem>>, vector<1x24x128xbf16>
    %155 = vector.shape_cast %154 : vector<1x24x128xbf16> to vector<24x128xbf16>
    %c0_139 = arith.constant 0 : index
    %c384_140 = arith.constant 384 : index
    %156 = vector.load %arg17[%c0_139, %c384_140] : memref<24x1152xbf16, #tpu.memory_space<vmem>>, vector<24x128xbf16>
    tpu.vector_store %arg17[%c0_139, %c384_140], %155 {strides = array<i32>} : memref<24x1152xbf16, #tpu.memory_space<vmem>>, vector<24x128xbf16>,
    %c0_141 = arith.constant 0 : index
    %c8_142 = arith.constant 8 : index
    %c0_143 = arith.constant 0 : index
    %157 = vector.load %arg19[%c0_141, %c8_142, %c0_143] : memref<1x40x128xbf16, #tpu.memory_space<vmem>>, vector<1x24x128xbf16>
    %158 = vector.shape_cast %157 : vector<1x24x128xbf16> to vector<24x128xbf16>
    %c0_144 = arith.constant 0 : index
    %c512_145 = arith.constant 512 : index
    %159 = vector.load %arg17[%c0_144, %c512_145] : memref<24x1152xbf16, #tpu.memory_space<vmem>>, vector<24x128xbf16>
    tpu.vector_store %arg17[%c0_144, %c512_145], %158 {strides = array<i32>} : memref<24x1152xbf16, #tpu.memory_space<vmem>>, vector<24x128xbf16>,
    %c0_146 = arith.constant 0 : index
    %c9_147 = arith.constant 9 : index
    %c0_148 = arith.constant 0 : index
    %160 = vector.load %arg19[%c0_146, %c9_147, %c0_148] : memref<1x40x128xbf16, #tpu.memory_space<vmem>>, vector<1x24x128xbf16>
    %161 = vector.shape_cast %160 : vector<1x24x128xbf16> to vector<24x128xbf16>
    %c0_149 = arith.constant 0 : index
    %c640_150 = arith.constant 640 : index
    %162 = vector.load %arg17[%c0_149, %c640_150] : memref<24x1152xbf16, #tpu.memory_space<vmem>>, vector<24x128xbf16>
    tpu.vector_store %arg17[%c0_149, %c640_150], %161 {strides = array<i32>} : memref<24x1152xbf16, #tpu.memory_space<vmem>>, vector<24x128xbf16>,
    %c0_151 = arith.constant 0 : index
    %c13_152 = arith.constant 13 : index
    %c0_153 = arith.constant 0 : index
    %163 = vector.load %arg19[%c0_151, %c13_152, %c0_153] : memref<1x40x128xbf16, #tpu.memory_space<vmem>>, vector<1x24x128xbf16>
    %164 = vector.shape_cast %163 : vector<1x24x128xbf16> to vector<24x128xbf16>
    %c0_154 = arith.constant 0 : index
    %c768_155 = arith.constant 768 : index
    %165 = vector.load %arg17[%c0_154, %c768_155] : memref<24x1152xbf16, #tpu.memory_space<vmem>>, vector<24x128xbf16>
    tpu.vector_store %arg17[%c0_154, %c768_155], %164 {strides = array<i32>} : memref<24x1152xbf16, #tpu.memory_space<vmem>>, vector<24x128xbf16>,
    %c0_156 = arith.constant 0 : index
    %c14_157 = arith.constant 14 : index
    %c0_158 = arith.constant 0 : index
    %166 = vector.load %arg19[%c0_156, %c14_157, %c0_158] : memref<1x40x128xbf16, #tpu.memory_space<vmem>>, vector<1x24x128xbf16>
    %167 = vector.shape_cast %166 : vector<1x24x128xbf16> to vector<24x128xbf16>
    %c0_159 = arith.constant 0 : index
    %c896_160 = arith.constant 896 : index
    %168 = vector.load %arg17[%c0_159, %c896_160] : memref<24x1152xbf16, #tpu.memory_space<vmem>>, vector<24x128xbf16>
    tpu.vector_store %arg17[%c0_159, %c896_160], %167 {strides = array<i32>} : memref<24x1152xbf16, #tpu.memory_space<vmem>>, vector<24x128xbf16>,
    %c0_161 = arith.constant 0 : index
    %c15_162 = arith.constant 15 : index
    %c0_163 = arith.constant 0 : index
    %169 = vector.load %arg19[%c0_161, %c15_162, %c0_163] : memref<1x40x128xbf16, #tpu.memory_space<vmem>>, vector<1x24x128xbf16>
    %170 = vector.shape_cast %169 : vector<1x24x128xbf16> to vector<24x128xbf16>
    %c0_164 = arith.constant 0 : index
    %c1024_165 = arith.constant 1024 : index
    %171 = vector.load %arg17[%c0_164, %c1024_165] : memref<24x1152xbf16, #tpu.memory_space<vmem>>, vector<24x128xbf16>
    tpu.vector_store %arg17[%c0_164, %c1024_165], %170 {strides = array<i32>} : memref<24x1152xbf16, #tpu.memory_space<vmem>>, vector<24x128xbf16>,
    %c0_166 = arith.constant 0 : index
    %c0_167 = arith.constant 0 : index
    %172 = vector.load %arg17[%c0_166, %c0_167] : memref<24x1152xbf16, #tpu.memory_space<vmem>>, vector<24x1152xbf16>
    %c0_168 = arith.constant 0 : index
    %c0_169 = arith.constant 0 : index
    %173 = vector.load %arg9[%c0_168, %c0_169] : memref<1152x128xbf16, #tpu.memory_space<vmem>>, vector<1152x128xbf16>
    %cst_170 = arith.constant dense<0.000000e+00> : vector<24x128xf32>
    %174 = tpu.matmul %172, %173, %cst_170 {dimension_numbers = #tpu.dot_dimension_numbers<[1], [0], [0], [1], [0, 0, 1, 1], [], []>} : vector<24x1152xbf16>, vector<1152x128xbf16>, vector<24x128xf32> -> vector<24x128xf32>
    %c0_171 = arith.constant 0 : index
    %c0_172 = arith.constant 0 : index
    %175 = vector.load %arg10[%c0_171, %c0_172] : memref<1x128xf32, #tpu.memory_space<vmem>>, vector<1x128xf32>
    %176 = vector.broadcast %175 : vector<1x128xf32> to vector<24x128xf32>
    %177 = arith.addf %174, %176 : vector<24x128xf32>
    %178 = arith.addf %63, %177 : vector<24x128xf32>
    %cst_173 = arith.constant 0.000000e+00 : f32
    %179 = vector.broadcast %cst_173 : f32 to vector<24x128xf32>
    %180 = arith.select %96, %178, %179 : vector<24x128xi1>, vector<24x128xf32>
    %181 = arith.truncf %180 : vector<24x128xf32> to vector<24x128xbf16>
    %c0_174 = arith.constant 0 : index
    %c8_175 = arith.constant 8 : index
    %c0_176 = arith.constant 0 : index
    %182 = vector.load %arg18[%c0_174, %c8_175, %c0_176] : memref<1x40x128xbf16, #tpu.memory_space<vmem>>, vector<1x24x128xbf16>
    %183 = vector.shape_cast %182 : vector<1x24x128xbf16> to vector<24x128xbf16>
    %184 = vector.shape_cast %181 : vector<24x128xbf16> to vector<1x24x128xbf16>
    tpu.vector_store %arg18[%c0_174, %c8_175, %c0_176], %184 {strides = array<i32>} : memref<1x40x128xbf16, #tpu.memory_space<vmem>>, vector<1x24x128xbf16>,
    %c0_177 = arith.constant 0 : index
    %c1_178 = arith.constant 1 : index
    %c0_179 = arith.constant 0 : index
    %185 = vector.load %arg18[%c0_177, %c1_178, %c0_179] : memref<1x40x128xbf16, #tpu.memory_space<vmem>>, vector<1x24x128xbf16>
    %186 = vector.shape_cast %185 : vector<1x24x128xbf16> to vector<24x128xbf16>
    %c0_180 = arith.constant 0 : index
    %c0_181 = arith.constant 0 : index
    %187 = vector.load %arg17[%c0_180, %c0_181] : memref<24x1152xbf16, #tpu.memory_space<vmem>>, vector<24x128xbf16>
    tpu.vector_store %arg17[%c0_180, %c0_181], %186 {strides = array<i32>} : memref<24x1152xbf16, #tpu.memory_space<vmem>>, vector<24x128xbf16>,
    %c0_182 = arith.constant 0 : index
    %c2_183 = arith.constant 2 : index
    %c0_184 = arith.constant 0 : index
    %188 = vector.load %arg18[%c0_182, %c2_183, %c0_184] : memref<1x40x128xbf16, #tpu.memory_space<vmem>>, vector<1x24x128xbf16>
    %189 = vector.shape_cast %188 : vector<1x24x128xbf16> to vector<24x128xbf16>
    %c0_185 = arith.constant 0 : index
    %c128_186 = arith.constant 128 : index
    %190 = vector.load %arg17[%c0_185, %c128_186] : memref<24x1152xbf16, #tpu.memory_space<vmem>>, vector<24x128xbf16>
    tpu.vector_store %arg17[%c0_185, %c128_186], %189 {strides = array<i32>} : memref<24x1152xbf16, #tpu.memory_space<vmem>>, vector<24x128xbf16>,
    %c0_187 = arith.constant 0 : index
    %c3_188 = arith.constant 3 : index
    %c0_189 = arith.constant 0 : index
    %191 = vector.load %arg18[%c0_187, %c3_188, %c0_189] : memref<1x40x128xbf16, #tpu.memory_space<vmem>>, vector<1x24x128xbf16>
    %192 = vector.shape_cast %191 : vector<1x24x128xbf16> to vector<24x128xbf16>
    %c0_190 = arith.constant 0 : index
    %c256_191 = arith.constant 256 : index
    %193 = vector.load %arg17[%c0_190, %c256_191] : memref<24x1152xbf16, #tpu.memory_space<vmem>>, vector<24x128xbf16>
    tpu.vector_store %arg17[%c0_190, %c256_191], %192 {strides = array<i32>} : memref<24x1152xbf16, #tpu.memory_space<vmem>>, vector<24x128xbf16>,
    %c0_192 = arith.constant 0 : index
    %c7_193 = arith.constant 7 : index
    %c0_194 = arith.constant 0 : index
    %194 = vector.load %arg18[%c0_192, %c7_193, %c0_194] : memref<1x40x128xbf16, #tpu.memory_space<vmem>>, vector<1x24x128xbf16>
    %195 = vector.shape_cast %194 : vector<1x24x128xbf16> to vector<24x128xbf16>
    %c0_195 = arith.constant 0 : index
    %c384_196 = arith.constant 384 : index
    %196 = vector.load %arg17[%c0_195, %c384_196] : memref<24x1152xbf16, #tpu.memory_space<vmem>>, vector<24x128xbf16>
    tpu.vector_store %arg17[%c0_195, %c384_196], %195 {strides = array<i32>} : memref<24x1152xbf16, #tpu.memory_space<vmem>>, vector<24x128xbf16>,
    %c0_197 = arith.constant 0 : index
    %c8_198 = arith.constant 8 : index
    %c0_199 = arith.constant 0 : index
    %197 = vector.load %arg18[%c0_197, %c8_198, %c0_199] : memref<1x40x128xbf16, #tpu.memory_space<vmem>>, vector<1x24x128xbf16>
    %198 = vector.shape_cast %197 : vector<1x24x128xbf16> to vector<24x128xbf16>
    %c0_200 = arith.constant 0 : index
    %c512_201 = arith.constant 512 : index
    %199 = vector.load %arg17[%c0_200, %c512_201] : memref<24x1152xbf16, #tpu.memory_space<vmem>>, vector<24x128xbf16>
    tpu.vector_store %arg17[%c0_200, %c512_201], %198 {strides = array<i32>} : memref<24x1152xbf16, #tpu.memory_space<vmem>>, vector<24x128xbf16>,
    %c0_202 = arith.constant 0 : index
    %c9_203 = arith.constant 9 : index
    %c0_204 = arith.constant 0 : index
    %200 = vector.load %arg18[%c0_202, %c9_203, %c0_204] : memref<1x40x128xbf16, #tpu.memory_space<vmem>>, vector<1x24x128xbf16>
    %201 = vector.shape_cast %200 : vector<1x24x128xbf16> to vector<24x128xbf16>
    %c0_205 = arith.constant 0 : index
    %c640_206 = arith.constant 640 : index
    %202 = vector.load %arg17[%c0_205, %c640_206] : memref<24x1152xbf16, #tpu.memory_space<vmem>>, vector<24x128xbf16>
    tpu.vector_store %arg17[%c0_205, %c640_206], %201 {strides = array<i32>} : memref<24x1152xbf16, #tpu.memory_space<vmem>>, vector<24x128xbf16>,
    %c0_207 = arith.constant 0 : index
    %c13_208 = arith.constant 13 : index
    %c0_209 = arith.constant 0 : index
    %203 = vector.load %arg18[%c0_207, %c13_208, %c0_209] : memref<1x40x128xbf16, #tpu.memory_space<vmem>>, vector<1x24x128xbf16>
    %204 = vector.shape_cast %203 : vector<1x24x128xbf16> to vector<24x128xbf16>
    %c0_210 = arith.constant 0 : index
    %c768_211 = arith.constant 768 : index
    %205 = vector.load %arg17[%c0_210, %c768_211] : memref<24x1152xbf16, #tpu.memory_space<vmem>>, vector<24x128xbf16>
    tpu.vector_store %arg17[%c0_210, %c768_211], %204 {strides = array<i32>} : memref<24x1152xbf16, #tpu.memory_space<vmem>>, vector<24x128xbf16>,
    %c0_212 = arith.constant 0 : index
    %c14_213 = arith.constant 14 : index
    %c0_214 = arith.constant 0 : index
    %206 = vector.load %arg18[%c0_212, %c14_213, %c0_214] : memref<1x40x128xbf16, #tpu.memory_space<vmem>>, vector<1x24x128xbf16>
    %207 = vector.shape_cast %206 : vector<1x24x128xbf16> to vector<24x128xbf16>
    %c0_215 = arith.constant 0 : index
    %c896_216 = arith.constant 896 : index
    %208 = vector.load %arg17[%c0_215, %c896_216] : memref<24x1152xbf16, #tpu.memory_space<vmem>>, vector<24x128xbf16>
    tpu.vector_store %arg17[%c0_215, %c896_216], %207 {strides = array<i32>} : memref<24x1152xbf16, #tpu.memory_space<vmem>>, vector<24x128xbf16>,
    %c0_217 = arith.constant 0 : index
    %c15_218 = arith.constant 15 : index
    %c0_219 = arith.constant 0 : index
    %209 = vector.load %arg18[%c0_217, %c15_218, %c0_219] : memref<1x40x128xbf16, #tpu.memory_space<vmem>>, vector<1x24x128xbf16>
    %210 = vector.shape_cast %209 : vector<1x24x128xbf16> to vector<24x128xbf16>
    %c0_220 = arith.constant 0 : index
    %c1024_221 = arith.constant 1024 : index
    %211 = vector.load %arg17[%c0_220, %c1024_221] : memref<24x1152xbf16, #tpu.memory_space<vmem>>, vector<24x128xbf16>
    tpu.vector_store %arg17[%c0_220, %c1024_221], %210 {strides = array<i32>} : memref<24x1152xbf16, #tpu.memory_space<vmem>>, vector<24x128xbf16>,
    %c0_222 = arith.constant 0 : index
    %c0_223 = arith.constant 0 : index
    %212 = vector.load %arg17[%c0_222, %c0_223] : memref<24x1152xbf16, #tpu.memory_space<vmem>>, vector<24x1152xbf16>
    %c0_224 = arith.constant 0 : index
    %c0_225 = arith.constant 0 : index
    %213 = vector.load %arg11[%c0_224, %c0_225] : memref<1152x128xbf16, #tpu.memory_space<vmem>>, vector<1152x128xbf16>
    %cst_226 = arith.constant dense<0.000000e+00> : vector<24x128xf32>
    %214 = tpu.matmul %212, %213, %cst_226 {dimension_numbers = #tpu.dot_dimension_numbers<[1], [0], [0], [1], [0, 0, 1, 1], [], []>} : vector<24x1152xbf16>, vector<1152x128xbf16>, vector<24x128xf32> -> vector<24x128xf32>
    %c0_227 = arith.constant 0 : index
    %c0_228 = arith.constant 0 : index
    %215 = vector.load %arg12[%c0_227, %c0_228] : memref<1x128xf32, #tpu.memory_space<vmem>>, vector<1x128xf32>
    %216 = vector.broadcast %215 : vector<1x128xf32> to vector<24x128xf32>
    %217 = arith.addf %214, %216 : vector<24x128xf32>
    %cst_229 = arith.constant 2.000000e-01 : f32
    %218 = vector.broadcast %cst_229 : f32 to vector<24x128xf32>
    %219 = arith.mulf %218, %217 : vector<24x128xf32>
    %220 = arith.maximumf %217, %219 : vector<24x128xf32>
    %cst_230 = arith.constant 0.000000e+00 : f32
    %221 = vector.broadcast %cst_230 : f32 to vector<24x128xf32>
    %222 = arith.select %96, %220, %221 : vector<24x128xi1>, vector<24x128xf32>
    %223 = arith.truncf %222 : vector<24x128xf32> to vector<24x128xbf16>
    %c0_231 = arith.constant 0 : index
    %c8_232 = arith.constant 8 : index
    %c0_233 = arith.constant 0 : index
    %224 = vector.load %arg19[%c0_231, %c8_232, %c0_233] : memref<1x40x128xbf16, #tpu.memory_space<vmem>>, vector<1x24x128xbf16>
    %225 = vector.shape_cast %224 : vector<1x24x128xbf16> to vector<24x128xbf16>
    %226 = vector.shape_cast %223 : vector<24x128xbf16> to vector<1x24x128xbf16>
    tpu.vector_store %arg19[%c0_231, %c8_232, %c0_233], %226 {strides = array<i32>} : memref<1x40x128xbf16, #tpu.memory_space<vmem>>, vector<1x24x128xbf16>,
    %c0_234 = arith.constant 0 : index
    %c1_235 = arith.constant 1 : index
    %c0_236 = arith.constant 0 : index
    %227 = vector.load %arg19[%c0_234, %c1_235, %c0_236] : memref<1x40x128xbf16, #tpu.memory_space<vmem>>, vector<1x24x128xbf16>
    %228 = vector.shape_cast %227 : vector<1x24x128xbf16> to vector<24x128xbf16>
    %c0_237 = arith.constant 0 : index
    %c0_238 = arith.constant 0 : index
    %229 = vector.load %arg17[%c0_237, %c0_238] : memref<24x1152xbf16, #tpu.memory_space<vmem>>, vector<24x128xbf16>
    tpu.vector_store %arg17[%c0_237, %c0_238], %228 {strides = array<i32>} : memref<24x1152xbf16, #tpu.memory_space<vmem>>, vector<24x128xbf16>,
    %c0_239 = arith.constant 0 : index
    %c2_240 = arith.constant 2 : index
    %c0_241 = arith.constant 0 : index
    %230 = vector.load %arg19[%c0_239, %c2_240, %c0_241] : memref<1x40x128xbf16, #tpu.memory_space<vmem>>, vector<1x24x128xbf16>
    %231 = vector.shape_cast %230 : vector<1x24x128xbf16> to vector<24x128xbf16>
    %c0_242 = arith.constant 0 : index
    %c128_243 = arith.constant 128 : index
    %232 = vector.load %arg17[%c0_242, %c128_243] : memref<24x1152xbf16, #tpu.memory_space<vmem>>, vector<24x128xbf16>
    tpu.vector_store %arg17[%c0_242, %c128_243], %231 {strides = array<i32>} : memref<24x1152xbf16, #tpu.memory_space<vmem>>, vector<24x128xbf16>,
    %c0_244 = arith.constant 0 : index
    %c3_245 = arith.constant 3 : index
    %c0_246 = arith.constant 0 : index
    %233 = vector.load %arg19[%c0_244, %c3_245, %c0_246] : memref<1x40x128xbf16, #tpu.memory_space<vmem>>, vector<1x24x128xbf16>
    %234 = vector.shape_cast %233 : vector<1x24x128xbf16> to vector<24x128xbf16>
    %c0_247 = arith.constant 0 : index
    %c256_248 = arith.constant 256 : index
    %235 = vector.load %arg17[%c0_247, %c256_248] : memref<24x1152xbf16, #tpu.memory_space<vmem>>, vector<24x128xbf16>
    tpu.vector_store %arg17[%c0_247, %c256_248], %234 {strides = array<i32>} : memref<24x1152xbf16, #tpu.memory_space<vmem>>, vector<24x128xbf16>,
    %c0_249 = arith.constant 0 : index
    %c7_250 = arith.constant 7 : index
    %c0_251 = arith.constant 0 : index
    %236 = vector.load %arg19[%c0_249, %c7_250, %c0_251] : memref<1x40x128xbf16, #tpu.memory_space<vmem>>, vector<1x24x128xbf16>
    %237 = vector.shape_cast %236 : vector<1x24x128xbf16> to vector<24x128xbf16>
    %c0_252 = arith.constant 0 : index
    %c384_253 = arith.constant 384 : index
    %238 = vector.load %arg17[%c0_252, %c384_253] : memref<24x1152xbf16, #tpu.memory_space<vmem>>, vector<24x128xbf16>
    tpu.vector_store %arg17[%c0_252, %c384_253], %237 {strides = array<i32>} : memref<24x1152xbf16, #tpu.memory_space<vmem>>, vector<24x128xbf16>,
    %c0_254 = arith.constant 0 : index
    %c8_255 = arith.constant 8 : index
    %c0_256 = arith.constant 0 : index
    %239 = vector.load %arg19[%c0_254, %c8_255, %c0_256] : memref<1x40x128xbf16, #tpu.memory_space<vmem>>, vector<1x24x128xbf16>
    %240 = vector.shape_cast %239 : vector<1x24x128xbf16> to vector<24x128xbf16>
    %c0_257 = arith.constant 0 : index
    %c512_258 = arith.constant 512 : index
    %241 = vector.load %arg17[%c0_257, %c512_258] : memref<24x1152xbf16, #tpu.memory_space<vmem>>, vector<24x128xbf16>
    tpu.vector_store %arg17[%c0_257, %c512_258], %240 {strides = array<i32>} : memref<24x1152xbf16, #tpu.memory_space<vmem>>, vector<24x128xbf16>,
    %c0_259 = arith.constant 0 : index
    %c9_260 = arith.constant 9 : index
    %c0_261 = arith.constant 0 : index
    %242 = vector.load %arg19[%c0_259, %c9_260, %c0_261] : memref<1x40x128xbf16, #tpu.memory_space<vmem>>, vector<1x24x128xbf16>
    %243 = vector.shape_cast %242 : vector<1x24x128xbf16> to vector<24x128xbf16>
    %c0_262 = arith.constant 0 : index
    %c640_263 = arith.constant 640 : index
    %244 = vector.load %arg17[%c0_262, %c640_263] : memref<24x1152xbf16, #tpu.memory_space<vmem>>, vector<24x128xbf16>
    tpu.vector_store %arg17[%c0_262, %c640_263], %243 {strides = array<i32>} : memref<24x1152xbf16, #tpu.memory_space<vmem>>, vector<24x128xbf16>,
    %c0_264 = arith.constant 0 : index
    %c13_265 = arith.constant 13 : index
    %c0_266 = arith.constant 0 : index
    %245 = vector.load %arg19[%c0_264, %c13_265, %c0_266] : memref<1x40x128xbf16, #tpu.memory_space<vmem>>, vector<1x24x128xbf16>
    %246 = vector.shape_cast %245 : vector<1x24x128xbf16> to vector<24x128xbf16>
    %c0_267 = arith.constant 0 : index
    %c768_268 = arith.constant 768 : index
    %247 = vector.load %arg17[%c0_267, %c768_268] : memref<24x1152xbf16, #tpu.memory_space<vmem>>, vector<24x128xbf16>
    tpu.vector_store %arg17[%c0_267, %c768_268], %246 {strides = array<i32>} : memref<24x1152xbf16, #tpu.memory_space<vmem>>, vector<24x128xbf16>,
    %c0_269 = arith.constant 0 : index
    %c14_270 = arith.constant 14 : index
    %c0_271 = arith.constant 0 : index
    %248 = vector.load %arg19[%c0_269, %c14_270, %c0_271] : memref<1x40x128xbf16, #tpu.memory_space<vmem>>, vector<1x24x128xbf16>
    %249 = vector.shape_cast %248 : vector<1x24x128xbf16> to vector<24x128xbf16>
    %c0_272 = arith.constant 0 : index
    %c896_273 = arith.constant 896 : index
    %250 = vector.load %arg17[%c0_272, %c896_273] : memref<24x1152xbf16, #tpu.memory_space<vmem>>, vector<24x128xbf16>
    tpu.vector_store %arg17[%c0_272, %c896_273], %249 {strides = array<i32>} : memref<24x1152xbf16, #tpu.memory_space<vmem>>, vector<24x128xbf16>,
    %c0_274 = arith.constant 0 : index
    %c15_275 = arith.constant 15 : index
    %c0_276 = arith.constant 0 : index
    %251 = vector.load %arg19[%c0_274, %c15_275, %c0_276] : memref<1x40x128xbf16, #tpu.memory_space<vmem>>, vector<1x24x128xbf16>
    %252 = vector.shape_cast %251 : vector<1x24x128xbf16> to vector<24x128xbf16>
    %c0_277 = arith.constant 0 : index
    %c1024_278 = arith.constant 1024 : index
    %253 = vector.load %arg17[%c0_277, %c1024_278] : memref<24x1152xbf16, #tpu.memory_space<vmem>>, vector<24x128xbf16>
    tpu.vector_store %arg17[%c0_277, %c1024_278], %252 {strides = array<i32>} : memref<24x1152xbf16, #tpu.memory_space<vmem>>, vector<24x128xbf16>,
    %c0_279 = arith.constant 0 : index
    %c0_280 = arith.constant 0 : index
    %254 = vector.load %arg17[%c0_279, %c0_280] : memref<24x1152xbf16, #tpu.memory_space<vmem>>, vector<24x1152xbf16>
    %c0_281 = arith.constant 0 : index
    %c0_282 = arith.constant 0 : index
    %255 = vector.load %arg13[%c0_281, %c0_282] : memref<1152x128xbf16, #tpu.memory_space<vmem>>, vector<1152x128xbf16>
    %cst_283 = arith.constant dense<0.000000e+00> : vector<24x128xf32>
    %256 = tpu.matmul %254, %255, %cst_283 {dimension_numbers = #tpu.dot_dimension_numbers<[1], [0], [0], [1], [0, 0, 1, 1], [], []>} : vector<24x1152xbf16>, vector<1152x128xbf16>, vector<24x128xf32> -> vector<24x128xf32>
    %c0_284 = arith.constant 0 : index
    %c0_285 = arith.constant 0 : index
    %257 = vector.load %arg14[%c0_284, %c0_285] : memref<1x128xf32, #tpu.memory_space<vmem>>, vector<1x128xf32>
    %258 = vector.broadcast %257 : vector<1x128xf32> to vector<24x128xf32>
    %259 = arith.addf %256, %258 : vector<24x128xf32>
    %260 = arith.addf %178, %259 : vector<24x128xf32>
    %c0_286 = arith.constant 0 : index
    %c0_287 = arith.constant 0 : index
    %261 = vector.load %arg15[%c0_286, %c0_287] : memref<24x128xf32, #tpu.memory_space<vmem>>, vector<24x128xf32>
    tpu.vector_store %arg15[%c0_286, %c0_287], %260 {strides = array<i32>} : memref<24x128xf32, #tpu.memory_space<vmem>>, vector<24x128xf32>,
    return
  }
  func.func @transform_0(%arg0: i32) -> (i32, i32) {
    %c0_i32 = arith.constant 0 : i32
    %c0_i32_0 = arith.constant 0 : i32
    return %arg0, %c0_i32 : i32, i32
  }
  func.func @transform_1(%arg0: i32) -> (i32, i32, i32) {
    %c0_i32 = arith.constant 0 : i32
    %c0_i32_0 = arith.constant 0 : i32
    %c0_i32_1 = arith.constant 0 : i32
    %c0_i32_2 = arith.constant 0 : i32
    return %c0_i32, %c0_i32_0, %c0_i32_1 : i32, i32, i32
  }
  func.func @transform_2(%arg0: i32) -> (i32, i32) {
    %c0_i32 = arith.constant 0 : i32
    %c0_i32_0 = arith.constant 0 : i32
    %c0_i32_1 = arith.constant 0 : i32
    return %c0_i32, %c0_i32_0 : i32, i32
  }
  func.func @transform_3(%arg0: i32) -> (i32, i32) {
    %c0_i32 = arith.constant 0 : i32
    %c0_i32_0 = arith.constant 0 : i32
    %c0_i32_1 = arith.constant 0 : i32
    return %c0_i32, %c0_i32_0 : i32, i32
  }
  func.func @transform_4(%arg0: i32) -> (i32, i32) {
    %c0_i32 = arith.constant 0 : i32
    %c0_i32_0 = arith.constant 0 : i32
    %c0_i32_1 = arith.constant 0 : i32
    return %c0_i32, %c0_i32_0 : i32, i32
  }
  func.func @transform_5(%arg0: i32) -> (i32, i32) {
    %c0_i32 = arith.constant 0 : i32
    %c0_i32_0 = arith.constant 0 : i32
    %c0_i32_1 = arith.constant 0 : i32
    return %c0_i32, %c0_i32_0 : i32, i32
  }
  func.func @transform_6(%arg0: i32) -> (i32, i32) {
    %c0_i32 = arith.constant 0 : i32
    %c0_i32_0 = arith.constant 0 : i32
    %c0_i32_1 = arith.constant 0 : i32
    return %c0_i32, %c0_i32_0 : i32, i32
  }
  func.func @transform_7(%arg0: i32) -> (i32, i32) {
    %c0_i32 = arith.constant 0 : i32
    %c0_i32_0 = arith.constant 0 : i32
    %c0_i32_1 = arith.constant 0 : i32
    return %c0_i32, %c0_i32_0 : i32, i32
  }
  func.func @transform_8(%arg0: i32) -> (i32, i32) {
    %c0_i32 = arith.constant 0 : i32
    %c0_i32_0 = arith.constant 0 : i32
    %c0_i32_1 = arith.constant 0 : i32
    return %c0_i32, %c0_i32_0 : i32, i32
  }
  func.func @transform_9(%arg0: i32) -> (i32, i32) {
    %c0_i32 = arith.constant 0 : i32
    %c0_i32_0 = arith.constant 0 : i32
    %c0_i32_1 = arith.constant 0 : i32
    return %c0_i32, %c0_i32_0 : i32, i32
  }
  func.func @transform_10(%arg0: i32) -> (i32, i32) {
    %c0_i32 = arith.constant 0 : i32
    %c0_i32_0 = arith.constant 0 : i32
    %c0_i32_1 = arith.constant 0 : i32
    return %c0_i32, %c0_i32_0 : i32, i32
  }
  func.func @transform_11(%arg0: i32) -> (i32, i32) {
    %c0_i32 = arith.constant 0 : i32
    %c0_i32_0 = arith.constant 0 : i32
    %c0_i32_1 = arith.constant 0 : i32
    return %c0_i32, %c0_i32_0 : i32, i32
  }
  func.func @transform_12(%arg0: i32) -> (i32, i32) {
    %c0_i32 = arith.constant 0 : i32
    %c0_i32_0 = arith.constant 0 : i32
    %c0_i32_1 = arith.constant 0 : i32
    return %c0_i32, %c0_i32_0 : i32, i32
  }
  func.func @transform_13(%arg0: i32) -> (i32, i32) {
    %c0_i32 = arith.constant 0 : i32
    %c0_i32_0 = arith.constant 0 : i32
    %c0_i32_1 = arith.constant 0 : i32
    return %c0_i32, %c0_i32_0 : i32, i32
  }
  func.func @transform_14(%arg0: i32) -> (i32, i32) {
    %c0_i32 = arith.constant 0 : i32
    %c0_i32_0 = arith.constant 0 : i32
    return %arg0, %c0_i32 : i32, i32
  }
}

</mosaic_0001>

<bundles_post_ra>
// kernel: discriminator_forward.3
= control target key start
LH: loop header
LB: loop body
LE: loop exit
PB: predicated region body
PF: predicated region fallthrough
CT: control target
= control target key end

     0   :  { %s9039_s29 = smov 0   ;;  %s10793_s0 = inlined_call_operand.vmem [shape: bf16[128,32], index: 0, kind: input, shape index: {}]   ;;  %s10794_s1 = inlined_call_operand.vmem [shape: bf16[9,24,64], index: 1, kind: input, shape index: {}]   ;;  %s10795_s2 = inlined_call_operand.vmem [shape: bf16[32,64], index: 2, kind: input, shape index: {}]   ;;  %s10796_s3 = inlined_call_operand.vmem [shape: f32[1,64], index: 3, kind: input, shape index: {}]   ;;  %s10797_s4 = inlined_call_operand.vmem [shape: bf16[576,128], index: 4, kind: input, shape index: {}]   ;;  %s10798_s5 = inlined_call_operand.vmem [shape: f32[1,128], index: 5, kind: input, shape index: {}]   ;;  %s10799_s6 = inlined_call_operand.vmem [shape: bf16[1152,128], index: 6, kind: input, shape index: {}]   ;;  %s10800_s7 = inlined_call_operand.vmem [shape: f32[1,128], index: 7, kind: input, shape index: {}]   ;;  %s10801_s8 = inlined_call_operand.vmem [shape: bf16[1152,128], index: 8, kind: input, shape index: {}]   ;;  %s10802_s9 = inlined_call_operand.vmem [shape: f32[1,128], index: 9, kind: input, shape index: {}]   ;;  %s10803_s10 = inlined_call_operand.vmem [shape: bf16[1152,128], index: 10, kind: input, shape index: {}]   ;;  %s10804_s11 = inlined_call_operand.vmem [shape: f32[1,128], index: 11, kind: input, shape index: {}]   ;;  %s10805_s12 = inlined_call_operand.vmem [shape: bf16[1152,128], index: 12, kind: input, shape index: {}]   ;;  %s10806_s13 = inlined_call_operand.vmem [shape: f32[1,128], index: 13, kind: input, shape index: {}]   ;;  %s10807_s14 = inlined_call_operand.vmem [shape: f32[48,128], index: 14, kind: output, shape index: {}]  }
   0x1 LB: > { %s7061_s30 = sadd.s32 4294967295, %s8960_s29   ;;  %p7065_p0 = scmp.ge.s32.totalorder %s8960_s29, 1  ;;  %s8960_s29 = sphi %s9039_s29, %s24_s29  }
   0x2   : > { %p413_p1 = scmp.lt.s32.totalorder %s8960_s29, 3 }
   0x4   : > { %p414_p2 = pnand %p7065_p0, %p413_p1 }
   0x5   : > { %v8511_v0 = vld [vmem:[%s10795_s2] sm:$0xff] (!%p414_p2)   ;;  %s7066_s17 = sshll.u32 (!%p414_p2), %s7061_s30, 3  ;;  %v8512_v1 = vld [vmem:[%s10795_s2 + $0x8] sm:$0xff] (!%p414_p2)   ;;  %vm523_vm0 = vcmask (!%p414_p2), 261120   ;;  %vm632_vm1 = vcmask (!%p414_p2), 523264   ;;  %v8522_v48 = vld [vmem:[%s10794_s1 + $0x18] sm:$0xff] (!%p414_p2)  }
   0x6   : > { %417 = sbr.rel (%p414_p2) target bundleno = 2149 (0x865), region = 76  ;;  %p460_p3 = scmp.lt.s32.totalorder (!%p414_p2), %s7066_s17, 15  ;;  %8283 = vmatprep.subr.bf16.mxu0 (!%p414_p2), %v8511_v0  ;;  %v8517_v6 = vld [vmem:[%s10794_s1 + $0xc] sm:$0xff] (!%p414_p2)   ;;  %v8518_v7 = vld [vmem:[%s10794_s1] sm:$0xff] (!%p414_p2)   ;;  %v8519_v45 = vld [vmem:[%s10794_s1 + $0x14] ss:$0 sps:$4 sm:$0xff] (!%p414_p2)  }
   0x7   : > { %8284 = vmatpush3.bf16.msra.mxu0 (!%p414_p2), %v8511_v0  ;;  %8303 = vmatprep.mubr.msk.bf16.mxu1 (!%p414_p2), %vm632_vm1, %v8518_v7  ;;  %v7069_v8 = vld [vmem:[%s10796_s3] ss:$0 sm:$0xff] (!%p414_p2)  ;;  %v8520_v46 = vld [vmem:[%s10794_s1 + $0x8] ss:$0 sps:$4 sm:$0xff] (!%p414_p2)   ;;  %v8523_v49 = vld [vmem:[%s10794_s1 + $0x2c] ss:$0 sps:$4 sm:$0xff] (!%p414_p2)  }
   0x8   : > { %8285 = vmatprep.subr.bf16.mxu0 (!%p414_p2), %v8512_v1  ;;  %v8521_v47 = vld [vmem:[%s10794_s1 + $0x24] sm:$0xff] (!%p414_p2)   ;;  %v8524_v50 = vld [vmem:[%s10794_s1 + $0x20] ss:$0 sps:$4 sm:$0xff] (!%p414_p2)   ;;  %v8526_v52 = vld [vmem:[%s10794_s1 + $0x30] sm:$0xff] (!%p414_p2)   ;;  %vm700_vm2 = vcmask (!%p414_p2), 519168   ;;  %vm789_vm3 = vcmask (!%p414_p2), 1043968  }
   0x9   : > { %v8525_v51 = vld [vmem:[%s10794_s1 + $0x3c] sm:$0xff] (!%p414_p2)   ;;  %v8527_v53 = vld [vmem:[%s10794_s1 + $0x44] ss:$0 sps:$4 sm:$0xff] (!%p414_p2)   ;;  %v8528_v54 = vld [vmem:[%s10794_s1 + $0x38] ss:$0 sps:$4 sm:$0xff] (!%p414_p2)   ;;  %s465_s24 = smul.u32 (!%p414_p2), 3, %s7061_s30 }
   0xa   : > { %v8529_v55 = vld [vmem:[%s10794_s1 + $0x54] sm:$0xff] (!%p414_p2)   ;;  %v8530_v56 = vld [vmem:[%s10794_s1 + $0x48] sm:$0xff] (!%p414_p2)   ;;  %v8531_v57 = vld [vmem:[%s10794_s1 + $0x5c] ss:$0 sps:$4 sm:$0xff] (!%p414_p2)   ;;  %vm1969_vm14 = vsmask.f32 (!%p414_p2), 3328 }
   0xb   : > { %8286 = vmatpush3.bf16.msra.mxu0 (!%p414_p2), %v8512_v1  ;;  %v8532_v58 = vld [vmem:[%s10794_s1 + $0x50] ss:$0 sps:$4 sm:$0xff] (!%p414_p2)   ;;  %v8533_v59 = vld [vmem:[%s10794_s1 + $0x60] sm:$0xff] (!%p414_p2)   ;;  %v8534_v60 = vld [vmem:[%s10794_s1 + $0x68] ss:$0 sps:$4 sm:$0xff] (!%p414_p2)   ;;  %p466_p4 = scmp.lt.s32.totalorder (!%p414_p2), %s465_s24, 5 }
   0xc   : > { %v8535_v61 = vld [vmem:[%s10797_s4 + $0x40] sm:$0xff] (!%p414_p2)   ;;  %v8537_v63 = vld [vmem:[%s10797_s4 + $0x48] sm:$0xff] (!%p414_p2)   ;;  %v8539_v1 = vld [vmem:[%s10797_s4 + $0x50] sm:$0xff] (!%p414_p2)   ;;  %vm1970_vm15 = vsmask.f32 (!%p414_p2), 7440 }
   0xd   : > { %s10833_s17 = smov (!%p460_p3, %s7066_s17), 15  ;;  %v8536_v62 = vld [vmem:[%s10797_s4] sm:$0xff]   ;;  %v8538_v0 = vld [vmem:[%s10797_s4 + $0x8] sm:$0xff]   ;;  %s10835_s24 = smov (!%p466_p4, %s465_s24), 5 }
   0xe   : > { %s7067_s20 = sshll.u32 %s10833_s17, 2  ;;  %s7068_s25 = sshll.u32 %s10835_s24, 3 }
   0xf   : > { %s463_s23 = scalar_lea.vmem %s10793_s0, %s7067_s20  ;;  %s8962_s20 = smov 64  }
  0x10   : > { %v8513_v2 = vld [vmem:[%s463_s23] sm:$0xff]   ;;  %v8514_v3 = vld [vmem:[%s463_s23 + $0x8] sm:$0xff]   ;;  %v8515_v4 = vld [vmem:[%s463_s23 + $0x10] sm:$0xff]   ;;  %s469_s28 = scalar_lea.vmem %s10807_s14, %s7068_s25 }
  0x11   : > { %8287 = vmatprep.mubr.msk.bf16.mxu0 %vm523_vm0, %v8513_v2  ;;  %v8516_v5 = vld [vmem:[%s463_s23 + $0x18] sm:$0xff]   ;;  %v8540_v2 = vld [vmem:[%s10797_s4 + $0x10] sm:$0xff]  }
  0x12   : > { %8288 = vmatmul.mubr.msk.bf16.vlgmr.msra.gmra.mrb[0].mxu0 %vm523_vm0, %v8514_v3  ;;  %v8541_v3 = vld [vmem:[%s10797_s4 + $0x58] sm:$0xff]  }
  0x13   : > { %8291 = vmatprep.mubr.msk.bf16.mxu0 %vm523_vm0, %v8515_v4 }
  0x1a   : > { %8292 = vmatmul.mubr.msk.bf16.gmra.mrb[4].mxu0 %vm523_vm0, %v8516_v5  ;;  %vm2020_vm0 = vcmask 1042432  }
  0x1b   : > { %8315 = vmatprep.mubr.msk.bf16.mxu0 %vm632_vm1, %v8517_v6 }
  0xe5   : > { %v8289_v9 = vpop.f32.mrb[0].mxu0 }
  0xe6   : > { %v579_v10 = vadd.f32 %v8289_v9, %v7069_v8  ;;  %v570_v11 = vpop.f32.mrb[1].mxu0 }
  0xe7   : > { %v571_v12 = vadd.f32 %v7069_v8, %v570_v11  ;;  %v8290_v13 = vpop.f32.mrb[2].mxu0 }
  0xe8   : > { %v603_v14 = vmul.f32 0.2, %v579_v10  ;;  %v582_v15 = vadd.f32 %v8290_v13, %v7069_v8  ;;  %v573_v16 = vpop.f32.mrb[3].mxu0 }
  0xe9   : > { %v601_v17 = vmul.f32 0.2, %v571_v12  ;;  %v574_v18 = vadd.f32 %v7069_v8, %v573_v16 }
  0xea   : > { %v604_v19 = vmul.f32 0.2, %v582_v15  ;;  %v611_v21 = vmax.f32 %v579_v10, %v603_v14 }
  0xeb   : > { %v602_v20 = vmul.f32 0.2, %v574_v18  ;;  %v609_v23 = vmax.f32 %v571_v12, %v601_v17 }
  0xec   : > { %v612_v22 = vmax.f32 %v582_v15, %v604_v19  ;;  %v8542_v15 = vld [vmem:[%s10797_s4 + $0x18] sm:$0xff]   ;;  %v8544_v19 = vld [vmem:[%s10797_s4 + $0x20] sm:$0xff]  }
  0xed   : > { %v610_v24 = vmax.f32 %v574_v18, %v602_v20  ;;  %v8293_v25 = vpop.f32.mrb[4].mxu0  ;;  %v8543_v18 = vld [vmem:[%s10797_s4 + $0x60] sm:$0xff]  }
  0xee   : > { %v9069_v26 = vpack.c.bf16 %v612_v22, %v611_v21  ;;  %v595_v27 = vadd.f32 %v8293_v25, %v7069_v8  ;;  %v586_v28 = vpop.f32.mrb[5].mxu0  ;;  %v8545_v21 = vld [vmem:[%s10797_s4 + $0x68] sm:$0xff]   ;;  %v8549_v25 = vld [vmem:[%s10797_s4 + $0xc0] sm:$0xff]  }
  0xef   : > { %v9071_v29 = vpack.c.bf16 %v610_v24, %v609_v23  ;;  %v587_v30 = vadd.f32 %v7069_v8, %v586_v28  ;;  %v8294_v31 = vpop.f32.mrb[6].mxu0  ;;  %v8546_v22 = vld [vmem:[%s10797_s4 + $0x28] sm:$0xff]   ;;  %v8547_v23 = vld [vmem:[%s10797_s4 + $0x70] sm:$0xff]  }
  0xf0   : > { %v607_v32 = vmul.f32 0.2, %v595_v27  ;;  %v598_v33 = vadd.f32 %v8294_v31, %v7069_v8  ;;  %v589_v34 = vpop.f32.mrb[7].mxu0  ;;  %v8548_v24 = vld [vmem:[%s10797_s4 + $0x30] sm:$0xff]  }
  0xf1   : > { %v605_v35 = vmul.f32 0.2, %v587_v30  ;;  %v590_v36 = vadd.f32 %v7069_v8, %v589_v34  ;;  %8295 = vmatprep.subr.bf16.mxu1 %v9071_v29  ;;  %8307 = vmatprep.subr.bf16.mxu0 %v9071_v29  ;;  %v8552_v34 = vld [vmem:[%s10797_s4 + $0x38] sm:$0xff]  }
  0xf2   : > { %v608_v37 = vmul.f32 0.2, %v598_v33  ;;  %8296 = vmatpush3.bf16.msra.mxu1 %v9071_v29  ;;  %8308 = vmatpush3.bf16.msra.mxu0 %v9071_v29  ;;  %v615_v39 = vmax.f32 %v595_v27, %v607_v32  ;;  %v8551_v27 = vld [vmem:[%s10797_s4 + $0x80] sm:$0xff]  }
  0xf3   : > { %v606_v38 = vmul.f32 0.2, %v590_v36  ;;  %8297 = vmatprep.subr.bf16.mxu1 %v9069_v26  ;;  %8309 = vmatprep.subr.bf16.mxu0 %v9069_v26  ;;  %v613_v41 = vmax.f32 %v587_v30, %v605_v35 }
  0xf4   : > { %v616_v40 = vmax.f32 %v598_v33, %v608_v37 }
  0xf5   : > { %v614_v42 = vmax.f32 %v590_v36, %v606_v38 }
  0xf6   : > { %v9079_v43 = vpack.c.bf16 %v616_v40, %v615_v39  ;;  %8298 = vmatpush3.bf16.msra.mxu1 %v9069_v26  ;;  %8310 = vmatpush3.bf16.msra.mxu0 %v9069_v26 }
  0xf7   : > { %v9083_v44 = vpack.c.bf16 %v614_v42, %v613_v41  ;;  %v8556_v42 = vld [vmem:[%s10797_s4 + $0xc8] sm:$0xff]  }
  0xf9   : > { %8299 = vmatprep.subr.bf16.mxu1 %v9083_v44  ;;  %8311 = vmatprep.subr.bf16.mxu0 %v9083_v44 }
  0xfa   : > { %8300 = vmatpush3.bf16.msra.mxu1 %v9083_v44  ;;  %8312 = vmatpush3.bf16.msra.mxu0 %v9083_v44 }
  0xfb   : > { %8301 = vmatprep.subr.bf16.mxu1 %v9079_v43  ;;  %8313 = vmatprep.subr.bf16.mxu0 %v9079_v43 }
  0xfe   : > { %8302 = vmatpush3.bf16.msra.mxu1 %v9079_v43  ;;  %8314 = vmatpush3.bf16.msra.mxu0 %v9079_v43 }
  0xff   : > { %8319 = vmatprep.subr.bf16.mxu1 %v9071_v29  ;;  %8331 = vmatprep.subr.bf16.mxu0 %v9071_v29 }
 0x101   : > { %8316 = vmatmul.mubr.msk.bf16.vlgmr.msra.gmra.mrb[8].mxu0 %vm632_vm1, %v8519_v45  ;;  %8304 = vmatmul.mubr.msk.bf16.vlgmr.msra.gmra.mrb[0].mxu1 %vm632_vm1, %v8520_v46  ;;  %v8559_v45 = vld [vmem:[%s10797_s4 + $0xd0] sm:$0xff]  }
 0x102   : > { %8320 = vmatpush3.bf16.msra.mxu1 %v9071_v29  ;;  %8332 = vmatpush3.bf16.msra.mxu0 %v9071_v29  ;;  %v8560_v46 = vld [vmem:[%s10797_s4 + $0x90] sm:$0xff]  }
 0x103   : > { %8321 = vmatprep.subr.bf16.mxu1 %v9069_v26  ;;  %8333 = vmatprep.subr.bf16.mxu0 %v9069_v26 }
 0x104   : > { %8339 = vmatprep.mubr.msk.bf16.mxu0 %vm632_vm1, %v8521_v47  ;;  %8327 = vmatprep.mubr.msk.bf16.mxu1 %vm632_vm1, %v8522_v48  ;;  %v8561_v47 = vld [vmem:[%s10797_s4 + $0xd8] sm:$0xff]  }
 0x105   : > { %v8562_v48 = vld [vmem:[%s10797_s4 + $0x98] sm:$0xff]  }
 0x106   : > { %8322 = vmatpush3.bf16.msra.mxu1 %v9069_v26  ;;  %8334 = vmatpush3.bf16.msra.mxu0 %v9069_v26 }
 0x107   : > { %8323 = vmatprep.subr.bf16.mxu1 %v9083_v44  ;;  %8335 = vmatprep.subr.bf16.mxu0 %v9083_v44 }
 0x10a   : > { %8324 = vmatpush3.bf16.msra.mxu1 %v9083_v44  ;;  %8336 = vmatpush3.bf16.msra.mxu0 %v9083_v44 }
 0x10b   : > { %8325 = vmatprep.subr.bf16.mxu1 %v9079_v43  ;;  %8337 = vmatprep.subr.bf16.mxu0 %v9079_v43 }
 0x10e   : > { %8326 = vmatpush3.bf16.msra.mxu1 %v9079_v43  ;;  %8338 = vmatpush3.bf16.msra.mxu0 %v9079_v43 }
 0x10f   : > { %8343 = vmatprep.subr.bf16.mxu1 %v9071_v29  ;;  %8355 = vmatprep.subr.bf16.mxu0 %v9071_v29 }
 0x111   : > { %8340 = vmatmul.mubr.msk.bf16.vlgmr.msra.gmra.mrb[12].mxu0 %vm632_vm1, %v8523_v49  ;;  %8328 = vmatmul.mubr.msk.bf16.vlgmr.msra.gmra.mrb[4].mxu1 %vm632_vm1, %v8524_v50 }
 0x112   : > { %8344 = vmatpush3.bf16.msra.mxu1 %v9071_v29  ;;  %8356 = vmatpush3.bf16.msra.mxu0 %v9071_v29 }
 0x113   : > { %8345 = vmatprep.subr.bf16.mxu1 %v9069_v26  ;;  %8357 = vmatprep.subr.bf16.mxu0 %v9069_v26 }
 0x114   : > { %8363 = vmatprep.mubr.msk.bf16.mxu0 %vm632_vm1, %v8525_v51  ;;  %8351 = vmatprep.mubr.msk.bf16.mxu1 %vm632_vm1, %v8526_v52  ;;  %v8563_v51 = vld [vmem:[%s10797_s4 + $0xe0] sm:$0xff]  }
 0x115   : > { %v8564_v52 = vld [vmem:[%s10797_s4 + $0xa0] sm:$0xff]  }
 0x116   : > { %8346 = vmatpush3.bf16.msra.mxu1 %v9069_v26  ;;  %8358 = vmatpush3.bf16.msra.mxu0 %v9069_v26 }
 0x117   : > { %8347 = vmatprep.subr.bf16.mxu1 %v9083_v44  ;;  %8359 = vmatprep.subr.bf16.mxu0 %v9083_v44 }
 0x11a   : > { %8348 = vmatpush3.bf16.msra.mxu1 %v9083_v44  ;;  %8360 = vmatpush3.bf16.msra.mxu0 %v9083_v44 }
 0x11b   : > { %8349 = vmatprep.subr.bf16.mxu1 %v9079_v43  ;;  %8361 = vmatprep.subr.bf16.mxu0 %v9079_v43 }
 0x11e   : > { %8350 = vmatpush3.bf16.msra.mxu1 %v9079_v43  ;;  %8362 = vmatpush3.bf16.msra.mxu0 %v9079_v43 }
 0x11f   : > { %8367 = vmatprep.subr.bf16.mxu1 %v9071_v29  ;;  %8379 = vmatprep.subr.bf16.mxu0 %v9071_v29 }
 0x121   : > { %8364 = vmatmul.mubr.msk.bf16.vlgmr.msra.gmra.mrb[16].mxu0 %vm632_vm1, %v8527_v53  ;;  %8352 = vmatmul.mubr.msk.bf16.vlgmr.msra.gmra.mrb[8].mxu1 %vm632_vm1, %v8528_v54  ;;  %v9306_v53 = vld [vmem:[%s10797_s4 + $0x100] sm:$0xff]  }
 0x122   : > { %8368 = vmatpush3.bf16.msra.mxu1 %v9071_v29  ;;  %8380 = vmatpush3.bf16.msra.mxu0 %v9071_v29 }
 0x123   : > { %8369 = vmatprep.subr.bf16.mxu1 %v9069_v26  ;;  %8381 = vmatprep.subr.bf16.mxu0 %v9069_v26 }
 0x124   : > { %8387 = vmatprep.mubr.msk.bf16.mxu0 %vm632_vm1, %v8529_v55  ;;  %8375 = vmatprep.mubr.msk.bf16.mxu1 %vm632_vm1, %v8530_v56 }
 0x126   : > { %8370 = vmatpush3.bf16.msra.mxu1 %v9069_v26  ;;  %8382 = vmatpush3.bf16.msra.mxu0 %v9069_v26 }
 0x127   : > { %8371 = vmatprep.subr.bf16.mxu1 %v9083_v44  ;;  %8383 = vmatprep.subr.bf16.mxu0 %v9083_v44 }
 0x12a   : > { %8372 = vmatpush3.bf16.msra.mxu1 %v9083_v44  ;;  %8384 = vmatpush3.bf16.msra.mxu0 %v9083_v44 }
 0x12b   : > { %8373 = vmatprep.subr.bf16.mxu1 %v9079_v43  ;;  %8385 = vmatprep.subr.bf16.mxu0 %v9079_v43 }
 0x12e   : > { %8374 = vmatpush3.bf16.msra.mxu1 %v9079_v43  ;;  %8386 = vmatpush3.bf16.msra.mxu0 %v9079_v43 }
 0x12f   : > { %8391 = vmatprep.subr.bf16.mxu1 %v9071_v29  ;;  %7733 = vmatprep.subr.bf16.mxu0 %v8535_v61 }
 0x131   : > { %8388 = vmatmul.mubr.msk.bf16.vlgmr.msra.gmra.mrb[20].mxu0 %vm632_vm1, %v8531_v57  ;;  %8376 = vmatmul.mubr.msk.bf16.vlgmr.msra.gmra.mrb[12].mxu1 %vm632_vm1, %v8532_v58 }
 0x132   : > { %8392 = vmatpush3.bf16.msra.mxu1 %v9071_v29  ;;  %8399 = vmatprep.mubr.msk.bf16.mxu1 %vm632_vm1, %v8533_v59 }
 0x133   : > { %8393 = vmatprep.subr.bf16.mxu1 %v9069_v26  ;;  %7734 = vmatpush3.bf16.msra.mxu0 %v8536_v62 }
 0x134   : > { %7735 = vmatprep.subr.bf16.mxu0 %v8537_v63 }
 0x136   : > { %8394 = vmatpush3.bf16.msra.mxu1 %v9069_v26  ;;  %v8550_v26 = vld [vmem:[%s10797_s4 + $0x78] sm:$0xff]  }
 0x137   : > { %8395 = vmatprep.subr.bf16.mxu1 %v9083_v44  ;;  %7736 = vmatpush3.bf16.msra.mxu0 %v8538_v0 }
 0x138   : > { %7737 = vmatprep.subr.bf16.mxu0 %v8539_v1  ;;  %v8566_v1 = vld [vmem:[%s10797_s4 + $0xe8] sm:$0xff]  }
 0x13a   : > { %8396 = vmatpush3.bf16.msra.mxu1 %v9083_v44 }
 0x13b   : > { %8397 = vmatprep.subr.bf16.mxu1 %v9079_v43  ;;  %7738 = vmatpush3.bf16.msra.mxu0 %v8540_v2  ;;  %v8567_v2 = vld [vmem:[%s10797_s4 + $0xa8] sm:$0xff]  }
 0x13c   : > { %7739 = vmatprep.subr.bf16.mxu0 %v8541_v3  ;;  %v8569_v3 = vld [vmem:[%s10797_s4 + $0xf0] sm:$0xff]  }
 0x13e   : > { %8398 = vmatpush3.bf16.msra.mxu1 %v9079_v43  ;;  %v8557_v43 = vld [vmem:[%s10797_s4 + $0x88] sm:$0xff]  }
 0x13f   : > { %7740 = vmatpush3.bf16.msra.mxu0 %v8542_v15  ;;  %7761 = vmatprep.subr.bf16.mxu1 %v8549_v25 }
 0x140   : > { %7741 = vmatprep.subr.bf16.mxu0 %v8543_v18 }
 0x141   : > { %8400 = vmatmul.mubr.msk.bf16.vlgmr.msra.gmra.mrb[16].mxu1 %vm632_vm1, %v8534_v60 }
 0x142   : > { %7762 = vmatpush3.bf16.msra.mxu1 %v8551_v27 }
 0x143   : > { %7742 = vmatpush3.bf16.msra.mxu0 %v8544_v19  ;;  %7763 = vmatprep.subr.bf16.mxu1 %v8556_v42  ;;  %v8571_v42 = vld [vmem:[%s10797_s4 + $0x110] sm:$0xff]  }
 0x144   : > { %7743 = vmatprep.subr.bf16.mxu0 %v8545_v21 }
 0x146   : > { %7764 = vmatpush3.bf16.msra.mxu1 %v8557_v43 }
 0x147   : > { %7744 = vmatpush3.bf16.msra.mxu0 %v8546_v22  ;;  %7765 = vmatprep.subr.bf16.mxu1 %v8559_v45  ;;  %v8574_v45 = vld [vmem:[%s10797_s4 + $0x118] sm:$0xff]  }
 0x148   : > { %7745 = vmatprep.subr.bf16.mxu0 %v8547_v23 }
 0x14a   : > { %7766 = vmatpush3.bf16.msra.mxu1 %v8560_v46 }
 0x14b   : > { %7746 = vmatpush3.bf16.msra.mxu0 %v8548_v24  ;;  %7767 = vmatprep.subr.bf16.mxu1 %v8561_v47 }
 0x14c   : > { %7747 = vmatprep.subr.bf16.mxu0 %v8550_v26 }
 0x14e   : > { %7768 = vmatpush3.bf16.msra.mxu1 %v8562_v48 }
 0x14f   : > { %7748 = vmatpush3.bf16.msra.mxu0 %v8552_v34  ;;  %7769 = vmatprep.subr.bf16.mxu1 %v8563_v51 }
 0x150   : > { %8403 = vmatprep.subr.bf16.mxu0 %v9306_v53 }
 0x152   : > { %7770 = vmatpush3.bf16.msra.mxu1 %v8564_v52 }
 0x153   : > { %7771 = vmatprep.subr.bf16.mxu1 %v8566_v1  ;;  %v8590_v1 = vld [vmem:[%s10799_s6 + $0x50] sm:$0xff]  }
 0x156   : > { %7772 = vmatpush3.bf16.msra.mxu1 %v8567_v2  ;;  %v8591_v2 = vld [vmem:[%s10799_s6 + $0x10] sm:$0xff]  }
 0x157   : > { %7773 = vmatprep.subr.bf16.mxu1 %v8569_v3  ;;  %v8592_v3 = vld [vmem:[%s10799_s6 + $0xd0] sm:$0xff]  }
 0x1d4   : > { %v8317_v4 = vpop.f32.mrb[8].mxu0  ;;  %v8305_v5 = vpop.f32.mrb[0].mxu1 }
 0x1d5   : > { %v7615_v6 = vpack.c.bf16 %v8317_v4, %v8317_v4  ;;  %v756_v7 = vpop.f32.mrb[9].mxu0  ;;  %v7612_v8 = vpack.c.bf16 %v8305_v5, %v8305_v5  ;;  %v673_v9 = vpop.f32.mrb[1].mxu1  ;;  %v8570_v4 = vld [vmem:[%s10797_s4 + $0xb0] sm:$0xff]   ;;  %v8572_v5 = vld [vmem:[%s10797_s4 + $0xf8] sm:$0xff]  }
 0x1d6   : > { %v8318_v10 = vpop.f32.mrb[10].mxu0  ;;  %v7610_v11 = vpack.c.bf16 %v673_v9, %v673_v9  ;;  %v8306_v12 = vpop.f32.mrb[2].mxu1  ;;  %v7613_v17 = vpack.c.bf16 %v756_v7, %v756_v7  ;;  %7774 = vmatpush3.bf16.msra.mxu1 %v8570_v4  ;;  %v8593_v4 = vld [vmem:[%s10799_s6 + $0x90] sm:$0xff]  }
 0x1d7   : > { %784 = vrot.lane.b32.xlu0 %v7615_v6, %s8962_s20  ;;  %v759_v13 = vpop.f32.mrb[11].mxu0  ;;  %703 = vst.msk [vmem:[#allocation2 + $0x28] sm:$0xf] %vm700_vm2, %v7612_v8  ;;  %v676_v14 = vpop.f32.mrb[3].mxu1  ;;  %v8573_v6 = vld [vmem:[%s10797_s4 + $0xb8] sm:$0xff]   ;;  %7775 = vmatprep.subr.bf16.mxu1 %v8572_v5 }
 0x1d8   : > { %701 = vst.msk [vmem:[#allocation2] sm:$0xf] %vm700_vm2, %v7610_v11  ;;  %v7611_v16 = vpack.c.bf16 %v676_v14, %v676_v14  ;;  %v7614_v20 = vpack.c.bf16 %v759_v13, %v759_v13  ;;  %v8594_v5 = vld [vmem:[%s10799_s6 + $0x58] sm:$0xff]  }
 0x1da   : > { %702 = vst.msk [vmem:[#allocation2 + $0x14] sm:$0xf] %vm700_vm2, %v7611_v16  ;;  %7776 = vmatpush3.bf16.msra.mxu1 %v8573_v6  ;;  %v8595_v6 = vld [vmem:[%s10799_s6 + $0x18] sm:$0xff]  }
 0x1db   : > { %780 = vrot.lane.b32.xlu0 %v7613_v17, %s8962_s20 }
 0x1df   : > { %782 = vrot.lane.b32.xlu0 %v7614_v20, %s8962_s20 }
 0x1e4   : > { %v8341_v28 = vpop.f32.mrb[12].mxu0  ;;  %v8329_v29 = vpop.f32.mrb[4].mxu1 }
 0x1e5   : > { %v7621_v30 = vpack.c.bf16 %v8341_v28, %v8341_v28  ;;  %v927_v31 = vpop.f32.mrb[13].mxu0  ;;  %v7618_v32 = vpack.c.bf16 %v8329_v29, %v8329_v29  ;;  %v845_v33 = vpop.f32.mrb[5].mxu1 }
 0x1e6   : > { %v8342_v35 = vpop.f32.mrb[14].mxu0  ;;  %v7616_v36 = vpack.c.bf16 %v845_v33, %v845_v33  ;;  %v8330_v37 = vpop.f32.mrb[6].mxu1  ;;  %v7619_v41 = vpack.c.bf16 %v927_v31, %v927_v31 }
 0x1e7   : > { %955 = vrot.lane.b32.xlu1 %v7621_v30, %s8962_s20  ;;  %v930_v38 = vpop.f32.mrb[15].mxu0  ;;  %874 = vst.msk [vmem:[#allocation2 + $0x2c] sm:$0xf] %vm700_vm2, %v7618_v32  ;;  %v848_v39 = vpop.f32.mrb[7].mxu1 }
 0x1e8   : > { %872 = vst.msk [vmem:[#allocation2 + $0x4] sm:$0xf] %vm700_vm2, %v7616_v36  ;;  %v7617_v40 = vpack.c.bf16 %v848_v39, %v848_v39  ;;  %v7620_v44 = vpack.c.bf16 %v930_v38, %v930_v38  ;;  %v8568_v39 = vld [vmem:[%s10797_s4 + $0x108] sm:$0xff]  }
 0x1ea   : > { %873 = vst.msk [vmem:[#allocation2 + $0x18] sm:$0xf] %vm700_vm2, %v7617_v40 }
 0x1eb   : > { %951 = vrot.lane.b32.xlu1 %v7619_v41, %s8962_s20 }
 0x1ef   : > { %953 = vrot.lane.b32.xlu1 %v7620_v44, %s8962_s20 }
 0x1f4   : > { %v8365_v49 = vpop.f32.mrb[16].mxu0  ;;  %v8353_v50 = vpop.f32.mrb[8].mxu1 }
 0x1f5   : > { %v1097_v54 = vpop.f32.mrb[17].mxu0  ;;  %v7624_v55 = vpack.c.bf16 %v8353_v50, %v8353_v50  ;;  %v1015_v56 = vpop.f32.mrb[9].mxu1  ;;  %v7627_v20 = vpack.c.bf16 %v8365_v49, %v8365_v49 }
 0x1f6   : > { %v7625_v57 = vpack.c.bf16 %v1097_v54, %v1097_v54  ;;  %v8366_v58 = vpop.f32.mrb[18].mxu0  ;;  %v7622_v59 = vpack.c.bf16 %v1015_v56, %v1015_v56  ;;  %v8354_v60 = vpop.f32.mrb[10].mxu1  ;;  %v8963_v56 = vmov 0  }
 0x1f7   : > { %v1100_v61 = vpop.f32.mrb[19].mxu0  ;;  %1044 = vst.msk [vmem:[#allocation2 + $0x30] sm:$0xf] %vm700_vm2, %v7624_v55  ;;  %v1018_v62 = vpop.f32.mrb[11].mxu1  ;;  %1887 = vst [vmem:[#allocation4] sm:$0xf] %v8963_v56 }
 0x1f8   : > { %v7626_v63 = vpack.c.bf16 %v1100_v61, %v1100_v61  ;;  %1121 = vrot.lane.b32.xlu0 %v7625_v57, %s8962_s20  ;;  %1042 = vst.msk [vmem:[#allocation2 + $0x8] sm:$0xf] %vm700_vm2, %v7622_v59  ;;  %v7623_v0 = vpack.c.bf16 %v1018_v62, %v1018_v62  ;;  %1888 = vst [vmem:[#allocation5] sm:$0xf] %v8963_v56  ;;  %v8582_v57 = vld [vmem:[%s10799_s6 + $0x40] sm:$0xff]   ;;  %v8586_v61 = vld [vmem:[%s10799_s6 + $0x48] sm:$0xff]  }
 0x1f9   : > { %1889 = vst [vmem:[#allocation4 + $0x10] sm:$0xf] %v8963_v56  ;;  %1890 = vst [vmem:[#allocation5 + $0x10] sm:$0xf] %v8963_v56  ;;  %v8583_v58 = vld [vmem:[%s10799_s6] sm:$0xff]   ;;  %7795 = vmatprep.subr.bf16.mxu1 %v8582_v57  ;;  %v8587_v62 = vld [vmem:[%s10799_s6 + $0x8] sm:$0xff]  }
 0x1fa   : > { %1123 = vrot.lane.b32.xlu1 %v7626_v63, %s8962_s20  ;;  %1043 = vst.msk [vmem:[#allocation2 + $0x1c] sm:$0xf] %vm700_vm2, %v7623_v0  ;;  %v8584_v59 = vld [vmem:[%s10799_s6 + $0xc0] sm:$0xff]   ;;  %v8588_v63 = vld [vmem:[%s10799_s6 + $0xc8] sm:$0xff]  }
 0x1fb   : > { %v8585_v60 = vld [vmem:[%s10799_s6 + $0x80] sm:$0xff]   ;;  %v8589_v0 = vld [vmem:[%s10799_s6 + $0x88] sm:$0xff]  }
 0x1fc   : > { %v7167_v57 = vld [vmem:[%s10798_s5] ss:$0 sm:$0xff] }
 0x204   : > { %v8389_v7 = vpop.f32.mrb[20].mxu0  ;;  %v8377_v8 = vpop.f32.mrb[12].mxu1 }
 0x205   : > { %v1267_v9 = vpop.f32.mrb[21].mxu0  ;;  %v7630_v10 = vpack.c.bf16 %v8377_v8, %v8377_v8  ;;  %v1185_v11 = vpop.f32.mrb[13].mxu1  ;;  %v7633_v21 = vpack.c.bf16 %v8389_v7, %v8389_v7  ;;  %v8596_v7 = vld [vmem:[%s10799_s6 + $0xd8] sm:$0xff]  }
 0x206   : > { %v7631_v12 = vpack.c.bf16 %v1267_v9, %v1267_v9  ;;  %v8390_v13 = vpop.f32.mrb[22].mxu0  ;;  %v7628_v14 = vpack.c.bf16 %v1185_v11, %v1185_v11  ;;  %v8378_v15 = vpop.f32.mrb[14].mxu1  ;;  %v8597_v8 = vld [vmem:[%s10799_s6 + $0x98] sm:$0xff]   ;;  %v8598_v9 = vld [vmem:[%s10799_s6 + $0x60] sm:$0xff]  }
 0x207   : > { %v1270_v16 = vpop.f32.mrb[23].mxu0  ;;  %1214 = vst.msk [vmem:[#allocation2 + $0x34] sm:$0xf] %vm700_vm2, %v7630_v10  ;;  %v1188_v17 = vpop.f32.mrb[15].mxu1  ;;  %v8599_v10 = vld [vmem:[%s10799_s6 + $0x20] sm:$0xff]   ;;  %v8602_v13 = vld [vmem:[%s10799_s6 + $0x68] sm:$0xff]  }
 0x208   : > { %v7632_v18 = vpack.c.bf16 %v1270_v16, %v1270_v16  ;;  %1291 = vrot.lane.b32.xlu0 %v7631_v12, %s8962_s20  ;;  %1212 = vst.msk [vmem:[#allocation2 + $0xc] sm:$0xf] %vm700_vm2, %v7628_v14  ;;  %v7629_v19 = vpack.c.bf16 %v1188_v17, %v1188_v17  ;;  %v8600_v11 = vld [vmem:[%s10799_s6 + $0xe0] sm:$0xff]   ;;  %v8603_v14 = vld [vmem:[%s10799_s6 + $0x28] sm:$0xff]   ;;  %v8606_v17 = vld [vmem:[%s10799_s6 + $0x70] sm:$0xff]  }
 0x209   : > { %v8601_v12 = vld [vmem:[%s10799_s6 + $0xa0] sm:$0xff]   ;;  %v8604_v15 = vld [vmem:[%s10799_s6 + $0xe8] sm:$0xff]  }
 0x20a   : > { %1293 = vrot.lane.b32.xlu1 %v7632_v18, %s8962_s20  ;;  %1213 = vst.msk [vmem:[#allocation2 + $0x20] sm:$0xf] %vm700_vm2, %v7629_v19  ;;  %v8605_v16 = vld [vmem:[%s10799_s6 + $0xa8] sm:$0xff]   ;;  %v8607_v18 = vld [vmem:[%s10799_s6 + $0x30] sm:$0xff]  }
 0x20b   : > { %v8608_v19 = vld [vmem:[%s10799_s6 + $0xf0] sm:$0xff]  }
 0x20c   : > { %1125 = vrot.lane.b32.xlu0 %v7627_v20, %s8962_s20  ;;  %v8609_v20 = vld [vmem:[%s10799_s6 + $0xb0] sm:$0xff]  }
 0x20e   : > { %1295 = vrot.lane.b32.xlu1 %v7633_v21, %s8962_s20  ;;  %v8610_v21 = vld [vmem:[%s10799_s6 + $0x78] sm:$0xff]  }
 0x214   : > { %v8401_v22 = vpop.f32.mrb[16].mxu1 }
 0x215   : > { %v7636_v23 = vpack.c.bf16 %v8401_v22, %v8401_v22  ;;  %v1355_v24 = vpop.f32.mrb[17].mxu1  ;;  %v8612_v22 = vld [vmem:[%s10799_s6 + $0xf8] sm:$0xff]  }
 0x216   : > { %v7634_v25 = vpack.c.bf16 %v1355_v24, %v1355_v24  ;;  %v8402_v26 = vpop.f32.mrb[18].mxu1  ;;  %v8616_v24 = vld [vmem:[%s10799_s6 + $0x140] sm:$0xff]  }
 0x217   : > { %1384 = vst.msk [vmem:[#allocation2 + $0x38] sm:$0xf] %vm700_vm2, %v7636_v23  ;;  %v1358_v27 = vpop.f32.mrb[19].mxu1  ;;  %v8611_v23 = vld [vmem:[%s10799_s6 + $0x38] sm:$0xff]   ;;  %v8621_v26 = vld [vmem:[%s10799_s6 + $0x1c0] sm:$0xff]  }
 0x218   : > { %1382 = vst.msk [vmem:[#allocation2 + $0x10] sm:$0xf] %vm700_vm2, %v7634_v25  ;;  %v7635_v28 = vpack.c.bf16 %v1358_v27, %v1358_v27  ;;  %v8613_v25 = vld [vmem:[%s10799_s6 + $0xb8] sm:$0xff]   ;;  %v1891_v27 = vlaneseq }
 0x21a   : > { %1383 = vst.msk [vmem:[#allocation2 + $0x24] sm:$0xf] %vm700_vm2, %v7635_v28 }
 0x21e   : > { %v8579_v46 = vld [vmem:[#allocation2 + $0x38] ss:$0 sps:$4 sm:$0xff]  }
 0x221   : > { %v8578_v43 = vld [vmem:[#allocation2 + $0x10] ss:$20 sps:$4 sm:$0xff]  }
 0x249   : > { %v785_v29 = vpop.permute.xlu0 %784 }
 0x24a   : > { %792 = vst.msk [vmem:[#allocation2 + $0x28] sm:$0xf] %vm789_vm3, %v785_v29 }
 0x24d   : > { %v781_v30 = vpop.permute.xlu0 %780 }
 0x24e   : > { %790 = vst.msk [vmem:[#allocation2] sm:$0xf] %vm789_vm3, %v781_v30 }
 0x251   : > { %v783_v31 = vpop.permute.xlu0 %782 }
 0x252   : > { %791 = vst.msk [vmem:[#allocation2 + $0x14] sm:$0xf] %vm789_vm3, %v783_v31 }
 0x259   : > { %v956_v32 = vpop.permute.xlu1 %955  ;;  %v8553_v36 = vld [vmem:[#allocation2] ss:$20 sps:$4 sm:$0xff]  }
 0x25a   : > { %962 = vst.msk [vmem:[#allocation2 + $0x2c] sm:$0xf] %vm789_vm3, %v956_v32 }
 0x25d   : > { %v952_v33 = vpop.permute.xlu1 %951 }
 0x25e   : > { %960 = vst.msk [vmem:[#allocation2 + $0x4] sm:$0xf] %vm789_vm3, %v952_v33  ;;  %v1892_v33 = vshrl.u32 %v1891_v27, 7 }
 0x261   : > { %v954_v34 = vpop.permute.xlu1 %953  ;;  %v1391_v35 = vld [vmem:[#allocation2 + $0x28] sm:$0xff] }
 0x262   : > { %961 = vst.msk [vmem:[#allocation2 + $0x18] sm:$0xf] %vm789_vm3, %v954_v34  ;;  %v7174_v40 = vcombine.high %v1391_v35, %v1391_v35  ;;  %v7173_v44 = vcombine.low %v1391_v35, %v1391_v35 }
 0x269   : > { %v8555_v37 = vld [vmem:[#allocation2 + $0x4] ss:$20 sps:$4 sm:$0xff]  }
 0x26a   : > { %v1122_v38 = vpop.permute.xlu0 %1121  ;;  %1769 = vmatprep.mubr.bf16.mxu0 %v8555_v37 }
 0x26b   : > { %1130 = vst.msk [vmem:[#allocation2 + $0x8] sm:$0xf] %vm789_vm3, %v1122_v38  ;;  %1770 = vmatmul.mubr.bf16.vlgmr.msra.gmra.mrb[24].mxu0 %v8553_v36  ;;  %v9468_v35 = vmul.u32.u64.low 2863311531, %v1892_v33  ;;  %v9469_v36 = vmul.u32.u64.high 2863311531, %v1892_v33, %v9468_v35 }
 0x26c   : > { %v1124_v41 = vpop.permute.xlu1 %1123  ;;  %1777 = vmatprep.mubr.bf16.mxu0 %v7174_v40  ;;  %8404 = vmatpush3.bf16.msra.mxu0 %v9306_v53 }
 0x26d   : > { %1131 = vst.msk [vmem:[#allocation2 + $0x1c] sm:$0xf] %vm789_vm3, %v1124_v41  ;;  %8405 = vmatprep.subr.bf16.mxu0 %v8568_v39  ;;  %v1893_v41 = vadd.s32 8, %v1892_v33 }
 0x270   : > { %8406 = vmatpush3.bf16.msra.mxu0 %v8568_v39 }
 0x271   : > { %8407 = vmatprep.subr.bf16.mxu0 %v8571_v42 }
 0x273   : > { %1778 = vmatmul.mubr.bf16.gmra.mrb[28].mxu0 %v7173_v44 }
 0x274   : > { %8408 = vmatpush3.bf16.msra.mxu0 %v8571_v42  ;;  %8411 = vmatprep.mubr.msk.bf16.mxu0 %vm632_vm1, %v8578_v43  ;;  %v8575_v51 = vld [vmem:[#allocation2 + $0x8] ss:$20 sps:$4 sm:$0xff]   ;;  %v1894_v43 = vadd.s32 16, %v1892_v33 }
 0x275   : > { %8409 = vmatprep.subr.bf16.mxu0 %v8574_v45 }
 0x278   : > { %8410 = vmatpush3.bf16.msra.mxu0 %v8574_v45  ;;  %v9471_v44 = vmul.u32.u64.low 2863311531, %v1893_v41  ;;  %v9472_v45 = vmul.u32.u64.high 2863311531, %v1893_v41, %v9471_v44 }
 0x279   : > { %7823 = vmatprep.subr.bf16.mxu0 %v8584_v59  ;;  %v2143_v44 = vld [vmem:[#allocation4 + $0x10] sm:$0x1] }
 0x27a   : > { %v1292_v47 = vpop.permute.xlu0 %1291 }
 0x27b   : > { %1300 = vst.msk [vmem:[#allocation2 + $0xc] sm:$0xf] %vm789_vm3, %v1292_v47  ;;  %8412 = vmatmul.mubr.msk.bf16.vlgmr.msra.gmra.mrb[32].mxu0 %vm632_vm1, %v8579_v46  ;;  %v1901_v46 = vshrl.u32 %v9469_v36, 2  ;;  %vm2021_vm1 = vcmask 1046532  }
 0x27c   : > { %v1294_v48 = vpop.permute.xlu1 %1293  ;;  %7824 = vmatpush3.bf16.msra.mxu0 %v8585_v60 }
 0x27d   : > { %1301 = vst.msk [vmem:[#allocation2 + $0x20] sm:$0xf] %vm789_vm3, %v1294_v48  ;;  %7825 = vmatprep.subr.bf16.mxu0 %v8588_v63  ;;  %v9475_v47 = vmul.u32.u64.low 2863311531, %v1894_v43  ;;  %v9476_v48 = vmul.u32.u64.high 2863311531, %v1894_v43, %v9475_v47 }
 0x27e   : > { %v1126_v49 = vpop.permute.xlu0 %1125 }
 0x27f   : > { %1132 = vst.msk [vmem:[#allocation2 + $0x30] sm:$0xf] %vm789_vm3, %v1126_v49  ;;  %v1923_v56 = vshrl.u32 %v9476_v48, 2 }
 0x280   : > { %v1296_v50 = vpop.permute.xlu1 %1295  ;;  %7826 = vmatpush3.bf16.msra.mxu0 %v8589_v0 }
 0x281   : > { %1302 = vst.msk [vmem:[#allocation2 + $0x34] sm:$0xf] %vm789_vm3, %v1296_v50  ;;  %7827 = vmatprep.subr.bf16.mxu0 %v8592_v3  ;;  %v1924_v60 = vmul.u32 6, %v1923_v56  ;;  %vm2043_vm3 = vsmask.f32 2304 }
 0x282   : > { %v9528_v56 = vld [vmem:[#allocation4 + $0x10] sm:$0xf] }
 0x284   : > { %v8577_v52 = vld [vmem:[#allocation2 + $0xc] ss:$20 sps:$4 sm:$0xff]   ;;  %7828 = vmatpush3.bf16.msra.mxu0 %v8593_v4 }
 0x285   : > { %1817 = vmatprep.mubr.bf16.mxu1 %v8577_v52  ;;  %7829 = vmatprep.subr.bf16.mxu0 %v8596_v7  ;;  %v1902_v52 = vmul.u32 6, %v1901_v46 }
 0x286   : > { %1818 = vmatmul.mubr.bf16.vlgmr.msra.gmra.mrb[20].mxu1 %v8575_v51 }
 0x287   : > { %7796 = vmatpush3.bf16.msra.mxu1 %v8583_v58 }
 0x288   : > { %v1392_v53 = vld [vmem:[#allocation2 + $0x30] sm:$0xff]  ;;  %7797 = vmatprep.subr.bf16.mxu1 %v8586_v61  ;;  %7830 = vmatpush3.bf16.msra.mxu0 %v8597_v8  ;;  %v2039_v8 = vld [vmem:[#allocation4] sm:$0xe] }
 0x289   : > { %v7176_v54 = vcombine.high %v1392_v53, %v1392_v53  ;;  %v7175_v55 = vcombine.low %v1392_v53, %v1392_v53  ;;  %7831 = vmatprep.subr.bf16.mxu0 %v8600_v11 }
 0x28b   : > { %1825 = vmatprep.mubr.bf16.mxu1 %v7176_v54  ;;  %7798 = vmatpush3.bf16.msra.mxu1 %v8587_v62  ;;  %v1912_v54 = vshrl.u32 %v9472_v45, 2 }
 0x28c   : > { %7799 = vmatprep.subr.bf16.mxu1 %v8590_v1  ;;  %7832 = vmatpush3.bf16.msra.mxu0 %v8601_v12 }
 0x28d   : > { %7833 = vmatprep.subr.bf16.mxu0 %v8604_v15  ;;  %v1913_v58 = vmul.u32 6, %v1912_v54  ;;  %v2174_v54 = vshll.u32 %v2143_v44, 16 }
 0x28e   : > { %1826 = vmatmul.mubr.bf16.gmra.mrb[24].mxu1 %v7175_v55  ;;  %v1903_v55 = vsub.s32 %v1892_v33, %v1902_v52 }
 0x28f   : > { %7800 = vmatpush3.bf16.msra.mxu1 %v8591_v2  ;;  %v1965_v2 = vld [vmem:[#allocation4] sm:$0xf] }
 0x290   : > { %7801 = vmatprep.subr.bf16.mxu1 %v8594_v5  ;;  %7834 = vmatpush3.bf16.msra.mxu0 %v8605_v16  ;;  %vm1928_vm4 = vcmp.ne.s32.totalorder %v1903_v55, 0  ;;  %vm1931_vm5 = vcmp.lt.s32.totalorder %v1903_v55, 0  ;;  %v1937_v1 = vadd.s32 6, %v1903_v55  ;;  %v1914_v5 = vsub.s32 %v1893_v41, %v1913_v58  ;;  %v9532_v58 = vld [vmem:[#allocation4 + $0x10] sm:$0x7] }
 0x291   : > { %7835 = vmatprep.subr.bf16.mxu0 %v8608_v19  ;;  %vm9485_vm6 = vmand %vm1931_vm5, %vm1928_vm4  ;;  %v1973_v11 = vshrl.u32 %v1965_v2, 16  ;;  %v1976_v12 = vshll.u32 %v1965_v2, 16  ;;  %v2047_v16 = vshrl.u32 %v2039_v8, 16  ;;  %vm2044_vm5 = vsmask.f32 6416 }
 0x292   : > { %vm1929_vm7 = vcmp.ne.s32.totalorder %v1914_v5, 0  ;;  %vm1932_vm8 = vcmp.lt.s32.totalorder %v1914_v5, 0 }
 0x293   : > { %7802 = vmatpush3.bf16.msra.mxu1 %v8595_v6  ;;  %vm9497_vm12 = vmand %vm1932_vm8, %vm1929_vm7  ;;  %v2049_v33 = vrot.slane %v2047_v16, 5  ;;  %vm2095_vm7 = vsmask.f32 4368 }
 0x294   : > { %7803 = vmatprep.subr.bf16.mxu1 %v8598_v9  ;;  %7836 = vmatpush3.bf16.msra.mxu0 %v8609_v20  ;;  %vm9547_vm8 = vmor %vm2020_vm0, %vm2021_vm1  ;;  %vm2189_vm0 = vsmask.f32 5392 }
 0x295   : > { %7837 = vmatprep.subr.bf16.mxu0 %v8612_v22  ;;  %v1975_v22 = vrot.slane %v1973_v11, 4 }
 0x297   : > { %7804 = vmatpush3.bf16.msra.mxu1 %v8599_v10  ;;  %v1925_v10 = vsub.s32 %v1894_v43, %v1924_v60 }
 0x298   : > { %7805 = vmatprep.subr.bf16.mxu1 %v8602_v13  ;;  %7838 = vmatpush3.bf16.msra.mxu0 %v8613_v25 }
 0x299   : > { %7879 = vmatprep.subr.bf16.mxu0 %v8621_v26  ;;  %vm1930_vm9 = vcmp.ne.s32.totalorder %v1925_v10, 0  ;;  %vm1933_vm10 = vcmp.lt.s32.totalorder %v1925_v10, 0 }
 0x29a   : > { %vm9505_vm13 = vmand %vm1933_vm10, %vm1930_vm9 }
 0x29b   : > { %7806 = vmatpush3.bf16.msra.mxu1 %v8603_v14  ;;  %v1940_v14 = vsel %vm9485_vm6, %v1937_v1, %v1903_v55  ;;  %vm2094_vm6 = vsmask.f32 256  ;;  %v2290_v1 = vshrl.u32 %v9528_v56, 16  ;;  %vm9554_vm9 = vmor %vm1969_vm14, %vm1970_vm15  ;;  %vm2244_vm14 = vcmask 1044484  }
 0x29c   : > { %7807 = vmatprep.subr.bf16.mxu1 %v8606_v17  ;;  %v2050_v17 = vshll.u32 %v2039_v8, 16  ;;  %vm9491_vm11 = vcmp.lt.s32.totalorder %v1940_v14, 4  ;;  %vm9565_vm10 = vmor %vm2043_vm3, %vm2044_vm5  ;;  %vm2188_vm15 = vsmask.f32 1280 }
 0x29d   : > { %vm9640_vm3 = vmor %vm2188_vm15, %vm2189_vm0 }
 0x29f   : > { %7808 = vmatpush3.bf16.msra.mxu1 %v8607_v18 }
 0x2a0   : > { %7809 = vmatprep.subr.bf16.mxu1 %v8610_v21 }
 0x2a3   : > { %7810 = vmatpush3.bf16.msra.mxu1 %v8611_v23  ;;  %v1978_v23 = vrot.slane %v1976_v12, 5 }
 0x2a4   : > { %7851 = vmatprep.subr.bf16.mxu1 %v8616_v24  ;;  %v1938_v24 = vadd.s32 6, %v1914_v5 }
 0x2a6   : > { %v1941_v43 = vsel %vm9497_vm12, %v1938_v24, %v1914_v5  ;;  %vm9575_vm12 = vmor %vm2094_vm6, %vm2095_vm7 }
 0x2a7   : > { %vm9520_vm2 = vcmp.lt.s32.totalorder %v1941_v43, 4 }
 0x33e   : > { %v7749_v28 = vpop.f32.mrb[24].mxu0 }
 0x33f   : > { %v7750_v29 = vpop.f32.mrb[25].mxu0 }
 0x340   : > { %v7751_v30 = vadd.f32 %v7750_v29, %v7749_v28  ;;  %v7752_v31 = vpop.f32.mrb[26].mxu0 }
 0x341   : > { %v7753_v32 = vpop.f32.mrb[27].mxu0 }
 0x342   : > { %v7754_v34 = vadd.f32 %v7753_v32, %v7752_v31  ;;  %v1772_v62 = vadd.f32 %v7751_v30, %v7167_v57  ;;  %v1939_v30 = vadd.s32 6, %v1925_v10  ;;  %v9501_v32 = vld [vmem:[#allocation4] sm:$0xe] }
 0x343   : > { %v7219_v47 = vrot.slane %v9501_v32, 9 }
 0x344   : > { %v1775_v6 = vadd.f32 %v7754_v34, %v7167_v57  ;;  %v2052_v34 = vrot.slane %v2050_v17, 6  ;;  %v1942_v46 = vsel %vm9505_vm13, %v1939_v30, %v1925_v10  ;;  %vm2243_vm13 = vcmask 1040384  }
 0x345   : > { %vm9524_vm4 = vcmp.lt.s32.totalorder %v1942_v46, 4  ;;  %vm9632_vm1 = vmor %vm2243_vm13, %vm2244_vm14 }
 0x346   : > { %v7755_v37 = vpop.f32.mrb[28].mxu0  ;;  %v2053_v48 = vor.u32 %v2052_v34, %v2049_v33 }
 0x347   : > { %v7756_v38 = vpop.f32.mrb[29].mxu0 }
 0x348   : > { %v7757_v39 = vadd.f32 %v7756_v38, %v7755_v37  ;;  %v7758_v40 = vpop.f32.mrb[30].mxu0  ;;  %v2090_v38 = vld [vmem:[#allocation4] sm:$0x8]  ;;  %v9534_v60 = vrot.slane %v2053_v48, 4 }
 0x349   : > { %v7759_v42 = vpop.f32.mrb[31].mxu0 }
 0x34a   : > { %v1780_v26 = vadd.f32 %v7757_v39, %v7167_v57  ;;  %v1979_v42 = vor.u32 %v1978_v23, %v1975_v22 }
 0x34c   : > { %v1980_v55 = vrot.slane %v1979_v42, 4 }
 0x34e   : > { %v9478_v49 = vpop.f32.mrb[32].mxu0 }
 0x34f   : > { %v1867_v50 = vpop.f32.mrb[33].mxu0 }
 0x350   : > { %v8414_v51 = vpop.f32.mrb[34].mxu0 }
 0x351   : > { %v1870_v53 = vpop.f32.mrb[35].mxu0 }
 0x359   : > { %v7777_v59 = vpop.f32.mrb[20].mxu1 }
 0x35a   : > { %v7778_v61 = vpop.f32.mrb[21].mxu1 }
 0x35b   : > { %v7779_v63 = vadd.f32 %v7778_v61, %v7777_v59  ;;  %v7780_v0 = vpop.f32.mrb[22].mxu1  ;;  %v2187_v59 = vld [vmem:[#allocation4 + $0x10] sm:$0x7] }
 0x35c   : > { %v7781_v4 = vpop.f32.mrb[23].mxu1  ;;  %v2221_v5 = vshrl.u32 %v2187_v59, 16 }
 0x35d   : > { %v1820_v7 = vadd.f32 %v7779_v63, %v1772_v62  ;;  %v7782_v9 = vadd.f32 %v7781_v4, %v7780_v0  ;;  %v9542_v0 = vrot.slane %v2174_v54, 5  ;;  %v2254_v4 = vrot.slane %v9532_v58, 7 }
 0x35e   : > { %v9582_v42 = vrot.slane %v2221_v5, 6 }
 0x35f   : > { %v1868_v13 = vadd.f32 %v1867_v50, %v1820_v7  ;;  %v1823_v15 = vadd.f32 %v7782_v9, %v1775_v6  ;;  %v2098_v50 = vshrl.u32 %v2090_v38, 16  ;;  %v2224_v6 = vshll.u32 %v2187_v59, 16 }
 0x361   : > { %v1881_v18 = vmul.f32 0.2, %v1868_v13  ;;  %v1871_v19 = vadd.f32 %v1870_v53, %v1823_v15  ;;  %v7783_v20 = vpop.f32.mrb[24].mxu1  ;;  %v7220_v61 = vrot.slane %v2098_v50, 11 }
 0x362   : > { %v7784_v25 = vpop.f32.mrb[25].mxu1 }
 0x363   : > { %v9495_v27 = vmax.f32 %v1868_v13, %v1881_v18  ;;  %v7785_v29 = vadd.f32 %v7784_v25, %v7783_v20  ;;  %v7786_v31 = vpop.f32.mrb[26].mxu1  ;;  %v1882_v39 = vmul.f32 0.2, %v1871_v19  ;;  %v2293_v20 = vshll.u32 %v9528_v56, 16  ;;  %v8629_v56 = vld [vmem:[%s10799_s6 + $0x188] sm:$0xff]  }
 0x364   : > { %v7787_v36 = vpop.f32.mrb[27].mxu1 }
 0x365   : > { %v1946_v37 = vsel %vm9491_vm11, %v9495_v27, 0.0  ;;  %v1828_v40 = vadd.f32 %v7785_v29, %v1780_v26  ;;  %v9518_v51 = vmax.f32 %v1871_v19, %v1882_v39  ;;  %v9558_v19 = vrot.slane %v2290_v1, 7  ;;  %v8931_v36 = vld [vmem:[%s10805_s12 + $0x1a8] sm:$0xff]  }
 0x366   : > { %v7637_v41 = vpack.c.bf16 %v1946_v37, %v1946_v37 }
 0x367   : > { %v1876_v45 = vadd.f32 %v9478_v49, %v1828_v40  ;;  %v1947_v62 = vsel %vm9520_vm2, %v9518_v51, 0.0 }
 0x368   : > { %1962 = vst [vmem:[#allocation4 + $0x4] sm:$0xf] %v7637_v41 }
 0x369   : > { %v1883_v53 = vmul.f32 0.2, %v1876_v45 }
 0x36b   : > { %v9530_v57 = vmax.f32 %v1876_v45, %v1883_v53 }
 0x36d   : > { %v1948_v63 = vsel %vm9524_vm4, %v9530_v57, 0.0 }
 0x36e   : > { %v7652_v3 = vpack.c.bf16 %v1948_v63, %v1947_v62 }
 0x36f   : > { %v1966_v7 = vld [vmem:[#allocation4 + $0x4] sm:$0xf] }
 0x370   : > { %v2013_v8 = vld [vmem:[#allocation4 + $0x4] sm:$0xf]  ;;  %v1982_v10 = vshll.u32 %v1966_v7, 16  ;;  %v1986_v11 = vshrl.u32 %v1966_v7, 16  ;;  %7669 = vst [vmem:[#allocation4 + $0x8] sm:$0xff] %v7652_v3  }
 0x371   : > { %v2040_v9 = vld [vmem:[#allocation4 + $0x4] sm:$0xf]  ;;  %v2025_v12 = vrot.slane %v2013_v8, 5 }
 0x372   : > { %v2056_v13 = vshrl.u32 %v2040_v9, 16  ;;  %v2091_v14 = vld [vmem:[#allocation4 + $0x4] sm:$0xf]  ;;  %v2059_v16 = vshll.u32 %v2040_v9, 16  ;;  %v1984_v22 = vrot.slane %v1982_v10, 5  ;;  %v1988_v23 = vrot.slane %v1986_v11, 4 }
 0x373   : > { %v2103_v17 = vshrl.u32 %v2091_v14, 16  ;;  %v2134_v18 = vld [vmem:[#allocation4 + $0x4] sm:$0xf]  ;;  %v2026_v24 = vsel %vm9547_vm8, %v7219_v47, %v2025_v12  ;;  %v2106_v25 = vshll.u32 %v2091_v14, 16  ;;  %v9586_v47 = vrot.slane %v2224_v6, 7 }
 0x374   : > { %2137 = vst [vmem:[#allocation3 + $0x10] sm:$0xf] %v2134_v18  ;;  %v2140_v26 = vld [vmem:[#allocation4 + $0x4] sm:$0xf]  ;;  %2036 = vst [vmem:[#allocation3 + $0x4] sm:$0xf] %v2026_v24  ;;  %v1985_v34 = vsel %vm9554_vm9, %v1980_v55, %v1984_v22  ;;  %v1989_v35 = vor.u32 %v1988_v23, %v1984_v22 }
 0x375   : > { %v2058_v29 = vrot.slane %v2056_v13, 5  ;;  %v2061_v30 = vrot.slane %v2059_v16, 6  ;;  %v9569_v31 = vrot.slane %v2103_v17, 7  ;;  %v2145_v32 = vshrl.u32 %v2140_v26, 16  ;;  %v2184_v33 = vld [vmem:[#allocation4 + $0x4] sm:$0xc] }
 0x376   : > { %v2148_v37 = vshll.u32 %v2140_v26, 16  ;;  %v2192_v38 = vshrl.u32 %v2184_v33, 16  ;;  %2009 = vst [vmem:[#allocation3] sm:$0xf] %v1985_v34  ;;  %v2195_v45 = vshll.u32 %v2184_v33, 16  ;;  %v2027_v48 = vrot.slane %v2025_v12, 4 }
 0x377   : > { %v9579_v39 = vor.u32 %v2061_v30, %v2058_v29  ;;  %v2108_v40 = vor.u32 %v2106_v25, %v9569_v31  ;;  %v2147_v41 = vrot.slane %v2145_v32, 4  ;;  %v9584_v46 = vld [vmem:[#allocation4 + $0x4] sm:$0x8]  ;;  %v2110_v54 = vrot.slane %v9569_v31, 4  ;;  %v1967_v55 = vld [vmem:[#allocation4 + $0x8] sm:$0xf] }
 0x378   : > { %v2150_v43 = vrot.slane %v2148_v37, 5  ;;  %v2194_v44 = vrot.slane %v2192_v38, 6  ;;  %v1968_v59 = vld [vmem:[#allocation4 + $0xc] sm:$0x1]  ;;  %v1990_v62 = vrot.slane %v1989_v35, 4  ;;  %v2197_v1 = vrot.slane %v2195_v45, 7 }
 0x379   : > { %v2063_v50 = vsel %vm9565_vm10, %v9534_v60, %v9579_v39  ;;  %v2109_v53 = vsel %vm9575_vm12, %v7220_v61, %v2108_v40  ;;  %v1992_v3 = vshll.u32 %v1967_v55, 16  ;;  %v2014_v5 = vld [vmem:[#allocation4 + $0x8] sm:$0xf]  ;;  %v2064_v6 = vrot.slane %v9579_v39, 4  ;;  %v2015_v9 = vld [vmem:[#allocation4 + $0xc] sm:$0x1] }
 0x37a   : > { %2087 = vst [vmem:[#allocation3 + $0x8] sm:$0xf] %v2063_v50  ;;  %2131 = vst [vmem:[#allocation3 + $0xc] sm:$0xf] %v2109_v53  ;;  %v2151_v63 = vor.u32 %v2150_v43, %v2147_v41  ;;  %v1996_v7 = vshrl.u32 %v1967_v55, 16  ;;  %v2002_v8 = vshll.u32 %v1968_v59, 16  ;;  %v2198_v61 = vor.u32 %v2197_v1, %v2194_v44 }
 0x37b   : > { %v2028_v60 = vrot.slane %v2014_v5, 5  ;;  %v7221_v11 = vrot.slane %v9584_v46, 11  ;;  %v1994_v12 = vrot.slane %v1992_v3, 5  ;;  %v2041_v13 = vld [vmem:[#allocation4 + $0x8] sm:$0xf]  ;;  %v2031_v25 = vrot.slane %v2015_v9, 5 }
 0x37c   : > { %v9596_v10 = vrot.slane %v2151_v63, 4  ;;  %v1998_v14 = vrot.slane %v1996_v7, 4  ;;  %v2004_v16 = vrot.slane %v2002_v8, 5  ;;  %v2042_v22 = vld [vmem:[#allocation4 + $0xc] sm:$0x3]  ;;  %v9601_v23 = vrot.slane %v2198_v61, 4 }
 0x37d   : > { %v2029_v17 = vsel %vm9547_vm8, %v2027_v48, %v2028_v60  ;;  %v2030_v18 = vrot.slane %v2028_v60, 4  ;;  %v1995_v24 = vsel %vm9554_vm9, %v1990_v62, %v1994_v12  ;;  %v2066_v26 = vshrl.u32 %v2041_v13, 16  ;;  %v2092_v29 = vld [vmem:[#allocation4 + $0x8] sm:$0xf]  ;;  %v2093_v35 = vld [vmem:[#allocation4 + $0xc] sm:$0xf] }
 0x37e   : > { %2037 = vst [vmem:[#allocation3 + $0x28] sm:$0xf] %v2029_v17  ;;  %v1999_v30 = vor.u32 %v1998_v14, %v1994_v12  ;;  %2010 = vst [vmem:[#allocation3 + $0x24] sm:$0xf] %v1995_v24  ;;  %v2069_v32 = vshll.u32 %v2041_v13, 16  ;;  %v2076_v33 = vshrl.u32 %v2042_v22, 16  ;;  %v2227_v63 = vor.u32 %v9586_v47, %v9582_v42 }
 0x37f   : > { %v2079_v34 = vshll.u32 %v2042_v22, 16  ;;  %v2032_v37 = vsel %vm9547_vm8, %v2030_v18, %v2031_v25  ;;  %v2068_v38 = vrot.slane %v2066_v26, 5  ;;  %v2112_v39 = vshrl.u32 %v2092_v29, 16  ;;  %v2135_v41 = vld [vmem:[#allocation4 + $0x8] sm:$0xf]  ;;  %v8638_v47 = vld [vmem:[%s10799_s6 + $0x158] sm:$0xff]  }
 0x380   : > { %v2115_v40 = vshll.u32 %v2092_v29, 16  ;;  %v2000_v43 = vrot.slane %v1999_v30, 4  ;;  %2038 = vst [vmem:[#allocation3 + $0x4c] sm:$0xf] %v2032_v37  ;;  %v2071_v44 = vrot.slane %v2069_v32, 6  ;;  %v2078_v45 = vrot.slane %v2076_v33, 5 }
 0x381   : > { %v2081_v48 = vrot.slane %v2079_v34, 6  ;;  %v2136_v50 = vld [vmem:[#allocation4 + $0xc] sm:$0xf]  ;;  %2138 = vst [vmem:[#allocation3 + $0x34] sm:$0xf] %v2135_v41  ;;  %v2114_v53 = vrot.slane %v2112_v39, 7 }
 0x382   : > { %v2121_v55 = vshrl.u32 %v2093_v35, 16  ;;  %v2124_v59 = vshll.u32 %v2093_v35, 16  ;;  %2139 = vst [vmem:[#allocation3 + $0x58] sm:$0xf] %v2136_v50  ;;  %v2141_v62 = vld [vmem:[#allocation4 + $0x8] sm:$0xf]  ;;  %v2005_v1 = vsel %vm9554_vm9, %v2000_v43, %v2004_v16  ;;  %v2072_v3 = vor.u32 %v2071_v44, %v2068_v38 }
 0x383   : > { %v2082_v5 = vor.u32 %v2081_v48, %v2078_v45  ;;  %v2142_v7 = vld [vmem:[#allocation4 + $0xc] sm:$0xf]  ;;  %v2154_v8 = vshll.u32 %v2141_v62, 16  ;;  %2011 = vst [vmem:[#allocation3 + $0x48] sm:$0xf] %v2005_v1  ;;  %v2117_v9 = vor.u32 %v2115_v40, %v2114_v53  ;;  %v2119_v60 = vrot.slane %v2114_v53, 4 }
 0x384   : > { %v2123_v61 = vrot.slane %v2121_v55, 7  ;;  %v2158_v12 = vshrl.u32 %v2141_v62, 16  ;;  %v2185_v13 = vld [vmem:[#allocation4 + $0x8] sm:$0xf]  ;;  %v2073_v14 = vsel %vm9565_vm10, %v2064_v6, %v2072_v3  ;;  %v2074_v17 = vrot.slane %v2072_v3, 4  ;;  %v8618_v32 = vld [vmem:[%s10799_s6 + $0x100] sm:$0xff]  }
 0x385   : > { %v2156_v18 = vrot.slane %v2154_v8, 5  ;;  %v2164_v22 = vshll.u32 %v2142_v7, 16  ;;  %2088 = vst [vmem:[#allocation3 + $0x2c] sm:$0xf] %v2073_v14  ;;  %v2118_v16 = vsel %vm9575_vm12, %v2110_v54, %v2117_v9  ;;  %v2168_v26 = vshrl.u32 %v2142_v7, 16  ;;  %v8626_v35 = vld [vmem:[%s10799_s6 + $0x148] sm:$0xff]  }
 0x386   : > { %v2126_v24 = vor.u32 %v2124_v59, %v2123_v61  ;;  %v2160_v25 = vrot.slane %v2158_v12, 4  ;;  %v2186_v29 = vld [vmem:[#allocation4 + $0xc] sm:$0xf]  ;;  %v2236_v30 = vld [vmem:[#allocation4 + $0x8] sm:$0xf]  ;;  %v2083_v6 = vsel %vm9565_vm10, %v2074_v17, %v2082_v5  ;;  %v2201_v34 = vshrl.u32 %v2185_v13, 16 }
 0x387   : > { %2132 = vst [vmem:[#allocation3 + $0x30] sm:$0xf] %v2118_v16  ;;  %v2157_v31 = vsel %vm9554_vm9, %v9596_v10, %v2156_v18  ;;  %v2166_v33 = vrot.slane %v2164_v22, 5  ;;  %v2237_v54 = vld [vmem:[#allocation4 + $0xc] sm:$0xf]  ;;  %v2170_v39 = vrot.slane %v2168_v26, 4 }
 0x388   : > { %2089 = vst [vmem:[#allocation3 + $0x50] sm:$0xf] %v2083_v6  ;;  %v2127_v37 = vsel %vm9575_vm12, %v2119_v60, %v2126_v24  ;;  %v2161_v38 = vor.u32 %v2160_v25, %v2156_v18  ;;  %2181 = vst [vmem:[#allocation3 + $0x14] sm:$0xf] %v2157_v31  ;;  %v2204_v40 = vshll.u32 %v2185_v13, 16  ;;  %v2203_v45 = vrot.slane %v2201_v34, 6 }
 0x389   : > { %v8614_v10 = vld [vmem:[#allocation3 + $0x4] ss:$36 sps:$4 sm:$0xff]   ;;  %v9636_v44 = vld [vmem:[#allocation4 + $0x4] sm:$0x8]  ;;  %2133 = vst [vmem:[#allocation3 + $0x54] sm:$0xf] %v2127_v37  ;;  %v2171_v59 = vor.u32 %v2170_v39, %v2166_v33 }
 0x38a   : > { %v8617_v43 = vld [vmem:[#allocation3] ss:$36 sps:$4 sm:$0xff]   ;;  %v2211_v48 = vshrl.u32 %v2186_v29, 16  ;;  %v2214_v50 = vshll.u32 %v2186_v29, 16  ;;  %v2248_v53 = vrot.slane %v2236_v30, 7  ;;  %v2162_v55 = vrot.slane %v2161_v38, 4  ;;  %3011 = vmatprep.mubr.bf16.mxu1 %v8614_v10 }
 0x38b   : > { %v2206_v62 = vrot.slane %v2204_v40, 7  ;;  %v2251_v1 = vrot.slane %v2237_v54, 7  ;;  %v2263_v3 = vld [vmem:[#allocation4 + $0x8] sm:$0xf]  ;;  %3012 = vmatmul.mubr.bf16.vlgmr.msra.gmra.mrb[28].mxu1 %v8617_v43  ;;  %v2172_v12 = vrot.slane %v2171_v59, 4  ;;  %v8627_v18 = vld [vmem:[%s10799_s6 + $0x108] sm:$0xff]   ;;  %v2295_v38 = vor.u32 %v2293_v20, %v9558_v19 }
 0x38c   : > { %v2213_v7 = vrot.slane %v2211_v48, 6  ;;  %v2216_v8 = vrot.slane %v2214_v50, 7  ;;  %v2249_v9 = vsel %vm9632_vm1, %v7221_v11, %v2248_v53  ;;  %v2250_v60 = vrot.slane %v2248_v53, 4  ;;  %v2264_v17 = vld [vmem:[#allocation4 + $0xc] sm:$0xf]  ;;  %7852 = vmatpush3.bf16.msra.mxu1 %v8618_v32  ;;  %v8623_v24 = vld [vmem:[%s10799_s6 + $0x180] sm:$0xff]  }
 0x38d   : > { %v2167_v61 = vsel %vm9554_vm9, %v2162_v55, %v2166_v33  ;;  %v2207_v13 = vor.u32 %v2206_v62, %v2203_v45  ;;  %v2253_v14 = vrot.slane %v2251_v1, 4  ;;  %2259 = vst [vmem:[#allocation3 + $0x1c] sm:$0xf] %v2249_v9  ;;  %v2267_v46 = vshrl.u32 %v9636_v44, 16  ;;  %v2313_v25 = vld [vmem:[#allocation3 + $0x48] sm:$0xff]  ;;  %7853 = vmatprep.subr.bf16.mxu1 %v8626_v35  ;;  %v8630_v26 = vld [vmem:[%s10799_s6 + $0x150] sm:$0xff]  }
 0x38e   : > { %2182 = vst [vmem:[#allocation3 + $0x38] sm:$0xf] %v2167_v61  ;;  %v2217_v22 = vor.u32 %v2216_v8, %v2213_v7  ;;  %v2252_v11 = vsel %vm9632_vm1, %v2250_v60, %v2251_v1  ;;  %v2272_v16 = vshrl.u32 %v2263_v3, 16  ;;  %v2177_v29 = vsel %vm9554_vm9, %v2172_v12, %v9542_v0  ;;  %v8619_v31 = vld [vmem:[#allocation3 + $0xc] ss:$36 sps:$4 sm:$0xff]   ;;  %v8632_v43 = vld [vmem:[%s10799_s6 + $0x110] sm:$0xff]  }
 0x38f   : > { %v2208_v30 = vsel %vm9640_vm3, %v9601_v23, %v2207_v13  ;;  %v2209_v32 = vrot.slane %v2207_v13, 4  ;;  %v2255_v6 = vsel %vm9632_vm1, %v2253_v14, %v2254_v4  ;;  %2260 = vst [vmem:[#allocation3 + $0x40] sm:$0xf] %v2252_v11  ;;  %v8622_v33 = vld [vmem:[#allocation3 + $0x8] ss:$36 sps:$4 sm:$0xff]   ;;  %v2281_v35 = vshrl.u32 %v2264_v17, 16  ;;  %3059 = vmatprep.mubr.bf16.mxu0 %v8619_v31 }
 0x390   : > { %v2219_v34 = vrot.slane %v2217_v22, 4  ;;  %2232 = vst [vmem:[#allocation3 + $0x18] sm:$0xf] %v2208_v30  ;;  %2261 = vst [vmem:[#allocation3 + $0x64] sm:$0xf] %v2255_v6  ;;  %v2274_v54 = vrot.slane %v2272_v16, 7  ;;  %v7234_v37 = vcombine.high %v2313_v25, %v2313_v25  ;;  %7854 = vmatpush3.bf16.msra.mxu1 %v8627_v18  ;;  %3060 = vmatmul.mubr.bf16.vlgmr.msra.gmra.mrb[36].mxu0 %v8622_v33 }
 0x391   : > { %2183 = vst [vmem:[#allocation3 + $0x5c] sm:$0xf] %v2177_v29  ;;  %v8628_v0 = vld [vmem:[%s10799_s6 + $0x1c8] sm:$0xff]   ;;  %v2218_v23 = vsel %vm9640_vm3, %v2209_v32, %v2217_v22  ;;  %v2275_v58 = vshll.u32 %v2263_v3, 16  ;;  %v2283_v39 = vrot.slane %v2281_v35, 7  ;;  %v2284_v40 = vshll.u32 %v2264_v17, 16  ;;  %7855 = vmatprep.subr.bf16.mxu1 %v8630_v26  ;;  %7880 = vmatpush3.bf16.msra.mxu0 %v8623_v24 }
 0x392   : > { %v2314_v4 = vld [vmem:[#allocation3 + $0x50] sm:$0xff]  ;;  %2233 = vst [vmem:[#allocation3 + $0x3c] sm:$0xf] %v2218_v23  ;;  %v2228_v44 = vsel %vm9640_vm3, %v2219_v34, %v2227_v63  ;;  %v7222_v45 = vrot.slane %v2267_v46, 11  ;;  %3019 = vmatprep.mubr.bf16.mxu1 %v7234_v37  ;;  %v7233_v19 = vcombine.low %v2313_v25, %v2313_v25  ;;  %v2279_v48 = vrot.slane %v2274_v54, 4  ;;  %7881 = vmatprep.subr.bf16.mxu0 %v8628_v0  ;;  %v8641_v59 = vld [vmem:[%s10799_s6 + $0x118] sm:$0xff]  }
 0x393   : > { %v7236_v10 = vcombine.high %v2314_v4, %v2314_v4  ;;  %2234 = vst [vmem:[#allocation3 + $0x60] sm:$0xf] %v2228_v44  ;;  %v2277_v20 = vor.u32 %v2275_v58, %v2274_v54  ;;  %v2288_v50 = vrot.slane %v2283_v39, 4  ;;  %v8635_v42 = vld [vmem:[%s10799_s6 + $0x1d0] sm:$0xff]   ;;  %v2286_v63 = vor.u32 %v2284_v40, %v2283_v39  ;;  %v8642_v8 = vld [vmem:[%s10799_s6 + $0x1d8] sm:$0xff]   ;;  %v8644_v9 = vld [vmem:[%s10799_s6 + $0x160] sm:$0xff]  }
 0x394   : > { %3020 = vmatmul.mubr.bf16.gmra.mrb[32].mxu1 %v7233_v19  ;;  %v8637_v3 = vld [vmem:[%s10799_s6 + $0x190] sm:$0xff]   ;;  %v7235_v7 = vcombine.low %v2314_v4, %v2314_v4  ;;  %v8645_v61 = vld [vmem:[%s10799_s6 + $0x120] sm:$0xff]   ;;  %v8643_v12 = vld [vmem:[%s10799_s6 + $0x198] sm:$0xff]  }
 0x395   : > { %3067 = vmatprep.mubr.bf16.mxu0 %v7236_v10  ;;  %v8633_v53 = vld [vmem:[#allocation3 + $0x14] ss:$36 sps:$4 sm:$0xff]   ;;  %v2278_v55 = vsel %vm9575_vm12, %v7222_v45, %v2277_v20  ;;  %7856 = vmatpush3.bf16.msra.mxu1 %v8632_v43  ;;  %v2287_v62 = vsel %vm9575_vm12, %v2279_v48, %v2286_v63  ;;  %v2296_v1 = vsel %vm9575_vm12, %v2288_v50, %v2295_v38  ;;  %v8648_v13 = vld [vmem:[%s10799_s6 + $0x168] sm:$0xff]   ;;  %v8646_v14 = vld [vmem:[%s10799_s6 + $0x1e0] sm:$0xff]  }
 0x396   : > { %2300 = vst [vmem:[#allocation3 + $0x20] sm:$0xf] %v2278_v55  ;;  %7882 = vmatpush3.bf16.msra.mxu0 %v8629_v56  ;;  %3107 = vmatprep.mubr.bf16.mxu1 %v8633_v53  ;;  %2301 = vst [vmem:[#allocation3 + $0x44] sm:$0xf] %v2287_v62  ;;  %v8639_v60 = vld [vmem:[#allocation3 + $0x1c] ss:$36 sps:$4 sm:$0xff]  }
 0x397   : > { %2302 = vst [vmem:[#allocation3 + $0x68] sm:$0xf] %v2296_v1  ;;  %7883 = vmatprep.subr.bf16.mxu0 %v8635_v42  ;;  %7857 = vmatprep.subr.bf16.mxu1 %v8638_v47  ;;  %v8649_v17 = vld [vmem:[%s10799_s6 + $0x128] sm:$0xff]   ;;  %v8647_v18 = vld [vmem:[%s10799_s6 + $0x1a0] sm:$0xff]   ;;  %v8652_v46 = vld [vmem:[%s10799_s6 + $0x170] sm:$0xff]  }
 0x398   : > { %3068 = vmatmul.mubr.bf16.gmra.mrb[40].mxu0 %v7235_v7  ;;  %v8650_v22 = vld [vmem:[%s10799_s6 + $0x1e8] sm:$0xff]   ;;  %v8653_v11 = vld [vmem:[%s10799_s6 + $0x130] sm:$0xff]   ;;  %v8656_v24 = vld [vmem:[%s10799_s6 + $0x178] sm:$0xff]  }
 0x399   : > { %7858 = vmatpush3.bf16.msra.mxu1 %v8641_v59  ;;  %3155 = vmatprep.mubr.bf16.mxu0 %v8639_v60  ;;  %v8651_v16 = vld [vmem:[%s10799_s6 + $0x1a8] sm:$0xff]   ;;  %v8654_v25 = vld [vmem:[%s10799_s6 + $0x1f0] sm:$0xff]   ;;  %v8657_v26 = vld [vmem:[%s10799_s6 + $0x138] sm:$0xff]  }
 0x39a   : > { %7884 = vmatpush3.bf16.msra.mxu0 %v8637_v3  ;;  %7859 = vmatprep.subr.bf16.mxu1 %v8644_v9  ;;  %v8655_v29 = vld [vmem:[%s10799_s6 + $0x1b0] sm:$0xff]   ;;  %v8661_v30 = vld [vmem:[%s10799_s6 + $0x200] sm:$0xff]   ;;  %v8658_v32 = vld [vmem:[%s10799_s6 + $0x1f8] sm:$0xff]  }
 0x39b   : > { %7885 = vmatprep.subr.bf16.mxu0 %v8642_v8  ;;  %v2315_v6 = vld [vmem:[#allocation3 + $0x58] sm:$0xff]  ;;  %v8660_v33 = vld [vmem:[#allocation3 + $0x10] ss:$36 sps:$4 sm:$0xff]   ;;  %v2316_v35 = vld [vmem:[#allocation3 + $0x60] sm:$0xff] }
 0x39c   : > { %v8659_v31 = vld [vmem:[%s10799_s6 + $0x1b8] sm:$0xff]   ;;  %v8665_v34 = vld [vmem:[%s10799_s6 + $0x208] sm:$0xff]   ;;  %v7238_v54 = vcombine.high %v2315_v6, %v2315_v6  ;;  %v8667_v0 = vld [vmem:[%s10799_s6 + $0x210] sm:$0xff]   ;;  %v7240_v58 = vcombine.high %v2316_v35, %v2316_v35  ;;  %v7237_v37 = vcombine.low %v2315_v6, %v2315_v6  ;;  %v7239_v40 = vcombine.low %v2316_v35, %v2316_v35 }
 0x39d   : > { %7860 = vmatpush3.bf16.msra.mxu1 %v8645_v61  ;;  %v8663_v23 = vld [vmem:[#allocation3 + $0x18] ss:$36 sps:$4 sm:$0xff]   ;;  %v8668_v38 = vld [vmem:[#allocation3 + $0x20] ss:$36 sps:$4 sm:$0xff]   ;;  %v8672_v10 = vld [vmem:[%s10799_s6 + $0x228] sm:$0xff]  }
 0x39e   : > { %7886 = vmatpush3.bf16.msra.mxu0 %v8643_v12  ;;  %7861 = vmatprep.subr.bf16.mxu1 %v8648_v13  ;;  %v8670_v4 = vld [vmem:[%s10799_s6 + $0x218] sm:$0xff]   ;;  %v8671_v39 = vld [vmem:[%s10799_s6 + $0x220] sm:$0xff]   ;;  %v8673_v43 = vld [vmem:[%s10799_s6 + $0x230] sm:$0xff]  }
 0x39f   : > { %7887 = vmatprep.subr.bf16.mxu0 %v8646_v14  ;;  %v8674_v44 = vld [vmem:[%s10799_s6 + $0x238] sm:$0xff]   ;;  %v8675_v45 = vld [vmem:[#allocation3 + $0x68] ss:$0 sps:$4 sm:$0xff]   ;;  %v8680_v50 = vld [vmem:[%s10801_s8 + $0x48] sm:$0xff]  }
 0x3a0   : > { %v8676_v56 = vld [vmem:[%s10801_s8 + $0x40] sm:$0xff]   ;;  %v8681_v42 = vld [vmem:[%s10801_s8 + $0xc8] sm:$0xff]   ;;  %v8684_v53 = vld [vmem:[%s10801_s8 + $0x50] sm:$0xff]  }
 0x3a1   : > { %7862 = vmatpush3.bf16.msra.mxu1 %v8649_v17  ;;  %v8677_v19 = vld [vmem:[%s10801_s8 + $0xc0] sm:$0xff]   ;;  %v8682_v47 = vld [vmem:[%s10801_s8 + $0x8] sm:$0xff]   ;;  %v8685_v55 = vld [vmem:[%s10801_s8 + $0xd0] sm:$0xff]  }
 0x3a2   : > { %7888 = vmatpush3.bf16.msra.mxu0 %v8647_v18  ;;  %7863 = vmatprep.subr.bf16.mxu1 %v8652_v46  ;;  %v8678_v20 = vld [vmem:[%s10801_s8] sm:$0xff]   ;;  %v8683_v63 = vld [vmem:[%s10801_s8 + $0x88] sm:$0xff]   ;;  %v8686_v59 = vld [vmem:[%s10801_s8 + $0x10] sm:$0xff]  }
 0x3a3   : > { %7889 = vmatprep.subr.bf16.mxu0 %v8650_v22  ;;  %v8679_v48 = vld [vmem:[%s10801_s8 + $0x80] sm:$0xff]   ;;  %v8687_v62 = vld [vmem:[%s10801_s8 + $0x90] sm:$0xff]   ;;  %v8688_v1 = vld [vmem:[%s10801_s8 + $0x58] sm:$0xff]  }
 0x3a4   : > { %v8689_v3 = vld [vmem:[%s10801_s8 + $0xd8] sm:$0xff]   ;;  %v8692_v9 = vld [vmem:[%s10801_s8 + $0x60] sm:$0xff]   ;;  %v8696_v13 = vld [vmem:[%s10801_s8 + $0x68] sm:$0xff]  }
 0x3a5   : > { %7864 = vmatpush3.bf16.msra.mxu1 %v8653_v11  ;;  %v8690_v7 = vld [vmem:[%s10801_s8 + $0x18] sm:$0xff]   ;;  %v8693_v60 = vld [vmem:[%s10801_s8 + $0xe0] sm:$0xff]   ;;  %v8697_v14 = vld [vmem:[%s10801_s8 + $0xe8] sm:$0xff]  }
 0x3a6   : > { %7890 = vmatpush3.bf16.msra.mxu0 %v8651_v16  ;;  %7865 = vmatprep.subr.bf16.mxu1 %v8656_v24  ;;  %v8691_v8 = vld [vmem:[%s10801_s8 + $0x98] sm:$0xff]   ;;  %v8694_v61 = vld [vmem:[%s10801_s8 + $0x20] sm:$0xff]   ;;  %v8698_v17 = vld [vmem:[%s10801_s8 + $0x28] sm:$0xff]  }
 0x3a7   : > { %7891 = vmatprep.subr.bf16.mxu0 %v8654_v25  ;;  %v8695_v12 = vld [vmem:[%s10801_s8 + $0xa0] sm:$0xff]   ;;  %v8699_v18 = vld [vmem:[%s10801_s8 + $0xa8] sm:$0xff]   ;;  %v8700_v46 = vld [vmem:[%s10801_s8 + $0x70] sm:$0xff]  }
 0x3a8   : > { %v8701_v22 = vld [vmem:[%s10801_s8 + $0xf0] sm:$0xff]   ;;  %v8704_v24 = vld [vmem:[%s10801_s8 + $0x78] sm:$0xff]   ;;  %v8930_v5 = vld [vmem:[%s10805_s12 + $0x128] sm:$0xff]  }
 0x3a9   : > { %7866 = vmatpush3.bf16.msra.mxu1 %v8657_v26  ;;  %v8702_v11 = vld [vmem:[%s10801_s8 + $0x30] sm:$0xff]   ;;  %v8705_v25 = vld [vmem:[%s10801_s8 + $0xf8] sm:$0xff]  }
 0x3aa   : > { %7892 = vmatpush3.bf16.msra.mxu0 %v8655_v29  ;;  %8415 = vmatprep.subr.bf16.mxu1 %v8661_v30  ;;  %v8703_v16 = vld [vmem:[%s10801_s8 + $0xb0] sm:$0xff]   ;;  %v8706_v26 = vld [vmem:[%s10801_s8 + $0x38] sm:$0xff]  }
 0x3ab   : > { %7893 = vmatprep.subr.bf16.mxu0 %v8658_v32  ;;  %v8707_v29 = vld [vmem:[%s10801_s8 + $0xb8] sm:$0xff]   ;;  %v8713_v32 = vld [vmem:[%s10801_s8 + $0x1c0] sm:$0xff]  }
 0x3ac   : > { %3108 = vmatmul.mubr.bf16.vlgmr.msra.gmra.mrb[36].mxu1 %v8660_v33 }
 0x3ad   : > { %3115 = vmatprep.mubr.bf16.mxu1 %v7238_v54  ;;  %8416 = vmatpush3.bf16.msra.mxu1 %v8661_v30  ;;  %v8712_v30 = vld [vmem:[%s10801_s8 + $0x140] sm:$0xff]  }
 0x3ae   : > { %7894 = vmatpush3.bf16.msra.mxu0 %v8659_v31  ;;  %8417 = vmatprep.subr.bf16.mxu1 %v8665_v34  ;;  %v7223_v54 = vld [vmem:[%s10800_s7] ss:$0 sm:$0xff] }
 0x3af   : > { %7917 = vmatprep.subr.bf16.mxu0 %v8676_v56 }
 0x3b1   : > { %3156 = vmatmul.mubr.bf16.vlgmr.msra.gmra.mrb[44].mxu0 %v8663_v23  ;;  %8418 = vmatpush3.bf16.msra.mxu1 %v8665_v34 }
 0x3b2   : > { %3163 = vmatprep.mubr.bf16.mxu0 %v7240_v58  ;;  %8419 = vmatprep.subr.bf16.mxu1 %v8667_v0 }
 0x3b3   : > { %7918 = vmatpush3.bf16.msra.mxu0 %v8678_v20 }
 0x3b4   : > { %3116 = vmatmul.mubr.bf16.gmra.mrb[40].mxu1 %v7237_v37  ;;  %7919 = vmatprep.subr.bf16.mxu0 %v8680_v50 }
 0x3b5   : > { %8420 = vmatpush3.bf16.msra.mxu1 %v8667_v0  ;;  %8431 = vmatprep.mubr.bf16.mxu1 %v8668_v38 }
 0x3b6   : > { %8421 = vmatprep.subr.bf16.mxu1 %v8670_v4 }
 0x3b7   : > { %7920 = vmatpush3.bf16.msra.mxu0 %v8682_v47 }
 0x3b8   : > { %7921 = vmatprep.subr.bf16.mxu0 %v8684_v53 }
 0x3b9   : > { %3164 = vmatmul.mubr.bf16.gmra.mrb[48].mxu0 %v7239_v40  ;;  %8422 = vmatpush3.bf16.msra.mxu1 %v8670_v4 }
 0x3ba   : > { %8423 = vmatprep.subr.bf16.mxu1 %v8671_v39 }
 0x3bb   : > { %7922 = vmatpush3.bf16.msra.mxu0 %v8686_v59 }
 0x3bc   : > { %7923 = vmatprep.subr.bf16.mxu0 %v8688_v1 }
 0x3bd   : > { %8424 = vmatpush3.bf16.msra.mxu1 %v8671_v39 }
 0x3be   : > { %8425 = vmatprep.subr.bf16.mxu1 %v8672_v10 }
 0x3bf   : > { %7924 = vmatpush3.bf16.msra.mxu0 %v8690_v7 }
 0x3c0   : > { %7925 = vmatprep.subr.bf16.mxu0 %v8692_v9 }
 0x3c1   : > { %8426 = vmatpush3.bf16.msra.mxu1 %v8672_v10 }
 0x3c2   : > { %8427 = vmatprep.subr.bf16.mxu1 %v8673_v43 }
 0x3c3   : > { %7926 = vmatpush3.bf16.msra.mxu0 %v8694_v61 }
 0x3c4   : > { %7927 = vmatprep.subr.bf16.mxu0 %v8696_v13 }
 0x3c5   : > { %8428 = vmatpush3.bf16.msra.mxu1 %v8673_v43 }
 0x3c6   : > { %8429 = vmatprep.subr.bf16.mxu1 %v8674_v44 }
 0x3c7   : > { %7928 = vmatpush3.bf16.msra.mxu0 %v8698_v17 }
 0x3c8   : > { %7929 = vmatprep.subr.bf16.mxu0 %v8700_v46 }
 0x3c9   : > { %8430 = vmatpush3.bf16.msra.mxu1 %v8674_v44 }
 0x3ca   : > { %7945 = vmatprep.subr.bf16.mxu1 %v8677_v19 }
 0x3cb   : > { %7930 = vmatpush3.bf16.msra.mxu0 %v8702_v11 }
 0x3cc   : > { %8432 = vmatmul.mubr.bf16.vlgmr.msra.gmra.mrb[44].mxu1 %v8675_v45  ;;  %7931 = vmatprep.subr.bf16.mxu0 %v8704_v24 }
 0x3cd   : > { %7946 = vmatpush3.bf16.msra.mxu1 %v8679_v48 }
 0x3ce   : > { %7947 = vmatprep.subr.bf16.mxu1 %v8681_v42 }
 0x3cf   : > { %7932 = vmatpush3.bf16.msra.mxu0 %v8706_v26 }
 0x3d0   : > { %7973 = vmatprep.subr.bf16.mxu0 %v8712_v30 }
 0x3d1   : > { %7948 = vmatpush3.bf16.msra.mxu1 %v8683_v63 }
 0x3d2   : > { %7949 = vmatprep.subr.bf16.mxu1 %v8685_v55 }
 0x3d5   : > { %7950 = vmatpush3.bf16.msra.mxu1 %v8687_v62 }
 0x3d6   : > { %7951 = vmatprep.subr.bf16.mxu1 %v8689_v3 }
 0x3d9   : > { %7952 = vmatpush3.bf16.msra.mxu1 %v8691_v8 }
 0x3da   : > { %7953 = vmatprep.subr.bf16.mxu1 %v8693_v60 }
 0x3dd   : > { %7954 = vmatpush3.bf16.msra.mxu1 %v8695_v12 }
 0x3de   : > { %7955 = vmatprep.subr.bf16.mxu1 %v8697_v14 }
 0x3e1   : > { %7956 = vmatpush3.bf16.msra.mxu1 %v8699_v18 }
 0x3e2   : > { %7957 = vmatprep.subr.bf16.mxu1 %v8701_v22 }
 0x3e5   : > { %7958 = vmatpush3.bf16.msra.mxu1 %v8703_v16 }
 0x3e6   : > { %7959 = vmatprep.subr.bf16.mxu1 %v8705_v25 }
 0x3e9   : > { %7960 = vmatpush3.bf16.msra.mxu1 %v8707_v29 }
 0x3ea   : > { %8001 = vmatprep.subr.bf16.mxu1 %v8713_v32 }
 0x45e   : > { %v7811_v6 = vpop.f32.mrb[28].mxu1 }
 0x45f   : > { %v7812_v31 = vpop.f32.mrb[29].mxu1 }
 0x460   : > { %v7813_v33 = vadd.f32 %v7812_v31, %v7811_v6  ;;  %v7814_v34 = vpop.f32.mrb[30].mxu1 }
 0x461   : > { %v7815_v35 = vpop.f32.mrb[31].mxu1 }
 0x462   : > { %v7816_v0 = vadd.f32 %v7815_v35, %v7814_v34  ;;  %v3014_v23 = vadd.f32 %v7813_v33, %v7223_v54 }
 0x463   : > { %v7839_v58 = vpop.f32.mrb[36].mxu0 }
 0x464   : > { %v7840_v37 = vpop.f32.mrb[37].mxu0  ;;  %v3017_v4 = vadd.f32 %v7816_v0, %v7223_v54 }
 0x465   : > { %v7841_v38 = vadd.f32 %v7840_v37, %v7839_v58  ;;  %v7842_v39 = vpop.f32.mrb[38].mxu0  ;;  %v3244_v58 = vld [vmem:[#allocation5] sm:$0xf] }
 0x466   : > { %v7843_v40 = vpop.f32.mrb[39].mxu0 }
 0x467   : > { %v7817_v10 = vpop.f32.mrb[32].mxu1  ;;  %v3062_v43 = vadd.f32 %v7841_v38, %v3014_v23  ;;  %v7844_v44 = vadd.f32 %v7843_v40, %v7842_v39 }
 0x468   : > { %v7818_v45 = vpop.f32.mrb[33].mxu1 }
 0x469   : > { %v7819_v56 = vadd.f32 %v7818_v45, %v7817_v10  ;;  %v7820_v19 = vpop.f32.mrb[34].mxu1  ;;  %v3065_v20 = vadd.f32 %v7844_v44, %v3017_v4  ;;  %v3312_v4 = vld [vmem:[#allocation5] sm:$0xe]  ;;  %v3252_v44 = vshll.u32 %v3244_v58, 16 }
 0x46a   : > { %v7821_v48 = vpop.f32.mrb[35].mxu1  ;;  %v3320_v19 = vshll.u32 %v3312_v4, 16 }
 0x46b   : > { %v3022_v50 = vadd.f32 %v7819_v56, %v7223_v54  ;;  %v7845_v42 = vpop.f32.mrb[40].mxu0  ;;  %v3317_v56 = vshrl.u32 %v3312_v4, 16 }
 0x46c   : > { %v7846_v47 = vpop.f32.mrb[41].mxu0 }
 0x46d   : > { %v7847_v63 = vadd.f32 %v7846_v47, %v7845_v42  ;;  %v7848_v53 = vpop.f32.mrb[42].mxu0  ;;  %v3526_v42 = vld [vmem:[#allocation5 + $0x10] sm:$0xf] }
 0x46e   : > { %v7849_v55 = vpop.f32.mrb[43].mxu0  ;;  %v3254_v53 = vrot.slane %v3252_v44, 5 }
 0x46f   : > { %v3070_v59 = vadd.f32 %v7847_v63, %v3022_v50 }
 0x47f   : > { %v7867_v62 = vpop.f32.mrb[36].mxu1 }
 0x480   : > { %v7868_v1 = vpop.f32.mrb[37].mxu1 }
 0x481   : > { %v7869_v3 = vadd.f32 %v7868_v1, %v7867_v62  ;;  %v7870_v7 = vpop.f32.mrb[38].mxu1  ;;  %v3319_v62 = vrot.slane %v3317_v56, 5  ;;  %v3322_v1 = vrot.slane %v3320_v19, 6 }
 0x482   : > { %v7871_v8 = vpop.f32.mrb[39].mxu1 }
 0x483   : > { %v3110_v9 = vadd.f32 %v7869_v3, %v3062_v43  ;;  %v7872_v60 = vadd.f32 %v7871_v8, %v7870_v7  ;;  %v3249_v43 = vshrl.u32 %v3244_v58, 16  ;;  %v3360_v3 = vld [vmem:[#allocation5] sm:$0x8] }
 0x484   : > { %v7895_v61 = vpop.f32.mrb[44].mxu0 }
 0x485   : > { %v3113_v12 = vadd.f32 %v7872_v60, %v3065_v20  ;;  %v7896_v13 = vpop.f32.mrb[45].mxu0  ;;  %v3251_v63 = vrot.slane %v3249_v43, 4  ;;  %v3454_v60 = vld [vmem:[#allocation5 + $0x10] sm:$0x7] }
 0x486   : > { %v7897_v14 = vadd.f32 %v7896_v13, %v7895_v61  ;;  %v7898_v17 = vpop.f32.mrb[46].mxu0  ;;  %v3365_v13 = vshrl.u32 %v3360_v3, 16 }
 0x487   : > { %v7899_v18 = vpop.f32.mrb[47].mxu0  ;;  %v7873_v46 = vpop.f32.mrb[40].mxu1 }
 0x488   : > { %v7900_v22 = vadd.f32 %v7899_v18, %v7898_v17  ;;  %v7874_v11 = vpop.f32.mrb[41].mxu1  ;;  %v3158_v16 = vadd.f32 %v7897_v14, %v3110_v9  ;;  %v3551_v9 = vshrl.u32 %v3526_v42, 16  ;;  %v3288_v14 = vld [vmem:[#allocation5] sm:$0xe]  ;;  %v3323_v17 = vor.u32 %v3322_v1, %v3319_v62  ;;  %v3410_v18 = vld [vmem:[#allocation5 + $0x10] sm:$0x1] }
 0x489   : > { %v7875_v24 = vadd.f32 %v7874_v11, %v7873_v46  ;;  %v7876_v25 = vpop.f32.mrb[42].mxu1  ;;  %v3485_v46 = vshrl.u32 %v3454_v60, 16  ;;  %v9898_v11 = vld [vmem:[#allocation5 + $0x10] sm:$0x7] }
 0x48a   : > { %v7877_v26 = vpop.f32.mrb[43].mxu1  ;;  %v3161_v29 = vadd.f32 %v7900_v22, %v3113_v12  ;;  %v3255_v12 = vor.u32 %v3254_v53, %v3251_v63  ;;  %v3488_v22 = vshll.u32 %v3454_v60, 16 }
 0x48b   : > { %v3118_v30 = vadd.f32 %v7875_v24, %v3070_v59  ;;  %v3554_v24 = vshll.u32 %v3526_v42, 16  ;;  %v7317_v26 = vrot.slane %v3288_v14, 9 }
 0x48c   : > { %v7901_v32 = vpop.f32.mrb[48].mxu0  ;;  %v3256_v25 = vrot.slane %v3255_v12, 4 }
 0x48d   : > { %v7902_v6 = vpop.f32.mrb[49].mxu0 }
 0x48e   : > { %v7903_v31 = vadd.f32 %v7902_v6, %v7901_v32  ;;  %v7904_v33 = vpop.f32.mrb[50].mxu0  ;;  %v3324_v32 = vrot.slane %v3323_v17, 4  ;;  %v3515_v6 = vrot.slane %v9898_v11, 7 }
 0x48f   : > { %v7905_v34 = vpop.f32.mrb[51].mxu0  ;;  %v9903_v33 = vrot.slane %v3488_v22, 7 }
 0x490   : > { %v3166_v54 = vadd.f32 %v7903_v31, %v3118_v30  ;;  %v3441_v30 = vshll.u32 %v3410_v18, 16  ;;  %v9901_v31 = vrot.slane %v3485_v46, 6 }
 0x492   : > { %v9907_v44 = vrot.slane %v3441_v30, 5 }
 0x49f   : > { %v8433_v35 = vpop.f32.mrb[44].mxu1 }
 0x4a0   : > { %v3214_v0 = vadd.f32 %v8433_v35, %v3166_v54  ;;  %v3205_v23 = vpop.f32.mrb[45].mxu1 }
 0x4a1   : > { %v3206_v37 = vadd.f32 %v3205_v23, %v3158_v16  ;;  %v8434_v38 = vpop.f32.mrb[46].mxu1  ;;  %v3553_v16 = vrot.slane %v3551_v9, 7 }
 0x4a2   : > { %v3221_v39 = vmul.f32 0.2, %v3214_v0  ;;  %v3208_v40 = vpop.f32.mrb[47].mxu1 }
 0x4a3   : > { %v3219_v10 = vmul.f32 0.2, %v3206_v37  ;;  %v3209_v45 = vadd.f32 %v3208_v40, %v3161_v29  ;;  %v7318_v29 = vrot.slane %v3365_v13, 11 }
 0x4a4   : > { %v3224_v20 = vmax.f32 %v3214_v0, %v3221_v39  ;;  %v9905_v0 = vor.u32 %v3554_v24, %v3553_v16 }
 0x4a5   : > { %v3222_v48 = vmax.f32 %v3206_v37, %v3219_v10  ;;  %v3220_v50 = vmul.f32 0.2, %v3209_v45 }
 0x4a6   : > { %v3227_v7 = vsel %vm9524_vm4, %v3224_v20, 0.0 }
 0x4a7   : > { %v3225_v47 = vsel %vm9491_vm11, %v3222_v48, 0.0  ;;  %v3223_v55 = vmax.f32 %v3209_v45, %v3220_v50 }
 0x4a8   : > { %v7640_v59 = vpack.c.bf16 %v3225_v47, %v3225_v47 }
 0x4a9   : > { %v3226_v8 = vsel %vm9520_vm2, %v3223_v55, 0.0 }
 0x4aa   : > { %3241 = vst [vmem:[#allocation5 + $0x4] sm:$0xf] %v7640_v59  ;;  %v7657_v61 = vpack.c.bf16 %v3227_v7, %v3226_v8 }
 0x4ac   : > { %7670 = vst [vmem:[#allocation5 + $0x8] sm:$0xff] %v7657_v61  }
 0x4b1   : > { %v3245_v34 = vld [vmem:[#allocation5 + $0x4] sm:$0xf] }
 0x4b2   : > { %v3289_v54 = vld [vmem:[#allocation5 + $0x4] sm:$0xf]  ;;  %v3258_v23 = vshll.u32 %v3245_v34, 16  ;;  %v3262_v58 = vshrl.u32 %v3245_v34, 16 }
 0x4b3   : > { %v3313_v35 = vld [vmem:[#allocation5 + $0x4] sm:$0xf]  ;;  %v3298_v37 = vrot.slane %v3289_v54, 5  ;;  %v3246_v12 = vld [vmem:[#allocation5 + $0x8] sm:$0xf] }
 0x4b4   : > { %v3326_v4 = vshrl.u32 %v3313_v35, 16  ;;  %v3361_v38 = vld [vmem:[#allocation5 + $0x4] sm:$0xf]  ;;  %v3329_v39 = vshll.u32 %v3313_v35, 16  ;;  %v3260_v45 = vrot.slane %v3258_v23, 5  ;;  %v3264_v56 = vrot.slane %v3262_v58, 4 }
 0x4b5   : > { %v3370_v40 = vshrl.u32 %v3361_v38, 16  ;;  %v3373_v10 = vshll.u32 %v3361_v38, 16  ;;  %v3401_v43 = vld [vmem:[#allocation5 + $0x4] sm:$0xf]  ;;  %v3299_v19 = vsel %vm9547_vm8, %v7317_v26, %v3298_v37  ;;  %v3300_v20 = vrot.slane %v3298_v37, 4 }
 0x4b6   : > { %3404 = vst [vmem:[#allocation3 + $0x10] sm:$0xf] %v3401_v43  ;;  %v3407_v48 = vld [vmem:[#allocation5 + $0x4] sm:$0xf]  ;;  %v3328_v50 = vrot.slane %v3326_v4, 5  ;;  %v3331_v42 = vrot.slane %v3329_v39, 6  ;;  %v3261_v55 = vsel %vm9554_vm9, %v3256_v25, %v3260_v45  ;;  %v3265_v59 = vor.u32 %v3264_v56, %v3260_v45 }
 0x4b7   : > { %v9911_v47 = vrot.slane %v3370_v40, 7  ;;  %v3412_v63 = vshrl.u32 %v3407_v48, 16  ;;  %v3451_v53 = vld [vmem:[#allocation5 + $0x4] sm:$0xc]  ;;  %3309 = vst [vmem:[#allocation3 + $0x4] sm:$0xf] %v3299_v19  ;;  %v3491_v56 = vor.u32 %v9903_v33, %v9901_v31 }
 0x4b8   : > { %v3415_v62 = vshll.u32 %v3407_v48, 16  ;;  %v3456_v1 = vshrl.u32 %v3451_v53, 16  ;;  %v9915_v3 = vld [vmem:[#allocation5 + $0x4] sm:$0x8]  ;;  %v9919_v8 = vor.u32 %v3331_v42, %v3328_v50  ;;  %3285 = vst [vmem:[#allocation3] sm:$0xf] %v3261_v55 }
 0x4b9   : > { %v9917_v7 = vld [vmem:[#allocation5 + $0x4] sm:$0x8]  ;;  %v3375_v9 = vor.u32 %v3373_v10, %v9911_v47  ;;  %v3377_v60 = vrot.slane %v9911_v47, 4  ;;  %v3414_v61 = vrot.slane %v3412_v63, 4  ;;  %v3247_v13 = vld [vmem:[#allocation5 + $0xc] sm:$0x1] }
 0x4ba   : > { %v3266_v14 = vrot.slane %v3265_v59, 4  ;;  %v3417_v17 = vrot.slane %v3415_v62, 5  ;;  %v3458_v18 = vrot.slane %v3456_v1, 6  ;;  %v3459_v46 = vshll.u32 %v3451_v53, 16  ;;  %v3290_v22 = vld [vmem:[#allocation5 + $0x8] sm:$0xf] }
 0x4bb   : > { %v3333_v16 = vsel %vm9565_vm10, %v3324_v32, %v9919_v8  ;;  %v3334_v24 = vrot.slane %v9919_v8, 4  ;;  %v3376_v25 = vsel %vm9575_vm12, %v7318_v29, %v3375_v9  ;;  %v7319_v26 = vrot.slane %v9915_v3, 11  ;;  %v3291_v30 = vld [vmem:[#allocation5 + $0xc] sm:$0x1]  ;;  %v3314_v58 = vld [vmem:[#allocation5 + $0x8] sm:$0xf] }
 0x4bc   : > { %v3418_v34 = vor.u32 %v3417_v17, %v3414_v61  ;;  %v3461_v54 = vrot.slane %v3459_v46, 7  ;;  %v3528_v35 = vshrl.u32 %v9917_v7, 16  ;;  %3357 = vst [vmem:[#allocation3 + $0x8] sm:$0xf] %v3333_v16  ;;  %3398 = vst [vmem:[#allocation3 + $0xc] sm:$0xf] %v3376_v25 }
 0x4bd   : > { %v3268_v23 = vshll.u32 %v3246_v12, 16  ;;  %v3272_v37 = vshrl.u32 %v3246_v12, 16  ;;  %v3278_v4 = vshll.u32 %v3247_v13, 16  ;;  %v3301_v38 = vrot.slane %v3290_v22, 5  ;;  %v3315_v39 = vld [vmem:[#allocation5 + $0xc] sm:$0x3] }
 0x4be   : > { %v3304_v32 = vrot.slane %v3291_v30, 5  ;;  %v9931_v40 = vrot.slane %v3418_v34, 4  ;;  %v3462_v10 = vor.u32 %v3461_v54, %v3458_v18  ;;  %v3362_v43 = vld [vmem:[#allocation5 + $0x8] sm:$0xf]  ;;  %v3363_v45 = vld [vmem:[#allocation5 + $0xc] sm:$0xf] }
 0x4bf   : > { %v3270_v29 = vrot.slane %v3268_v23, 5  ;;  %v3274_v19 = vrot.slane %v3272_v37, 4  ;;  %v3280_v48 = vrot.slane %v3278_v4, 5  ;;  %v3302_v50 = vsel %vm9547_vm8, %v3300_v20, %v3301_v38  ;;  %v3402_v63 = vld [vmem:[#allocation5 + $0x8] sm:$0xf]  ;;  %v8723_v31 = vld [vmem:[%s10801_s8 + $0x150] sm:$0xff]  }
 0x4c0   : > { %v3303_v42 = vrot.slane %v3301_v38, 4  ;;  %v9937_v53 = vrot.slane %v3462_v10, 4  ;;  %v3336_v59 = vshrl.u32 %v3314_v58, 16  ;;  %v3339_v62 = vshll.u32 %v3314_v58, 16  ;;  %v3403_v1 = vld [vmem:[#allocation5 + $0xc] sm:$0xf] }
 0x4c1   : > { %v3271_v55 = vsel %vm9554_vm9, %v3266_v14, %v3270_v29  ;;  %3405 = vst [vmem:[#allocation3 + $0x34] sm:$0xf] %v3402_v63  ;;  %3310 = vst [vmem:[#allocation3 + $0x28] sm:$0xf] %v3302_v50  ;;  %v3275_v9 = vor.u32 %v3274_v19, %v3270_v29  ;;  %v3346_v12 = vshrl.u32 %v3315_v39, 16  ;;  %v3349_v13 = vshll.u32 %v3315_v39, 16 }
 0x4c2   : > { %v3305_v61 = vsel %vm9547_vm8, %v3303_v42, %v3304_v32  ;;  %3406 = vst [vmem:[#allocation3 + $0x58] sm:$0xf] %v3403_v1  ;;  %v3408_v20 = vld [vmem:[#allocation5 + $0x8] sm:$0xf]  ;;  %3286 = vst [vmem:[#allocation3 + $0x24] sm:$0xf] %v3271_v55 }
 0x4c3   : > { %v3338_v17 = vrot.slane %v3336_v59, 5  ;;  %v3341_v18 = vrot.slane %v3339_v62, 6  ;;  %v3379_v46 = vshrl.u32 %v3362_v43, 16  ;;  %v3382_v22 = vshll.u32 %v3362_v43, 16  ;;  %3311 = vst [vmem:[#allocation3 + $0x4c] sm:$0xf] %v3305_v61 }
 0x4c4   : > { %v3276_v14 = vrot.slane %v3275_v9, 4  ;;  %v9943_v16 = vrot.slane %v3346_v12, 5  ;;  %v9945_v25 = vrot.slane %v3349_v13, 6  ;;  %v3388_v30 = vshrl.u32 %v3363_v45, 16  ;;  %v3409_v58 = vld [vmem:[#allocation5 + $0xc] sm:$0xf] }
 0x4c5   : > { %v9947_v34 = vor.u32 %v3341_v18, %v3338_v17  ;;  %v3381_v54 = vrot.slane %v3379_v46, 7  ;;  %v3391_v23 = vshll.u32 %v3363_v45, 16  ;;  %v3421_v37 = vshll.u32 %v3408_v20, 16  ;;  %v3452_v10 = vld [vmem:[#allocation5 + $0x8] sm:$0xf] }
 0x4c6   : > { %v3281_v4 = vsel %vm9554_vm9, %v3276_v14, %v3280_v48  ;;  %v3352_v38 = vor.u32 %v9945_v25, %v9943_v16  ;;  %v3390_v32 = vrot.slane %v3388_v30, 7  ;;  %v3425_v39 = vshrl.u32 %v3408_v20, 16  ;;  %v3453_v42 = vld [vmem:[#allocation5 + $0xc] sm:$0xf]  ;;  %v3500_v62 = vld [vmem:[#allocation5 + $0x8] sm:$0xf] }
 0x4c7   : > { %v3344_v29 = vrot.slane %v9947_v34, 4  ;;  %v3384_v43 = vor.u32 %v3382_v22, %v3381_v54  ;;  %v3386_v19 = vrot.slane %v3381_v54, 4  ;;  %v3423_v50 = vrot.slane %v3421_v37, 5  ;;  %3287 = vst [vmem:[#allocation3 + $0x48] sm:$0xf] %v3281_v4  ;;  %v8727_v25 = vld [vmem:[%s10801_s8 + $0x110] sm:$0xff]  }
 0x4c8   : > { %v3393_v63 = vor.u32 %v3391_v23, %v3390_v32  ;;  %v3427_v45 = vrot.slane %v3425_v39, 4  ;;  %v3431_v55 = vshll.u32 %v3409_v58, 16  ;;  %v3435_v59 = vshrl.u32 %v3409_v58, 16  ;;  %v3501_v12 = vld [vmem:[#allocation5 + $0xc] sm:$0xf] }
 0x4c9   : > { %v3385_v48 = vsel %vm9575_vm12, %v3377_v60, %v3384_v43  ;;  %v3424_v1 = vsel %vm9554_vm9, %v9931_v40, %v3423_v50  ;;  %v3465_v9 = vshrl.u32 %v3452_v10, 16  ;;  %v3468_v61 = vshll.u32 %v3452_v10, 16  ;;  %v8708_v13 = vld [vmem:[#allocation3 + $0x4] ss:$36 sps:$4 sm:$0xff]   ;;  %v3525_v39 = vld [vmem:[#allocation5 + $0xc] sm:$0xf] }
 0x4ca   : > { %v3394_v20 = vsel %vm9575_vm12, %v3386_v19, %v3393_v63  ;;  %v3428_v17 = vor.u32 %v3427_v45, %v3423_v50  ;;  %v3433_v18 = vrot.slane %v3431_v55, 5  ;;  %v3437_v46 = vrot.slane %v3435_v59, 4  ;;  %v3524_v22 = vld [vmem:[#allocation5 + $0x8] sm:$0xf]  ;;  %3399 = vst [vmem:[#allocation3 + $0x30] sm:$0xf] %v3385_v48  ;;  %4272 = vmatprep.mubr.bf16.mxu0 %v8708_v13 }
 0x4cb   : > { %3448 = vst [vmem:[#allocation3 + $0x14] sm:$0xf] %v3424_v1  ;;  %v3467_v47 = vrot.slane %v3465_v9, 6  ;;  %v3470_v14 = vrot.slane %v3468_v61, 7  ;;  %v3475_v60 = vshrl.u32 %v3453_v42, 16  ;;  %v3478_v30 = vshll.u32 %v3453_v42, 16 }
 0x4cc   : > { %3400 = vst [vmem:[#allocation3 + $0x54] sm:$0xf] %v3394_v20  ;;  %v3429_v40 = vrot.slane %v3428_v17, 4  ;;  %v3438_v54 = vor.u32 %v3437_v46, %v3433_v18  ;;  %v3509_v23 = vrot.slane %v3500_v62, 7  ;;  %v3512_v58 = vrot.slane %v3501_v12, 7  ;;  %v3569_v62 = vld [vmem:[#allocation3 + $0x24] sm:$0xff] }
 0x4cd   : > { %v3471_v37 = vor.u32 %v3470_v14, %v3467_v47  ;;  %v3477_v4 = vrot.slane %v3475_v60, 6  ;;  %v3480_v32 = vrot.slane %v3478_v30, 7  ;;  %v3533_v10 = vshrl.u32 %v3524_v22, 16  ;;  %v3564_v20 = vld [vmem:[#allocation3] sm:$0xff] }
 0x4ce   : > { %v3434_v43 = vsel %vm9554_vm9, %v3429_v40, %v3433_v18  ;;  %v3439_v19 = vrot.slane %v3438_v54, 4  ;;  %v3510_v50 = vsel %vm9632_vm1, %v7319_v26, %v3509_v23  ;;  %v3511_v42 = vrot.slane %v3509_v23, 4  ;;  %v3574_v48 = vld [vmem:[#allocation3 + $0x48] sm:$0xff]  ;;  %v8733_v54 = vld [vmem:[%s10801_s8 + $0x158] sm:$0xff]  }
 0x4cf   : > { %v3473_v63 = vrot.slane %v3471_v37, 4  ;;  %v3481_v45 = vor.u32 %v3480_v32, %v3477_v4  ;;  %v3514_v55 = vrot.slane %v3512_v58, 4  ;;  %v3535_v59 = vrot.slane %v3533_v10, 7  ;;  %3449 = vst [vmem:[#allocation3 + $0x38] sm:$0xf] %v3434_v43  ;;  %v8715_v18 = vld [vmem:[%s10801_s8 + $0x100] sm:$0xff]  }
 0x4d0   : > { %3520 = vst [vmem:[#allocation3 + $0x1c] sm:$0xf] %v3510_v50  ;;  %v3513_v1 = vsel %vm9632_vm1, %v3511_v42, %v3512_v58  ;;  %v3536_v9 = vshll.u32 %v3524_v22, 16  ;;  %v3542_v61 = vshrl.u32 %v3525_v39, 16  ;;  %v3545_v12 = vshll.u32 %v3525_v39, 16  ;;  %v8724_v4 = vld [vmem:[%s10801_s8 + $0x1d0] sm:$0xff]  }
 0x4d1   : > { %v3483_v13 = vrot.slane %v3481_v45, 4  ;;  %v3516_v3 = vsel %vm9632_vm1, %v3514_v55, %v3515_v6  ;;  %v3540_v26 = vrot.slane %v3535_v59, 4  ;;  %3521 = vst [vmem:[#allocation3 + $0x40] sm:$0xf] %v3513_v1  ;;  %v3343_v17 = vsel %vm9565_vm10, %v3334_v24, %v9947_v34  ;;  %v8719_v6 = vld [vmem:[%s10801_s8 + $0x148] sm:$0xff]   ;;  %v8735_v39 = vld [vmem:[%s10801_s8 + $0x118] sm:$0xff]  }
 0x4d2   : > { %v3538_v46 = vor.u32 %v3536_v9, %v3535_v59  ;;  %v3544_v22 = vrot.slane %v3542_v61, 7  ;;  %3522 = vst [vmem:[#allocation3 + $0x64] sm:$0xf] %v3516_v3  ;;  %3358 = vst [vmem:[#allocation3 + $0x2c] sm:$0xf] %v3343_v17  ;;  %v7322_v11 = vcombine.low %v3564_v20, %v3569_v62  ;;  %v7332_v47 = vcombine.high %v3574_v48, %v3574_v48  ;;  %v8737_v10 = vld [vmem:[%s10801_s8 + $0x160] sm:$0xff]  }
 0x4d3   : > { %v7320_v8 = vrot.slane %v3528_v35, 11  ;;  %v3353_v24 = vsel %vm9565_vm10, %v3344_v29, %v3352_v38  ;;  %v3472_v14 = vsel %vm9640_vm3, %v9937_v53, %v3471_v37  ;;  %v3482_v60 = vsel %vm9640_vm3, %v3473_v63, %v3481_v45  ;;  %v8721_v53 = vld [vmem:[%s10801_s8 + $0x108] sm:$0xff]   ;;  %v8728_v43 = vld [vmem:[%s10801_s8 + $0x190] sm:$0xff]   ;;  %v8734_v50 = vld [vmem:[%s10801_s8 + $0x1d8] sm:$0xff]  }
 0x4d4   : > { %v3547_v30 = vor.u32 %v3545_v12, %v3544_v22  ;;  %v3549_v40 = vrot.slane %v3544_v22, 4  ;;  %4273 = vmatmul.mubr.bf16.vlgmr.msra.gmra.mrb[52].mxu0 %v7322_v11  ;;  %3359 = vst [vmem:[#allocation3 + $0x50] sm:$0xf] %v3353_v24  ;;  %3496 = vst [vmem:[#allocation3 + $0x18] sm:$0xf] %v3472_v14  ;;  %v3444_v7 = vsel %vm9554_vm9, %v3439_v19, %v9907_v44  ;;  %v8720_v38 = vld [vmem:[%s10801_s8 + $0x1c8] sm:$0xff]  }
 0x4d5   : > { %3497 = vst [vmem:[#allocation3 + $0x3c] sm:$0xf] %v3482_v60  ;;  %v3492_v35 = vsel %vm9640_vm3, %v3483_v13, %v3491_v56  ;;  %7974 = vmatpush3.bf16.msra.mxu0 %v8715_v18  ;;  %4280 = vmatprep.mubr.bf16.mxu0 %v7332_v47  ;;  %3450 = vst [vmem:[#allocation3 + $0x5c] sm:$0xf] %v3444_v7  ;;  %v3539_v16 = vsel %vm9575_vm12, %v7320_v8, %v3538_v46  ;;  %v8716_v56 = vld [vmem:[%s10801_s8 + $0x180] sm:$0xff]   ;;  %v8722_v37 = vld [vmem:[%s10801_s8 + $0x188] sm:$0xff]  }
 0x4d6   : > { %3498 = vst [vmem:[#allocation3 + $0x60] sm:$0xf] %v3492_v35  ;;  %v3557_v44 = vsel %vm9575_vm12, %v3549_v40, %v9905_v0  ;;  %7975 = vmatprep.subr.bf16.mxu0 %v8719_v6  ;;  %v3548_v33 = vsel %vm9575_vm12, %v3540_v26, %v3547_v30  ;;  %3561 = vst [vmem:[#allocation3 + $0x20] sm:$0xf] %v3539_v16  ;;  %v8710_v0 = vld [vmem:[#allocation3 + $0xc] ss:$36 sps:$4 sm:$0xff]   ;;  %v7331_v29 = vcombine.low %v3574_v48, %v3574_v48 }
 0x4d7   : > { %3563 = vst [vmem:[#allocation3 + $0x68] sm:$0xf] %v3557_v44  ;;  %3562 = vst [vmem:[#allocation3 + $0x44] sm:$0xf] %v3548_v33  ;;  %4320 = vmatprep.mubr.bf16.mxu1 %v8710_v0  ;;  %v8729_v32 = vld [vmem:[#allocation3 + $0x14] ss:$36 sps:$4 sm:$0xff]  }
 0x4d8   : > { %v8739_v42 = vld [vmem:[%s10801_s8 + $0x120] sm:$0xff]   ;;  %v8731_v63 = vld [vmem:[#allocation3 + $0x1c] ss:$36 sps:$4 sm:$0xff]   ;;  %v8741_v45 = vld [vmem:[%s10801_s8 + $0x168] sm:$0xff]  }
 0x4d9   : > { %v8714_v34 = vld [vmem:[#allocation3 + $0x8] ss:$36 sps:$4 sm:$0xff]   ;;  %7976 = vmatpush3.bf16.msra.mxu0 %v8721_v53  ;;  %v8736_v55 = vld [vmem:[%s10801_s8 + $0x198] sm:$0xff]   ;;  %v8745_v48 = vld [vmem:[%s10801_s8 + $0x170] sm:$0xff]  }
 0x4da   : > { %7977 = vmatprep.subr.bf16.mxu0 %v8723_v31  ;;  %4321 = vmatmul.mubr.bf16.vlgmr.msra.gmra.mrb[48].mxu1 %v8714_v34  ;;  %v8738_v59 = vld [vmem:[%s10801_s8 + $0x1e0] sm:$0xff]   ;;  %v8743_v62 = vld [vmem:[%s10801_s8 + $0x128] sm:$0xff]   ;;  %v8747_v61 = vld [vmem:[%s10801_s8 + $0x130] sm:$0xff]  }
 0x4db   : > { %v3575_v23 = vld [vmem:[#allocation3 + $0x50] sm:$0xff]  ;;  %8002 = vmatpush3.bf16.msra.mxu1 %v8716_v56  ;;  %v8740_v1 = vld [vmem:[%s10801_s8 + $0x1a0] sm:$0xff]   ;;  %v8749_v12 = vld [vmem:[%s10801_s8 + $0x178] sm:$0xff]  }
 0x4dc   : > { %v7334_v58 = vcombine.high %v3575_v23, %v3575_v23  ;;  %4281 = vmatmul.mubr.bf16.gmra.mrb[56].mxu0 %v7331_v29  ;;  %8003 = vmatprep.subr.bf16.mxu1 %v8720_v38  ;;  %v7333_v19 = vcombine.low %v3575_v23, %v3575_v23  ;;  %v8742_v9 = vld [vmem:[%s10801_s8 + $0x1e8] sm:$0xff]   ;;  %v8746_v3 = vld [vmem:[%s10801_s8 + $0x1f0] sm:$0xff]   ;;  %v8751_v26 = vld [vmem:[%s10801_s8 + $0x138] sm:$0xff]  }
 0x4dd   : > { %7978 = vmatpush3.bf16.msra.mxu0 %v8727_v25  ;;  %4368 = vmatprep.mubr.bf16.mxu0 %v8729_v32  ;;  %v8744_v13 = vld [vmem:[%s10801_s8 + $0x1a8] sm:$0xff]   ;;  %v8754_v20 = vld [vmem:[%s10801_s8 + $0x200] sm:$0xff]   ;;  %v3571_v17 = vld [vmem:[#allocation3 + $0x34] sm:$0xff] }
 0x4de   : > { %4328 = vmatprep.mubr.bf16.mxu1 %v7334_v58  ;;  %7979 = vmatprep.subr.bf16.mxu0 %v8733_v54  ;;  %v8748_v18 = vld [vmem:[%s10801_s8 + $0x1b0] sm:$0xff]   ;;  %v8750_v11 = vld [vmem:[%s10801_s8 + $0x1f8] sm:$0xff]   ;;  %v8757_v8 = vld [vmem:[%s10801_s8 + $0x208] sm:$0xff]  }
 0x4df   : > { %8004 = vmatpush3.bf16.msra.mxu1 %v8722_v37  ;;  %v3576_v46 = vld [vmem:[#allocation3 + $0x58] sm:$0xff]  ;;  %v3566_v22 = vld [vmem:[#allocation3 + $0x10] sm:$0xff]  ;;  %v3577_v14 = vld [vmem:[#allocation3 + $0x60] sm:$0xff] }
 0x4e0   : > { %8005 = vmatprep.subr.bf16.mxu1 %v8724_v4  ;;  %v7326_v47 = vcombine.low %v3566_v22, %v3571_v17  ;;  %v7336_v6 = vcombine.high %v3576_v46, %v3576_v46  ;;  %v8752_v24 = vld [vmem:[%s10801_s8 + $0x1b8] sm:$0xff]   ;;  %v8760_v60 = vld [vmem:[%s10801_s8 + $0x210] sm:$0xff]   ;;  %v7338_v40 = vcombine.high %v3577_v14, %v3577_v14  ;;  %v7335_v7 = vcombine.low %v3576_v46, %v3576_v46  ;;  %v8763_v16 = vld [vmem:[%s10801_s8 + $0x220] sm:$0xff]  }
 0x4e1   : > { %7980 = vmatpush3.bf16.msra.mxu0 %v8735_v39  ;;  %v8753_v30 = vld [vmem:[#allocation3 + $0x18] ss:$36 sps:$4 sm:$0xff]   ;;  %v8761_v35 = vld [vmem:[#allocation3 + $0x20] ss:$36 sps:$4 sm:$0xff]   ;;  %v7337_v44 = vcombine.low %v3577_v14, %v3577_v14  ;;  %v8764_v31 = vld [vmem:[%s10801_s8 + $0x228] sm:$0xff]  }
 0x4e2   : > { %7981 = vmatprep.subr.bf16.mxu0 %v8737_v10  ;;  %4329 = vmatmul.mubr.bf16.gmra.mrb[52].mxu1 %v7333_v19  ;;  %v8762_v53 = vld [vmem:[%s10801_s8 + $0x218] sm:$0xff]   ;;  %v8765_v33 = vld [vmem:[%s10801_s8 + $0x230] sm:$0xff]   ;;  %v8767_v25 = vld [vmem:[#allocation3 + $0x68] ss:$0 sps:$4 sm:$0xff]  }
 0x4e3   : > { %8006 = vmatpush3.bf16.msra.mxu1 %v8728_v43  ;;  %4416 = vmatprep.mubr.bf16.mxu1 %v8731_v63  ;;  %v8766_v56 = vld [vmem:[%s10801_s8 + $0x238] sm:$0xff]   ;;  %v8768_v0 = vld [vmem:[%s10803_s10 + $0x40] sm:$0xff]   ;;  %v8772_v54 = vld [vmem:[%s10803_s10 + $0x48] sm:$0xff]  }
 0x4e4   : > { %8007 = vmatprep.subr.bf16.mxu1 %v8734_v50  ;;  %v8769_v34 = vld [vmem:[%s10803_s10 + $0xc0] sm:$0xff]   ;;  %v8773_v23 = vld [vmem:[%s10803_s10 + $0xc8] sm:$0xff]   ;;  %v8776_v4 = vld [vmem:[%s10803_s10 + $0x50] sm:$0xff]  }
 0x4e5   : > { %7982 = vmatpush3.bf16.msra.mxu0 %v8739_v42  ;;  %v8770_v38 = vld [vmem:[%s10803_s10] sm:$0xff]   ;;  %v8774_v58 = vld [vmem:[%s10803_s10 + $0x8] sm:$0xff]   ;;  %v8777_v32 = vld [vmem:[%s10803_s10 + $0xd0] sm:$0xff]  }
 0x4e6   : > { %7983 = vmatprep.subr.bf16.mxu0 %v8741_v45  ;;  %v8771_v29 = vld [vmem:[%s10803_s10 + $0x80] sm:$0xff]   ;;  %v8775_v37 = vld [vmem:[%s10803_s10 + $0x88] sm:$0xff]   ;;  %v8778_v39 = vld [vmem:[%s10803_s10 + $0x10] sm:$0xff]  }
 0x4e7   : > { %8008 = vmatpush3.bf16.msra.mxu1 %v8736_v55  ;;  %v8779_v10 = vld [vmem:[%s10803_s10 + $0x90] sm:$0xff]   ;;  %v8780_v43 = vld [vmem:[%s10803_s10 + $0x58] sm:$0xff]   ;;  %v8784_v63 = vld [vmem:[%s10803_s10 + $0x60] sm:$0xff]  }
 0x4e8   : > { %8009 = vmatprep.subr.bf16.mxu1 %v8738_v59  ;;  %v8781_v19 = vld [vmem:[%s10803_s10 + $0xd8] sm:$0xff]   ;;  %v8785_v45 = vld [vmem:[%s10803_s10 + $0xe0] sm:$0xff]  }
 0x4e9   : > { %7984 = vmatpush3.bf16.msra.mxu0 %v8743_v62  ;;  %v8782_v50 = vld [vmem:[%s10803_s10 + $0x18] sm:$0xff]   ;;  %v8786_v55 = vld [vmem:[%s10803_s10 + $0x20] sm:$0xff]   ;;  %v8788_v62 = vld [vmem:[%s10803_s10 + $0x68] sm:$0xff]  }
 0x4ea   : > { %7985 = vmatprep.subr.bf16.mxu0 %v8745_v48  ;;  %v8783_v42 = vld [vmem:[%s10803_s10 + $0x98] sm:$0xff]   ;;  %v8787_v59 = vld [vmem:[%s10803_s10 + $0xa0] sm:$0xff]   ;;  %v8789_v48 = vld [vmem:[%s10803_s10 + $0xe8] sm:$0xff]  }
 0x4eb   : > { %8010 = vmatpush3.bf16.msra.mxu1 %v8740_v1  ;;  %v8790_v1 = vld [vmem:[%s10803_s10 + $0x28] sm:$0xff]   ;;  %v8798_v17 = vld [vmem:[%s10803_s10 + $0x38] sm:$0xff]   ;;  %v8804_v46 = vld [vmem:[%s10803_s10 + $0x140] sm:$0xff]  }
 0x4ec   : > { %8011 = vmatprep.subr.bf16.mxu1 %v8742_v9  ;;  %v8791_v9 = vld [vmem:[%s10803_s10 + $0xa8] sm:$0xff]   ;;  %v8805_v22 = vld [vmem:[%s10803_s10 + $0x1c0] sm:$0xff]  }
 0x4ed   : > { %7986 = vmatpush3.bf16.msra.mxu0 %v8747_v61  ;;  %v8792_v61 = vld [vmem:[%s10803_s10 + $0x70] sm:$0xff]  }
 0x4ee   : > { %7987 = vmatprep.subr.bf16.mxu0 %v8749_v12  ;;  %v8793_v12 = vld [vmem:[%s10803_s10 + $0xf0] sm:$0xff]  }
 0x4ef   : > { %8012 = vmatpush3.bf16.msra.mxu1 %v8744_v13  ;;  %v8794_v13 = vld [vmem:[%s10803_s10 + $0x30] sm:$0xff]  }
 0x4f0   : > { %8013 = vmatprep.subr.bf16.mxu1 %v8746_v3  ;;  %v8795_v3 = vld [vmem:[%s10803_s10 + $0xb0] sm:$0xff]  }
 0x4f1   : > { %7988 = vmatpush3.bf16.msra.mxu0 %v8751_v26  ;;  %v8796_v26 = vld [vmem:[%s10803_s10 + $0x78] sm:$0xff]  }
 0x4f2   : > { %8435 = vmatprep.subr.bf16.mxu0 %v8754_v20 }
 0x4f3   : > { %8014 = vmatpush3.bf16.msra.mxu1 %v8748_v18  ;;  %v8799_v18 = vld [vmem:[%s10803_s10 + $0xb8] sm:$0xff]  }
 0x4f4   : > { %4369 = vmatmul.mubr.bf16.vlgmr.msra.gmra.mrb[60].mxu0 %v7326_v47  ;;  %8015 = vmatprep.subr.bf16.mxu1 %v8750_v11 }
 0x4f5   : > { %4376 = vmatprep.mubr.bf16.mxu0 %v7336_v6  ;;  %8436 = vmatpush3.bf16.msra.mxu0 %v8754_v20  ;;  %v8797_v20 = vld [vmem:[%s10803_s10 + $0xf8] sm:$0xff]  }
 0x4f6   : > { %8437 = vmatprep.subr.bf16.mxu0 %v8757_v8 }
 0x4f7   : > { %8016 = vmatpush3.bf16.msra.mxu1 %v8752_v24 }
 0x4f8   : > { %8039 = vmatprep.subr.bf16.mxu1 %v8768_v0 }
 0x4f9   : > { %8438 = vmatpush3.bf16.msra.mxu0 %v8757_v8 }
 0x4fa   : > { %4417 = vmatmul.mubr.bf16.vlgmr.msra.gmra.mrb[56].mxu1 %v8753_v30  ;;  %8439 = vmatprep.subr.bf16.mxu0 %v8760_v60 }
 0x4fb   : > { %4424 = vmatprep.mubr.bf16.mxu1 %v7338_v40  ;;  %8040 = vmatpush3.bf16.msra.mxu1 %v8770_v38 }
 0x4fc   : > { %4377 = vmatmul.mubr.bf16.gmra.mrb[64].mxu0 %v7335_v7  ;;  %8041 = vmatprep.subr.bf16.mxu1 %v8772_v54 }
 0x4fd   : > { %8451 = vmatprep.mubr.bf16.mxu0 %v8761_v35  ;;  %8440 = vmatpush3.bf16.msra.mxu0 %v8760_v60  ;;  %v7321_v60 = vld [vmem:[%s10802_s9] ss:$0 sm:$0xff] }
 0x4fe   : > { %8441 = vmatprep.subr.bf16.mxu0 %v8762_v53 }
 0x4ff   : > { %8042 = vmatpush3.bf16.msra.mxu1 %v8774_v58 }
 0x500   : > { %8043 = vmatprep.subr.bf16.mxu1 %v8776_v4 }
 0x501   : > { %8442 = vmatpush3.bf16.msra.mxu0 %v8762_v53 }
 0x502   : > { %4425 = vmatmul.mubr.bf16.gmra.mrb[60].mxu1 %v7337_v44  ;;  %8443 = vmatprep.subr.bf16.mxu0 %v8763_v16 }
 0x503   : > { %8044 = vmatpush3.bf16.msra.mxu1 %v8778_v39 }
 0x504   : > { %8045 = vmatprep.subr.bf16.mxu1 %v8780_v43 }
 0x505   : > { %8444 = vmatpush3.bf16.msra.mxu0 %v8763_v16 }
 0x506   : > { %8445 = vmatprep.subr.bf16.mxu0 %v8764_v31 }
 0x507   : > { %8046 = vmatpush3.bf16.msra.mxu1 %v8782_v50 }
 0x508   : > { %8047 = vmatprep.subr.bf16.mxu1 %v8784_v63 }
 0x509   : > { %8446 = vmatpush3.bf16.msra.mxu0 %v8764_v31 }
 0x50a   : > { %8447 = vmatprep.subr.bf16.mxu0 %v8765_v33 }
 0x50b   : > { %8048 = vmatpush3.bf16.msra.mxu1 %v8786_v55 }
 0x50c   : > { %8049 = vmatprep.subr.bf16.mxu1 %v8788_v62 }
 0x50d   : > { %8448 = vmatpush3.bf16.msra.mxu0 %v8765_v33 }
 0x50e   : > { %8449 = vmatprep.subr.bf16.mxu0 %v8766_v56 }
 0x50f   : > { %8050 = vmatpush3.bf16.msra.mxu1 %v8790_v1 }
 0x510   : > { %8051 = vmatprep.subr.bf16.mxu1 %v8792_v61 }
 0x511   : > { %8450 = vmatpush3.bf16.msra.mxu0 %v8766_v56 }
 0x512   : > { %8067 = vmatprep.subr.bf16.mxu0 %v8769_v34 }
 0x513   : > { %8052 = vmatpush3.bf16.msra.mxu1 %v8794_v13 }
 0x514   : > { %8452 = vmatmul.mubr.bf16.vlgmr.msra.gmra.mrb[68].mxu0 %v8767_v25  ;;  %8053 = vmatprep.subr.bf16.mxu1 %v8796_v26 }
 0x515   : > { %8068 = vmatpush3.bf16.msra.mxu0 %v8771_v29 }
 0x516   : > { %8069 = vmatprep.subr.bf16.mxu0 %v8773_v23 }
 0x517   : > { %8054 = vmatpush3.bf16.msra.mxu1 %v8798_v17 }
 0x518   : > { %8095 = vmatprep.subr.bf16.mxu1 %v8804_v46 }
 0x519   : > { %8070 = vmatpush3.bf16.msra.mxu0 %v8775_v37 }
 0x51a   : > { %8071 = vmatprep.subr.bf16.mxu0 %v8777_v32 }
 0x51d   : > { %8072 = vmatpush3.bf16.msra.mxu0 %v8779_v10 }
 0x51e   : > { %8073 = vmatprep.subr.bf16.mxu0 %v8781_v19 }
 0x521   : > { %8074 = vmatpush3.bf16.msra.mxu0 %v8783_v42 }
 0x522   : > { %8075 = vmatprep.subr.bf16.mxu0 %v8785_v45 }
 0x525   : > { %8076 = vmatpush3.bf16.msra.mxu0 %v8787_v59 }
 0x526   : > { %8077 = vmatprep.subr.bf16.mxu0 %v8789_v48 }
 0x529   : > { %8078 = vmatpush3.bf16.msra.mxu0 %v8791_v9 }
 0x52a   : > { %8079 = vmatprep.subr.bf16.mxu0 %v8793_v12 }
 0x52d   : > { %8080 = vmatpush3.bf16.msra.mxu0 %v8795_v3 }
 0x52e   : > { %8081 = vmatprep.subr.bf16.mxu0 %v8797_v20 }
 0x531   : > { %8082 = vmatpush3.bf16.msra.mxu0 %v8799_v18 }
 0x532   : > { %8123 = vmatprep.subr.bf16.mxu0 %v8805_v22 }
 0x5a7   : > { %v7933_v11 = vpop.f32.mrb[52].mxu0 }
 0x5a8   : > { %v7934_v47 = vpop.f32.mrb[53].mxu0 }
 0x5a9   : > { %v7935_v6 = vadd.f32 %v7934_v47, %v7933_v11  ;;  %v7936_v8 = vpop.f32.mrb[54].mxu0 }
 0x5aa   : > { %v7937_v24 = vpop.f32.mrb[55].mxu0 }
 0x5ab   : > { %v7938_v14 = vadd.f32 %v7937_v24, %v7936_v8  ;;  %v4275_v40 = vadd.f32 %v7935_v6, %v7321_v60 }
 0x5ad   : > { %v7961_v30 = vpop.f32.mrb[48].mxu1  ;;  %v4278_v31 = vadd.f32 %v7938_v14, %v7321_v60  ;;  %v4502_v14 = vld [vmem:[#allocation4] sm:$0xf] }
 0x5ae   : > { %v7962_v35 = vpop.f32.mrb[49].mxu1 }
 0x5af   : > { %v7939_v7 = vpop.f32.mrb[56].mxu0  ;;  %v7963_v16 = vadd.f32 %v7962_v35, %v7961_v30  ;;  %v7964_v44 = vpop.f32.mrb[50].mxu1  ;;  %v4507_v35 = vshrl.u32 %v4502_v14, 16 }
 0x5b0   : > { %v7940_v53 = vpop.f32.mrb[57].mxu0  ;;  %v7965_v25 = vpop.f32.mrb[51].mxu1 }
 0x5b1   : > { %v7941_v33 = vadd.f32 %v7940_v53, %v7939_v7  ;;  %v7942_v56 = vpop.f32.mrb[58].mxu0  ;;  %v4323_v34 = vadd.f32 %v7963_v16, %v4275_v40  ;;  %v7966_v38 = vadd.f32 %v7965_v25, %v7964_v44  ;;  %v4510_v53 = vshll.u32 %v4502_v14, 16 }
 0x5b2   : > { %v7943_v0 = vpop.f32.mrb[59].mxu0 }
 0x5b3   : > { %v4326_v29 = vadd.f32 %v7966_v38, %v4278_v31  ;;  %v4283_v23 = vadd.f32 %v7941_v33, %v7321_v60  ;;  %v4570_v60 = vld [vmem:[#allocation4] sm:$0xe]  ;;  %v4509_v38 = vrot.slane %v4507_v35, 4 }
 0x5b4   : > { %v4575_v31 = vshrl.u32 %v4570_v60, 16  ;;  %v4578_v33 = vshll.u32 %v4570_v60, 16 }
 0x5b5   : > { %v7967_v54 = vpop.f32.mrb[52].mxu1 }
 0x5b6   : > { %v7968_v58 = vpop.f32.mrb[53].mxu1 }
 0x5b7   : > { %v7969_v37 = vadd.f32 %v7968_v58, %v7967_v54  ;;  %v7970_v4 = vpop.f32.mrb[54].mxu1  ;;  %v4577_v58 = vrot.slane %v4575_v31, 5 }
 0x5b8   : > { %v7971_v32 = vpop.f32.mrb[55].mxu1 }
 0x5b9   : > { %v4331_v39 = vadd.f32 %v7969_v37, %v4283_v23  ;;  %v4580_v37 = vrot.slane %v4578_v33, 6  ;;  %v4618_v32 = vld [vmem:[#allocation4] sm:$0x8] }
 0x5c7   : > { %v7989_v10 = vpop.f32.mrb[60].mxu0 }
 0x5c8   : > { %v7990_v43 = vpop.f32.mrb[61].mxu0 }
 0x5c9   : > { %v7991_v19 = vadd.f32 %v7990_v43, %v7989_v10  ;;  %v7992_v50 = vpop.f32.mrb[62].mxu0  ;;  %v4668_v10 = vld [vmem:[#allocation4 + $0x10] sm:$0x1] }
 0x5ca   : > { %v7993_v42 = vpop.f32.mrb[63].mxu0  ;;  %v10246_v43 = vld [vmem:[#allocation4 + $0x10] sm:$0xf] }
 0x5cb   : > { %v4371_v63 = vadd.f32 %v7991_v19, %v4323_v34  ;;  %v7994_v45 = vadd.f32 %v7993_v42, %v7992_v50  ;;  %v4546_v50 = vld [vmem:[#allocation4] sm:$0xe]  ;;  %v4581_v42 = vor.u32 %v4580_v37, %v4577_v58 }
 0x5cd   : > { %v4374_v55 = vadd.f32 %v7994_v45, %v4326_v29  ;;  %v8017_v59 = vpop.f32.mrb[56].mxu1  ;;  %v4512_v29 = vrot.slane %v4510_v53, 5 }
 0x5ce   : > { %v8018_v62 = vpop.f32.mrb[57].mxu1 }
 0x5cf   : > { %v7995_v48 = vpop.f32.mrb[64].mxu0  ;;  %v8019_v1 = vadd.f32 %v8018_v62, %v8017_v59  ;;  %v8020_v9 = vpop.f32.mrb[58].mxu1  ;;  %v10248_v62 = vld [vmem:[#allocation4 + $0x10] sm:$0x7] }
 0x5d0   : > { %v7996_v61 = vpop.f32.mrb[65].mxu0  ;;  %v8021_v12 = vpop.f32.mrb[59].mxu1 }
 0x5d1   : > { %v7997_v13 = vadd.f32 %v7996_v61, %v7995_v48  ;;  %v7998_v3 = vpop.f32.mrb[66].mxu0  ;;  %v8022_v26 = vadd.f32 %v8021_v12, %v8020_v9  ;;  %v4419_v17 = vadd.f32 %v8019_v1, %v4371_v63  ;;  %v4623_v63 = vshrl.u32 %v4618_v32, 16 }
 0x5d2   : > { %v7999_v20 = vpop.f32.mrb[67].mxu0  ;;  %v4809_v48 = vshrl.u32 %v10246_v43, 16  ;;  %v7415_v9 = vrot.slane %v4546_v50, 9  ;;  %v10251_v61 = vrot.slane %v4581_v42, 4  ;;  %v4773_v3 = vrot.slane %v10248_v62, 7  ;;  %v8831_v62 = vld [vmem:[%s10803_s10 + $0x120] sm:$0xff]  }
 0x5d3   : > { %v4379_v18 = vadd.f32 %v7997_v13, %v4331_v39  ;;  %v4422_v46 = vadd.f32 %v8022_v26, %v4374_v55  ;;  %v4712_v39 = vld [vmem:[#allocation4 + $0x10] sm:$0x7]  ;;  %v4699_v55 = vshll.u32 %v4668_v10, 16  ;;  %v10253_v12 = vrot.slane %v4623_v63, 11 }
 0x5d4   : > { %v4743_v45 = vshrl.u32 %v4712_v39, 16  ;;  %v4746_v59 = vshll.u32 %v4712_v39, 16 }
 0x5d5   : > { %v8023_v22 = vpop.f32.mrb[60].mxu1  ;;  %v10258_v26 = vrot.slane %v4699_v55, 5 }
 0x5d6   : > { %v8024_v11 = vpop.f32.mrb[61].mxu1  ;;  %v10255_v13 = vrot.slane %v4743_v45, 6  ;;  %v10260_v20 = vrot.slane %v4746_v59, 7 }
 0x5d7   : > { %v8025_v47 = vadd.f32 %v8024_v11, %v8023_v22  ;;  %v8026_v6 = vpop.f32.mrb[62].mxu1 }
 0x5d8   : > { %v8027_v8 = vpop.f32.mrb[63].mxu1 }
 0x5d9   : > { %v4427_v24 = vadd.f32 %v8025_v47, %v4379_v18  ;;  %v4812_v18 = vshll.u32 %v10246_v43, 16  ;;  %v8830_v43 = vld [vmem:[%s10803_s10 + $0x1e0] sm:$0xff]  }
 0x5e7   : > { %v8453_v30 = vpop.f32.mrb[68].mxu0 }
 0x5e8   : > { %v4475_v40 = vadd.f32 %v8453_v30, %v4427_v24  ;;  %v4466_v7 = vpop.f32.mrb[69].mxu0 }
 0x5e9   : > { %v4467_v16 = vadd.f32 %v4466_v7, %v4419_v17  ;;  %v8454_v44 = vpop.f32.mrb[70].mxu0  ;;  %v10262_v17 = vrot.slane %v4809_v48, 7 }
 0x5ea   : > { %v4469_v56 = vpop.f32.mrb[71].mxu0  ;;  %v10229_v25 = vadd.f32 %v4475_v40, %v9530_v57 }
 0x5eb   : > { %v10232_v0 = vadd.f32 %v4467_v16, %v9495_v27  ;;  %v4470_v34 = vadd.f32 %v4469_v56, %v4422_v46 }
 0x5ec   : > { %v4485_v27 = vsel %vm9524_vm4, %v10229_v25, 0.0 }
 0x5ed   : > { %v4483_v54 = vsel %vm9491_vm11, %v10232_v0, 0.0  ;;  %v10238_v23 = vadd.f32 %v4470_v34, %v9518_v51  ;;  %v4513_v51 = vor.u32 %v4512_v29, %v4509_v38 }
 0x5ee   : > { %v7643_v4 = vpack.c.bf16 %v4483_v54, %v4483_v54 }
 0x5ef   : > { %v4484_v57 = vsel %vm9520_vm2, %v10238_v23, 0.0  ;;  %v4514_v1 = vrot.slane %v4513_v51, 4 }
 0x5f0   : > { %4499 = vst [vmem:[#allocation4 + $0x4] sm:$0xf] %v7643_v4  ;;  %v7662_v19 = vpack.c.bf16 %v4485_v27, %v4484_v57 }
 0x5f2   : > { %7671 = vst [vmem:[#allocation4 + $0x8] sm:$0xff] %v7662_v19  }
 0x5f7   : > { %v4503_v46 = vld [vmem:[#allocation4 + $0x4] sm:$0xf] }
 0x5f8   : > { %v4547_v22 = vld [vmem:[#allocation4 + $0x4] sm:$0xf]  ;;  %v4516_v47 = vshll.u32 %v4503_v46, 16  ;;  %v4520_v6 = vshrl.u32 %v4503_v46, 16 }
 0x5f9   : > { %v4571_v11 = vld [vmem:[#allocation4 + $0x4] sm:$0xf]  ;;  %v4556_v8 = vrot.slane %v4547_v22, 5  ;;  %v4504_v14 = vld [vmem:[#allocation4 + $0x8] sm:$0xf] }
 0x5fa   : > { %v4584_v24 = vshrl.u32 %v4571_v11, 16  ;;  %v4548_v60 = vld [vmem:[#allocation4 + $0x8] sm:$0xf]  ;;  %v4619_v30 = vld [vmem:[#allocation4 + $0x4] sm:$0xf]  ;;  %v4518_v40 = vrot.slane %v4516_v47, 5 }
 0x5fb   : > { %v4522_v7 = vrot.slane %v4520_v6, 4  ;;  %v4526_v35 = vshll.u32 %v4504_v14, 16  ;;  %v4530_v53 = vshrl.u32 %v4504_v14, 16  ;;  %v4572_v16 = vld [vmem:[#allocation4 + $0x8] sm:$0xf]  ;;  %v4557_v44 = vsel %vm9547_vm8, %v7415_v9, %v4556_v8 }
 0x5fc   : > { %v4558_v31 = vrot.slane %v4556_v8, 4  ;;  %v4559_v33 = vrot.slane %v4548_v60, 5  ;;  %v4586_v56 = vrot.slane %v4584_v24, 5  ;;  %v4620_v34 = vld [vmem:[#allocation4 + $0x8] sm:$0xf]  ;;  %v4519_v38 = vsel %vm9554_vm9, %v4514_v1, %v4518_v40 }
 0x5fd   : > { %v4523_v29 = vor.u32 %v4522_v7, %v4518_v40  ;;  %v4528_v54 = vrot.slane %v4526_v35, 5  ;;  %4567 = vst [vmem:[#allocation3 + $0x4] sm:$0xf] %v4557_v44  ;;  %v4587_v58 = vshll.u32 %v4571_v11, 16  ;;  %4543 = vst [vmem:[#allocation3] sm:$0xf] %v4519_v38 }
 0x5fe   : > { %v4560_v37 = vsel %vm9547_vm8, %v4558_v31, %v4559_v33  ;;  %v4594_v4 = vshrl.u32 %v4572_v16, 16  ;;  %v4597_v32 = vshll.u32 %v4572_v16, 16  ;;  %v4628_v39 = vshrl.u32 %v4619_v30, 16  ;;  %v4505_v27 = vld [vmem:[#allocation4 + $0xc] sm:$0x1] }
 0x5ff   : > { %v4524_v57 = vrot.slane %v4523_v29, 4  ;;  %4568 = vst [vmem:[#allocation3 + $0x28] sm:$0xf] %v4560_v37  ;;  %v4589_v10 = vrot.slane %v4587_v58, 6  ;;  %v4631_v19 = vshll.u32 %v4619_v30, 16  ;;  %v4637_v51 = vshrl.u32 %v4620_v34, 16 }
 0x600   : > { %v4659_v50 = vld [vmem:[#allocation4 + $0x4] sm:$0xf]  ;;  %v4596_v42 = vrot.slane %v4594_v4, 5  ;;  %v4599_v63 = vrot.slane %v4597_v32, 6  ;;  %v4630_v45 = vrot.slane %v4628_v39, 7  ;;  %v4640_v55 = vshll.u32 %v4620_v34, 16 }
 0x601   : > { %v4660_v59 = vld [vmem:[#allocation4 + $0x8] sm:$0xf]  ;;  %4662 = vst [vmem:[#allocation3 + $0x10] sm:$0xf] %v4659_v50  ;;  %v4529_v48 = vsel %vm9554_vm9, %v4524_v57, %v4528_v54  ;;  %v4590_v1 = vor.u32 %v4589_v10, %v4586_v56  ;;  %v10273_v9 = vrot.slane %v4637_v51, 7  ;;  %v4532_v46 = vrot.slane %v4530_v53, 4 }
 0x602   : > { %v4549_v22 = vld [vmem:[#allocation4 + $0xc] sm:$0x1]  ;;  %4663 = vst [vmem:[#allocation3 + $0x34] sm:$0xf] %v4660_v59  ;;  %4544 = vst [vmem:[#allocation3 + $0x24] sm:$0xf] %v4529_v48  ;;  %v10275_v11 = vor.u32 %v4599_v63, %v4596_v42  ;;  %v4633_v47 = vor.u32 %v4631_v19, %v4630_v45 }
 0x603   : > { %v4635_v6 = vrot.slane %v4630_v45, 4  ;;  %v4536_v8 = vshll.u32 %v4505_v27, 16  ;;  %v4591_v24 = vsel %vm9565_vm10, %v10251_v61, %v4590_v1  ;;  %v4592_v14 = vrot.slane %v4590_v1, 4  ;;  %v4573_v40 = vld [vmem:[#allocation4 + $0xc] sm:$0x3]  ;;  %v8807_v51 = vld [vmem:[%s10803_s10 + $0x100] sm:$0xff]  }
 0x604   : > { %v4642_v60 = vor.u32 %v4640_v55, %v10273_v9  ;;  %v4533_v30 = vor.u32 %v4532_v46, %v4528_v54  ;;  %v4621_v7 = vld [vmem:[#allocation4 + $0xc] sm:$0xf]  ;;  %4615 = vst [vmem:[#allocation3 + $0x8] sm:$0xf] %v4591_v24  ;;  %v4634_v35 = vsel %vm9575_vm12, %v10253_v12, %v4633_v47  ;;  %v4561_v16 = vrot.slane %v4559_v33, 4  ;;  %v4822_v19 = vld [vmem:[#allocation3] sm:$0xff] }
 0x605   : > { %v4538_v53 = vrot.slane %v4536_v8, 5  ;;  %v4562_v44 = vrot.slane %v4549_v22, 5  ;;  %v4665_v31 = vld [vmem:[#allocation4 + $0x4] sm:$0xf]  ;;  %v4601_v56 = vsel %vm9565_vm10, %v4592_v14, %v10275_v11  ;;  %4656 = vst [vmem:[#allocation3 + $0xc] sm:$0xf] %v4634_v35 }
 0x606   : > { %v4643_v61 = vsel %vm9575_vm12, %v4635_v6, %v4642_v60  ;;  %v4534_v34 = vrot.slane %v4533_v30, 4  ;;  %v4602_v38 = vrot.slane %v10275_v11, 4  ;;  %v4666_v29 = vld [vmem:[#allocation4 + $0x8] sm:$0xf]  ;;  %4616 = vst [vmem:[#allocation3 + $0x2c] sm:$0xf] %v4601_v56 }
 0x607   : > { %4657 = vst [vmem:[#allocation3 + $0x30] sm:$0xf] %v4643_v61  ;;  %v4563_v12 = vsel %vm9547_vm8, %v4561_v16, %v4562_v44  ;;  %v4604_v33 = vshrl.u32 %v4573_v40, 16  ;;  %v4607_v54 = vshll.u32 %v4573_v40, 16  ;;  %v4644_v58 = vrot.slane %v10273_v9, 4  ;;  %v8811_v11 = vld [vmem:[%s10803_s10 + $0x148] sm:$0xff]  }
 0x608   : > { %v10293_v37 = vld [vmem:[#allocation4 + $0xc] sm:$0xf]  ;;  %v4539_v4 = vsel %vm9554_vm9, %v4534_v34, %v4538_v53  ;;  %4569 = vst [vmem:[#allocation3 + $0x4c] sm:$0xf] %v4563_v12  ;;  %v4646_v32 = vshrl.u32 %v4621_v7, 16  ;;  %v4649_v39 = vshll.u32 %v4621_v7, 16 }
 0x609   : > { %v4670_v27 = vshrl.u32 %v4665_v31, 16  ;;  %v4709_v57 = vld [vmem:[#allocation4 + $0x4] sm:$0xc]  ;;  %v4661_v10 = vld [vmem:[#allocation4 + $0xc] sm:$0xf]  ;;  %v4606_v50 = vrot.slane %v4604_v33, 5 }
 0x60a   : > { %4545 = vst [vmem:[#allocation3 + $0x48] sm:$0xf] %v4539_v4  ;;  %v4609_v42 = vrot.slane %v4607_v54, 6  ;;  %v4673_v63 = vshll.u32 %v4665_v31, 16  ;;  %v4679_v45 = vshll.u32 %v4666_v29, 16  ;;  %v4827_v55 = vld [vmem:[#allocation3 + $0x24] sm:$0xff]  ;;  %v4749_v54 = vor.u32 %v10260_v20, %v10255_v13 }
 0x60b   : > { %4664 = vst [vmem:[#allocation3 + $0x58] sm:$0xf] %v4661_v10  ;;  %v8800_v59 = vld [vmem:[#allocation3 + $0x4] ss:$36 sps:$4 sm:$0xff]   ;;  %v4648_v48 = vrot.slane %v4646_v32, 7  ;;  %v4672_v1 = vrot.slane %v4670_v27, 4  ;;  %v7420_v46 = vcombine.low %v4822_v19, %v4827_v55  ;;  %v4814_v20 = vor.u32 %v4812_v18, %v10262_v17 }
 0x60c   : > { %v4683_v9 = vshrl.u32 %v4666_v29, 16  ;;  %v4610_v22 = vor.u32 %v4609_v42, %v4606_v50  ;;  %v4675_v47 = vrot.slane %v4673_v63, 5  ;;  %v4681_v6 = vrot.slane %v4679_v45, 5  ;;  %5530 = vmatprep.mubr.bf16.mxu1 %v8800_v59  ;;  %v8808_v8 = vld [vmem:[%s10803_s10 + $0x180] sm:$0xff]   ;;  %v4710_v40 = vld [vmem:[#allocation4 + $0x8] sm:$0xf] }
 0x60d   : > { %v4651_v24 = vor.u32 %v4649_v39, %v4648_v48  ;;  %v4689_v60 = vshll.u32 %v10293_v37, 16  ;;  %v4693_v30 = vshrl.u32 %v10293_v37, 16  ;;  %5531 = vmatmul.mubr.bf16.vlgmr.msra.gmra.mrb[64].mxu1 %v7420_v46  ;;  %v8812_v35 = vld [vmem:[%s10803_s10 + $0x1c8] sm:$0xff]   ;;  %v4711_v44 = vld [vmem:[#allocation4 + $0xc] sm:$0xf]  ;;  %v4714_v31 = vshrl.u32 %v4709_v57, 16 }
 0x60e   : > { %v4685_v14 = vrot.slane %v4683_v9, 4  ;;  %v4611_v7 = vsel %vm9565_vm10, %v4602_v38, %v4610_v22  ;;  %v8813_v53 = vld [vmem:[%s10803_s10 + $0x108] sm:$0xff]   ;;  %v4676_v16 = vor.u32 %v4675_v47, %v4672_v1  ;;  %v4717_v56 = vshll.u32 %v4709_v57, 16  ;;  %8096 = vmatpush3.bf16.msra.mxu1 %v8807_v51  ;;  %v4758_v27 = vld [vmem:[#allocation4 + $0x8] sm:$0xf] }
 0x60f   : > { %v8802_v61 = vld [vmem:[#allocation3 + $0xc] ss:$36 sps:$4 sm:$0xff]   ;;  %4617 = vst [vmem:[#allocation3 + $0x50] sm:$0xf] %v4611_v7  ;;  %v4652_v29 = vsel %vm9575_vm12, %v4644_v58, %v4651_v24  ;;  %v10318_v12 = vrot.slane %v4689_v60, 5  ;;  %8097 = vmatprep.subr.bf16.mxu1 %v8811_v11  ;;  %v4716_v4 = vrot.slane %v4714_v31, 6 }
 0x610   : > { %v8806_v34 = vld [vmem:[#allocation3 + $0x8] ss:$36 sps:$4 sm:$0xff]   ;;  %v4686_v38 = vor.u32 %v4685_v14, %v4681_v6  ;;  %v4757_v33 = vld [vmem:[#allocation4 + $0x4] sm:$0x8]  ;;  %4658 = vst [vmem:[#allocation3 + $0x54] sm:$0xf] %v4652_v29  ;;  %5578 = vmatprep.mubr.bf16.mxu0 %v8802_v61 }
 0x611   : > { %v4677_v37 = vrot.slane %v4676_v16, 4  ;;  %v4719_v32 = vrot.slane %v4717_v56, 7  ;;  %v4723_v39 = vshrl.u32 %v4710_v40, 16  ;;  %v4832_v57 = vld [vmem:[#allocation3 + $0x48] sm:$0xff]  ;;  %v8815_v58 = vld [vmem:[%s10803_s10 + $0x150] sm:$0xff]   ;;  %v4726_v19 = vshll.u32 %v4710_v40, 16  ;;  %5579 = vmatmul.mubr.bf16.vlgmr.msra.gmra.mrb[72].mxu0 %v8806_v34 }
 0x612   : > { %v4687_v10 = vrot.slane %v4686_v38, 4  ;;  %v4733_v51 = vshrl.u32 %v4711_v44, 16  ;;  %v4736_v50 = vshll.u32 %v4711_v44, 16  ;;  %v7430_v42 = vcombine.high %v4832_v57, %v4832_v57  ;;  %v8814_v63 = vld [vmem:[%s10803_s10 + $0x188] sm:$0xff]   ;;  %v4759_v48 = vld [vmem:[#allocation4 + $0xc] sm:$0xf]  ;;  %8124 = vmatpush3.bf16.msra.mxu0 %v8808_v8  ;;  %8098 = vmatpush3.bf16.msra.mxu1 %v8813_v53 }
 0x613   : > { %v7429_v45 = vcombine.low %v4832_v57, %v4832_v57  ;;  %v4682_v55 = vsel %vm9554_vm9, %v4677_v37, %v4681_v6  ;;  %v4720_v59 = vor.u32 %v4719_v32, %v4716_v4  ;;  %v10330_v1 = vld [vmem:[#allocation4 + $0x4] sm:$0x8]  ;;  %v8819_v9 = vld [vmem:[%s10803_s10 + $0x110] sm:$0xff]   ;;  %v4725_v22 = vrot.slane %v4723_v39, 6  ;;  %8125 = vmatprep.subr.bf16.mxu0 %v8812_v35  ;;  %v8825_v7 = vld [vmem:[%s10803_s10 + $0x158] sm:$0xff]   ;;  %8099 = vmatprep.subr.bf16.mxu1 %v8815_v58 }
 0x614   : > { %v4692_v46 = vsel %vm9554_vm9, %v4687_v10, %v10318_v12  ;;  %4706 = vst [vmem:[#allocation3 + $0x14] sm:$0xf] %v4682_v55  ;;  %v4728_v11 = vrot.slane %v4726_v19, 7  ;;  %v4735_v47 = vrot.slane %v4733_v51, 6  ;;  %v10338_v24 = vld [vmem:[#allocation4 + $0x8] sm:$0xf]  ;;  %5538 = vmatprep.mubr.bf16.mxu1 %v7430_v42 }
 0x615   : > { %v8816_v6 = vld [vmem:[%s10803_s10 + $0x1d0] sm:$0xff]   ;;  %4707 = vst [vmem:[#allocation3 + $0x38] sm:$0xf] %v4692_v46  ;;  %v4721_v8 = vrot.slane %v4720_v59, 4  ;;  %v4738_v14 = vrot.slane %v4736_v50, 7  ;;  %v7417_v60 = vrot.slane %v4757_v33, 11  ;;  %5539 = vmatmul.mubr.bf16.gmra.mrb[68].mxu1 %v7429_v45 }
 0x616   : > { %v4767_v40 = vrot.slane %v4758_v27, 7  ;;  %v4729_v53 = vor.u32 %v4728_v11, %v4725_v22  ;;  %v4770_v16 = vrot.slane %v4759_v48, 7  ;;  %v4695_v44 = vrot.slane %v4693_v30, 4  ;;  %8126 = vmatpush3.bf16.msra.mxu0 %v8814_v63  ;;  %8100 = vmatpush3.bf16.msra.mxu1 %v8819_v9  ;;  %v8827_v30 = vld [vmem:[%s10803_s10 + $0x118] sm:$0xff]   ;;  %v4783_v32 = vld [vmem:[#allocation4 + $0xc] sm:$0xf] }
 0x617   : > { %v4786_v31 = vshrl.u32 %v10330_v1, 16  ;;  %v4739_v35 = vor.u32 %v4738_v14, %v4735_v47  ;;  %v4791_v34 = vshrl.u32 %v10338_v24, 16  ;;  %v4833_v29 = vld [vmem:[#allocation3 + $0x50] sm:$0xff]  ;;  %8127 = vmatprep.subr.bf16.mxu0 %v8816_v6  ;;  %8101 = vmatprep.subr.bf16.mxu1 %v8825_v7  ;;  %v8829_v58 = vld [vmem:[%s10803_s10 + $0x160] sm:$0xff]   ;;  %v8826_v51 = vld [vmem:[%s10803_s10 + $0x1d8] sm:$0xff]   ;;  %v4794_v55 = vshll.u32 %v10338_v24, 16 }
 0x618   : > { %v4768_v56 = vsel %vm9632_vm1, %v7417_v60, %v4767_v40  ;;  %v4769_v61 = vrot.slane %v4767_v40, 4  ;;  %v4730_v38 = vsel %vm9640_vm3, %v4721_v8, %v4729_v53  ;;  %v4731_v33 = vrot.slane %v4729_v53, 4  ;;  %v8820_v27 = vld [vmem:[%s10803_s10 + $0x190] sm:$0xff]   ;;  %v8833_v1 = vld [vmem:[%s10803_s10 + $0x168] sm:$0xff]   ;;  %v8832_v24 = vld [vmem:[%s10803_s10 + $0x1a0] sm:$0xff]  }
 0x619   : > { %4778 = vst [vmem:[#allocation3 + $0x1c] sm:$0xf] %v4768_v56  ;;  %v4696_v37 = vor.u32 %v4695_v44, %v10318_v12  ;;  %v4772_v4 = vrot.slane %v4770_v16, 4  ;;  %v7432_v39 = vcombine.high %v4833_v29, %v4833_v29  ;;  %4754 = vst [vmem:[#allocation3 + $0x18] sm:$0xf] %v4730_v38  ;;  %v4741_v10 = vrot.slane %v4739_v35, 4 }
 0x61a   : > { %v4771_v57 = vsel %vm9632_vm1, %v4769_v61, %v4770_v16  ;;  %v7431_v19 = vcombine.low %v4833_v29, %v4833_v29  ;;  %v4740_v12 = vsel %vm9640_vm3, %v4731_v33, %v4739_v35  ;;  %v4793_v45 = vrot.slane %v4791_v34, 7  ;;  %8102 = vmatpush3.bf16.msra.mxu1 %v8827_v30  ;;  %8128 = vmatpush3.bf16.msra.mxu0 %v8820_v27  ;;  %v8835_v47 = vld [vmem:[%s10803_s10 + $0x128] sm:$0xff]   ;;  %v8837_v6 = vld [vmem:[%s10803_s10 + $0x170] sm:$0xff]   ;;  %v8841_v16 = vld [vmem:[%s10803_s10 + $0x178] sm:$0xff]  }
 0x61b   : > { %4779 = vst [vmem:[#allocation3 + $0x40] sm:$0xf] %v4771_v57  ;;  %v4697_v50 = vrot.slane %v4696_v37, 4  ;;  %v4774_v42 = vsel %vm9632_vm1, %v4772_v4, %v4773_v3  ;;  %5586 = vmatprep.mubr.bf16.mxu0 %v7432_v39  ;;  %4755 = vst [vmem:[#allocation3 + $0x3c] sm:$0xf] %v4740_v12  ;;  %v4750_v63 = vsel %vm9640_vm3, %v4741_v10, %v4749_v54  ;;  %v4800_v59 = vshrl.u32 %v4783_v32, 16 }
 0x61c   : > { %4780 = vst [vmem:[#allocation3 + $0x64] sm:$0xf] %v4774_v42  ;;  %5587 = vmatmul.mubr.bf16.gmra.mrb[76].mxu0 %v7431_v19  ;;  %v8821_v48 = vld [vmem:[#allocation3 + $0x14] ss:$36 sps:$4 sm:$0xff]   ;;  %4756 = vst [vmem:[#allocation3 + $0x60] sm:$0xf] %v4750_v63  ;;  %8103 = vmatprep.subr.bf16.mxu1 %v8829_v58  ;;  %v4796_v9 = vor.u32 %v4794_v55, %v4793_v45 }
 0x61d   : > { %v4702_v3 = vsel %vm9554_vm9, %v4697_v50, %v10258_v26  ;;  %v7418_v13 = vrot.slane %v4786_v31, 11  ;;  %v8828_v54 = vld [vmem:[%s10803_s10 + $0x198] sm:$0xff]   ;;  %v4798_v46 = vrot.slane %v4793_v45, 4  ;;  %v4802_v26 = vrot.slane %v4800_v59, 7  ;;  %5626 = vmatprep.mubr.bf16.mxu1 %v8821_v48  ;;  %8129 = vmatprep.subr.bf16.mxu0 %v8826_v51  ;;  %v8834_v40 = vld [vmem:[%s10803_s10 + $0x1e8] sm:$0xff]   ;;  %v8839_v7 = vld [vmem:[%s10803_s10 + $0x130] sm:$0xff]  }
 0x61e   : > { %4708 = vst [vmem:[#allocation3 + $0x5c] sm:$0xf] %v4702_v3  ;;  %v4803_v22 = vshll.u32 %v4783_v32, 16  ;;  %8104 = vmatpush3.bf16.msra.mxu1 %v8831_v62  ;;  %8130 = vmatpush3.bf16.msra.mxu0 %v8828_v54  ;;  %v8836_v53 = vld [vmem:[%s10803_s10 + $0x1a8] sm:$0xff]   ;;  %v8838_v44 = vld [vmem:[%s10803_s10 + $0x1f0] sm:$0xff]   ;;  %v8843_v35 = vld [vmem:[%s10803_s10 + $0x138] sm:$0xff]  }
 0x61f   : > { %v4797_v17 = vsel %vm9575_vm12, %v7418_v13, %v4796_v9  ;;  %v4807_v11 = vrot.slane %v4802_v26, 4  ;;  %8105 = vmatprep.subr.bf16.mxu1 %v8833_v1  ;;  %8131 = vmatprep.subr.bf16.mxu0 %v8830_v43  ;;  %v8840_v31 = vld [vmem:[%s10803_s10 + $0x1b0] sm:$0xff]   ;;  %v8846_v56 = vld [vmem:[%s10803_s10 + $0x200] sm:$0xff]   ;;  %v8842_v34 = vld [vmem:[%s10803_s10 + $0x1f8] sm:$0xff]  }
 0x620   : > { %v4805_v18 = vor.u32 %v4803_v22, %v4802_v26  ;;  %4819 = vst [vmem:[#allocation3 + $0x20] sm:$0xf] %v4797_v17  ;;  %v4829_v61 = vld [vmem:[#allocation3 + $0x34] sm:$0xff]  ;;  %v8844_v33 = vld [vmem:[%s10803_s10 + $0x1b8] sm:$0xff]   ;;  %v8849_v37 = vld [vmem:[%s10803_s10 + $0x208] sm:$0xff]  }
 0x621   : > { %v4815_v14 = vsel %vm9575_vm12, %v4807_v11, %v4814_v20  ;;  %v4824_v38 = vld [vmem:[#allocation3 + $0x10] sm:$0xff]  ;;  %v8854_v10 = vld [vmem:[%s10803_s10 + $0x218] sm:$0xff]   ;;  %v8855_v12 = vld [vmem:[%s10803_s10 + $0x220] sm:$0xff]  }
 0x622   : > { %v4806_v8 = vsel %vm9575_vm12, %v4798_v46, %v4805_v18  ;;  %v8823_v60 = vld [vmem:[#allocation3 + $0x1c] ss:$36 sps:$4 sm:$0xff]   ;;  %4821 = vst [vmem:[#allocation3 + $0x68] sm:$0xf] %v4815_v14  ;;  %8106 = vmatpush3.bf16.msra.mxu1 %v8835_v47  ;;  %8132 = vmatpush3.bf16.msra.mxu0 %v8832_v24  ;;  %v7424_v30 = vcombine.low %v4824_v38, %v4829_v61  ;;  %v8852_v39 = vld [vmem:[%s10803_s10 + $0x210] sm:$0xff]   ;;  %v8856_v50 = vld [vmem:[%s10803_s10 + $0x228] sm:$0xff]  }
 0x623   : > { %4820 = vst [vmem:[#allocation3 + $0x44] sm:$0xf] %v4806_v8  ;;  %5674 = vmatprep.mubr.bf16.mxu0 %v8823_v60  ;;  %8107 = vmatprep.subr.bf16.mxu1 %v8837_v6  ;;  %v4835_v32 = vld [vmem:[#allocation3 + $0x60] sm:$0xff]  ;;  %v8845_v27 = vld [vmem:[#allocation3 + $0x18] ss:$36 sps:$4 sm:$0xff]   ;;  %v8864_v3 = vld [vmem:[%s10805_s12 + $0x48] sm:$0xff]  }
 0x624   : > { %8133 = vmatprep.subr.bf16.mxu0 %v8834_v40  ;;  %v7436_v57 = vcombine.high %v4835_v32, %v4835_v32  ;;  %v7435_v51 = vcombine.low %v4835_v32, %v4835_v32  ;;  %v8857_v42 = vld [vmem:[%s10803_s10 + $0x230] sm:$0xff]   ;;  %v8858_v63 = vld [vmem:[%s10803_s10 + $0x238] sm:$0xff]   ;;  %v8860_v55 = vld [vmem:[%s10805_s12 + $0x40] sm:$0xff]  }
 0x625   : > { %v4834_v29 = vld [vmem:[#allocation3 + $0x58] sm:$0xff]  ;;  %v8861_v59 = vld [vmem:[%s10805_s12 + $0xc0] sm:$0xff]   ;;  %v8865_v13 = vld [vmem:[%s10805_s12 + $0xc8] sm:$0xff]  }
 0x626   : > { %8108 = vmatpush3.bf16.msra.mxu1 %v8839_v7  ;;  %8134 = vmatpush3.bf16.msra.mxu0 %v8836_v53  ;;  %v7434_v4 = vcombine.high %v4834_v29, %v4834_v29  ;;  %v7433_v58 = vcombine.low %v4834_v29, %v4834_v29  ;;  %v8862_v48 = vld [vmem:[%s10805_s12] sm:$0xff]   ;;  %v8866_v20 = vld [vmem:[%s10805_s12 + $0x8] sm:$0xff]   ;;  %v8868_v1 = vld [vmem:[%s10805_s12 + $0x50] sm:$0xff]  }
 0x627   : > { %8109 = vmatprep.subr.bf16.mxu1 %v8841_v16  ;;  %8135 = vmatprep.subr.bf16.mxu0 %v8838_v44  ;;  %v8863_v62 = vld [vmem:[%s10805_s12 + $0x80] sm:$0xff]   ;;  %v8867_v54 = vld [vmem:[%s10805_s12 + $0x88] sm:$0xff]   ;;  %v8869_v9 = vld [vmem:[%s10805_s12 + $0xd0] sm:$0xff]  }
 0x628   : > { %v8870_v46 = vld [vmem:[%s10805_s12 + $0x10] sm:$0xff]   ;;  %v8872_v22 = vld [vmem:[%s10805_s12 + $0x58] sm:$0xff]   ;;  %v8876_v11 = vld [vmem:[%s10805_s12 + $0x60] sm:$0xff]  }
 0x629   : > { %v8859_v45 = vld [vmem:[#allocation3 + $0x68] ss:$0 sps:$4 sm:$0xff]   ;;  %v8871_v26 = vld [vmem:[%s10805_s12 + $0x90] sm:$0xff]   ;;  %v8873_v43 = vld [vmem:[%s10805_s12 + $0xd8] sm:$0xff]  }
 0x62a   : > { %8110 = vmatpush3.bf16.msra.mxu1 %v8843_v35  ;;  %8136 = vmatpush3.bf16.msra.mxu0 %v8840_v31  ;;  %v8853_v19 = vld [vmem:[#allocation3 + $0x20] ss:$36 sps:$4 sm:$0xff]   ;;  %v8880_v8 = vld [vmem:[%s10805_s12 + $0x68] sm:$0xff]   ;;  %v8884_v7 = vld [vmem:[%s10805_s12 + $0x70] sm:$0xff]  }
 0x62b   : > { %8455 = vmatprep.subr.bf16.mxu1 %v8846_v56  ;;  %8137 = vmatprep.subr.bf16.mxu0 %v8842_v34  ;;  %v8874_v17 = vld [vmem:[%s10805_s12 + $0x18] sm:$0xff]   ;;  %v8877_v47 = vld [vmem:[%s10805_s12 + $0xe0] sm:$0xff]   ;;  %v8881_v14 = vld [vmem:[%s10805_s12 + $0xe8] sm:$0xff]  }
 0x62c   : > { %v8875_v18 = vld [vmem:[%s10805_s12 + $0x98] sm:$0xff]   ;;  %v8878_v24 = vld [vmem:[%s10805_s12 + $0x20] sm:$0xff]   ;;  %v8882_v60 = vld [vmem:[%s10805_s12 + $0x28] sm:$0xff]  }
 0x62d   : > { %5627 = vmatmul.mubr.bf16.vlgmr.msra.gmra.mrb[72].mxu1 %v7424_v30  ;;  %v8879_v6 = vld [vmem:[%s10805_s12 + $0xa0] sm:$0xff]   ;;  %v8883_v40 = vld [vmem:[%s10805_s12 + $0xa8] sm:$0xff]   ;;  %v8885_v53 = vld [vmem:[%s10805_s12 + $0xf0] sm:$0xff]  }
 0x62e   : > { %5634 = vmatprep.mubr.bf16.mxu1 %v7434_v4  ;;  %8456 = vmatpush3.bf16.msra.mxu1 %v8846_v56  ;;  %v8886_v16 = vld [vmem:[%s10805_s12 + $0x30] sm:$0xff]   ;;  %v8888_v31 = vld [vmem:[%s10805_s12 + $0x78] sm:$0xff]   ;;  %v8898_v34 = vld [vmem:[%s10805_s12 + $0x140] sm:$0xff]  }
 0x62f   : > { %8138 = vmatpush3.bf16.msra.mxu0 %v8844_v33  ;;  %8457 = vmatprep.subr.bf16.mxu1 %v8849_v37  ;;  %v8887_v44 = vld [vmem:[%s10805_s12 + $0xb0] sm:$0xff]   ;;  %v8889_v35 = vld [vmem:[%s10805_s12 + $0xf8] sm:$0xff]   ;;  %v8899_v29 = vld [vmem:[%s10805_s12 + $0x1c0] sm:$0xff]  }
 0x630   : > { %8161 = vmatprep.subr.bf16.mxu0 %v8860_v55  ;;  %v8890_v56 = vld [vmem:[%s10805_s12 + $0x38] sm:$0xff]   ;;  %v7419_v33 = vld [vmem:[%s10804_s11] ss:$0 sm:$0xff] }
 0x631   : > { %v8891_v61 = vld [vmem:[%s10805_s12 + $0xb8] sm:$0xff]  }
 0x632   : > { %5675 = vmatmul.mubr.bf16.vlgmr.msra.gmra.mrb[80].mxu0 %v8845_v27  ;;  %8458 = vmatpush3.bf16.msra.mxu1 %v8849_v37 }
 0x633   : > { %5682 = vmatprep.mubr.bf16.mxu0 %v7436_v57  ;;  %8459 = vmatprep.subr.bf16.mxu1 %v8852_v39 }
 0x634   : > { %8162 = vmatpush3.bf16.msra.mxu0 %v8862_v48 }
 0x635   : > { %5635 = vmatmul.mubr.bf16.gmra.mrb[76].mxu1 %v7433_v58  ;;  %8163 = vmatprep.subr.bf16.mxu0 %v8864_v3 }
 0x636   : > { %8460 = vmatpush3.bf16.msra.mxu1 %v8852_v39  ;;  %8471 = vmatprep.mubr.bf16.mxu1 %v8853_v19 }
 0x637   : > { %8461 = vmatprep.subr.bf16.mxu1 %v8854_v10 }
 0x638   : > { %8164 = vmatpush3.bf16.msra.mxu0 %v8866_v20 }
 0x639   : > { %8165 = vmatprep.subr.bf16.mxu0 %v8868_v1 }
 0x63a   : > { %5683 = vmatmul.mubr.bf16.gmra.mrb[84].mxu0 %v7435_v51  ;;  %8462 = vmatpush3.bf16.msra.mxu1 %v8854_v10 }
 0x63b   : > { %8463 = vmatprep.subr.bf16.mxu1 %v8855_v12 }
 0x63c   : > { %8166 = vmatpush3.bf16.msra.mxu0 %v8870_v46 }
 0x63d   : > { %8167 = vmatprep.subr.bf16.mxu0 %v8872_v22 }
 0x63e   : > { %8464 = vmatpush3.bf16.msra.mxu1 %v8855_v12 }
 0x63f   : > { %8465 = vmatprep.subr.bf16.mxu1 %v8856_v50 }
 0x640   : > { %8168 = vmatpush3.bf16.msra.mxu0 %v8874_v17 }
 0x641   : > { %8169 = vmatprep.subr.bf16.mxu0 %v8876_v11 }
 0x642   : > { %8466 = vmatpush3.bf16.msra.mxu1 %v8856_v50 }
 0x643   : > { %8467 = vmatprep.subr.bf16.mxu1 %v8857_v42 }
 0x644   : > { %8170 = vmatpush3.bf16.msra.mxu0 %v8878_v24 }
 0x645   : > { %8171 = vmatprep.subr.bf16.mxu0 %v8880_v8 }
 0x646   : > { %8468 = vmatpush3.bf16.msra.mxu1 %v8857_v42 }
 0x647   : > { %8469 = vmatprep.subr.bf16.mxu1 %v8858_v63 }
 0x648   : > { %8172 = vmatpush3.bf16.msra.mxu0 %v8882_v60 }
 0x649   : > { %8173 = vmatprep.subr.bf16.mxu0 %v8884_v7 }
 0x64a   : > { %8470 = vmatpush3.bf16.msra.mxu1 %v8858_v63 }
 0x64b   : > { %8189 = vmatprep.subr.bf16.mxu1 %v8861_v59 }
 0x64c   : > { %8174 = vmatpush3.bf16.msra.mxu0 %v8886_v16 }
 0x64d   : > { %8472 = vmatmul.mubr.bf16.vlgmr.msra.gmra.mrb[80].mxu1 %v8859_v45  ;;  %8175 = vmatprep.subr.bf16.mxu0 %v8888_v31 }
 0x64e   : > { %8190 = vmatpush3.bf16.msra.mxu1 %v8863_v62 }
 0x64f   : > { %8191 = vmatprep.subr.bf16.mxu1 %v8865_v13 }
 0x650   : > { %8176 = vmatpush3.bf16.msra.mxu0 %v8890_v56 }
 0x651   : > { %8217 = vmatprep.subr.bf16.mxu0 %v8898_v34 }
 0x652   : > { %8192 = vmatpush3.bf16.msra.mxu1 %v8867_v54 }
 0x653   : > { %8193 = vmatprep.subr.bf16.mxu1 %v8869_v9 }
 0x656   : > { %8194 = vmatpush3.bf16.msra.mxu1 %v8871_v26 }
 0x657   : > { %8195 = vmatprep.subr.bf16.mxu1 %v8873_v43 }
 0x65a   : > { %8196 = vmatpush3.bf16.msra.mxu1 %v8875_v18 }
 0x65b   : > { %8197 = vmatprep.subr.bf16.mxu1 %v8877_v47 }
 0x65e   : > { %8198 = vmatpush3.bf16.msra.mxu1 %v8879_v6 }
 0x65f   : > { %8199 = vmatprep.subr.bf16.mxu1 %v8881_v14 }
 0x662   : > { %8200 = vmatpush3.bf16.msra.mxu1 %v8883_v40 }
 0x663   : > { %8201 = vmatprep.subr.bf16.mxu1 %v8885_v53 }
 0x666   : > { %8202 = vmatpush3.bf16.msra.mxu1 %v8887_v44 }
 0x667   : > { %8203 = vmatprep.subr.bf16.mxu1 %v8889_v35 }
 0x66a   : > { %8204 = vmatpush3.bf16.msra.mxu1 %v8891_v61 }
 0x66b   : > { %8245 = vmatprep.subr.bf16.mxu1 %v8899_v29 }
 0x6e0   : > { %v8055_v38 = vpop.f32.mrb[64].mxu1 }
 0x6e1   : > { %v8056_v30 = vpop.f32.mrb[65].mxu1 }
 0x6e2   : > { %v8057_v37 = vadd.f32 %v8056_v30, %v8055_v38  ;;  %v8058_v4 = vpop.f32.mrb[66].mxu1 }
 0x6e3   : > { %v8059_v32 = vpop.f32.mrb[67].mxu1 }
 0x6e4   : > { %v8083_v39 = vpop.f32.mrb[72].mxu0  ;;  %v5533_v27 = vadd.f32 %v8057_v37, %v7419_v33  ;;  %v8060_v57 = vadd.f32 %v8059_v32, %v8058_v4 }
 0x6e5   : > { %v8084_v58 = vpop.f32.mrb[73].mxu0 }
 0x6e6   : > { %v8085_v10 = vadd.f32 %v8084_v58, %v8083_v39  ;;  %v8086_v19 = vpop.f32.mrb[74].mxu0  ;;  %v5536_v12 = vadd.f32 %v8060_v57, %v7419_v33  ;;  %v5763_v39 = vld [vmem:[#allocation5] sm:$0xf] }
 0x6e7   : > { %v8087_v51 = vpop.f32.mrb[75].mxu0  ;;  %v5831_v58 = vld [vmem:[#allocation5] sm:$0xe] }
 0x6e8   : > { %v5581_v50 = vadd.f32 %v8085_v10, %v5533_v27  ;;  %v8088_v42 = vadd.f32 %v8087_v51, %v8086_v19  ;;  %v8061_v63 = vpop.f32.mrb[68].mxu1 }
 0x6e9   : > { %v8062_v45 = vpop.f32.mrb[69].mxu1 }
 0x6ea   : > { %v5584_v55 = vadd.f32 %v8088_v42, %v5536_v12  ;;  %v8063_v59 = vadd.f32 %v8062_v45, %v8061_v63  ;;  %v8064_v48 = vpop.f32.mrb[70].mxu1  ;;  %v5771_v42 = vshll.u32 %v5763_v39, 16 }
 0x6eb   : > { %v8065_v62 = vpop.f32.mrb[71].mxu1 }
 0x6ec   : > { %v5541_v13 = vadd.f32 %v8063_v59, %v7419_v33  ;;  %v5839_v59 = vshll.u32 %v5831_v58, 16 }
 0x6ef   : > { %v8089_v3 = vpop.f32.mrb[76].mxu0 }
 0x6f0   : > { %v8090_v20 = vpop.f32.mrb[77].mxu0 }
 0x6f1   : > { %v8091_v54 = vadd.f32 %v8090_v20, %v8089_v3  ;;  %v8092_v1 = vpop.f32.mrb[78].mxu0  ;;  %v5773_v20 = vrot.slane %v5771_v42, 5 }
 0x6f2   : > { %v8093_v9 = vpop.f32.mrb[79].mxu0 }
 0x6f3   : > { %v5589_v46 = vadd.f32 %v8091_v54, %v5541_v13 }
 0x700   : > { %v8111_v26 = vpop.f32.mrb[72].mxu1 }
 0x701   : > { %v8112_v22 = vpop.f32.mrb[73].mxu1 }
 0x702   : > { %v8113_v43 = vadd.f32 %v8112_v22, %v8111_v26  ;;  %v8114_v17 = vpop.f32.mrb[74].mxu1  ;;  %v5879_v22 = vld [vmem:[#allocation5] sm:$0x8] }
 0x703   : > { %v8115_v18 = vpop.f32.mrb[75].mxu1  ;;  %v5884_v21 = vshrl.u32 %v5879_v22, 16 }
 0x704   : > { %v5629_v11 = vadd.f32 %v8113_v43, %v5581_v50  ;;  %v8116_v47 = vadd.f32 %v8115_v18, %v8114_v17  ;;  %v5768_v50 = vshrl.u32 %v5763_v39, 16  ;;  %v5973_v43 = vld [vmem:[#allocation5 + $0x10] sm:$0x7] }
 0x705   : > { %v8139_v24 = vpop.f32.mrb[80].mxu0  ;;  %v10580_v52 = vrot.slane %v5884_v21, 11 }
 0x706   : > { %v8140_v6 = vpop.f32.mrb[81].mxu0  ;;  %v5632_v8 = vadd.f32 %v8116_v47, %v5584_v55  ;;  %v5836_v55 = vshrl.u32 %v5831_v58, 16  ;;  %v5770_v13 = vrot.slane %v5768_v50, 4 }
 0x707   : > { %v8141_v14 = vadd.f32 %v8140_v6, %v8139_v24  ;;  %v8142_v60 = vpop.f32.mrb[82].mxu0  ;;  %v5807_v6 = vld [vmem:[#allocation5] sm:$0xe] }
 0x708   : > { %v8143_v40 = vpop.f32.mrb[83].mxu0  ;;  %v8117_v7 = vpop.f32.mrb[76].mxu1  ;;  %v5838_v9 = vrot.slane %v5836_v55, 5  ;;  %v5774_v24 = vor.u32 %v5773_v20, %v5770_v13 }
 0x709   : > { %v8144_v53 = vadd.f32 %v8143_v40, %v8142_v60  ;;  %v8118_v16 = vpop.f32.mrb[77].mxu1  ;;  %v5677_v44 = vadd.f32 %v8141_v14, %v5629_v11  ;;  %v5929_v11 = vld [vmem:[#allocation5 + $0x10] sm:$0x1]  ;;  %v6004_v14 = vshrl.u32 %v5973_v43, 16  ;;  %v6007_v40 = vshll.u32 %v5973_v43, 16 }
 0x70a   : > { %v8119_v31 = vadd.f32 %v8118_v16, %v8117_v7  ;;  %v8120_v35 = vpop.f32.mrb[78].mxu1  ;;  %v5960_v60 = vshll.u32 %v5929_v11, 16  ;;  %v10574_v7 = vld [vmem:[#allocation5 + $0x10] sm:$0x7]  ;;  %v5775_v49 = vrot.slane %v5774_v24, 4  ;;  %v7513_v16 = vrot.slane %v5807_v6, 9 }
 0x70b   : > { %v8121_v56 = vpop.f32.mrb[79].mxu1  ;;  %v5680_v61 = vadd.f32 %v8144_v53, %v5632_v8  ;;  %v10576_v53 = vld [vmem:[#allocation5 + $0x10] sm:$0xf]  ;;  %v6034_v35 = vrot.slane %v10574_v7, 7 }
 0x70c   : > { %v5637_v34 = vadd.f32 %v8119_v31, %v5589_v46  ;;  %v5841_v46 = vrot.slane %v5839_v59, 6  ;;  %v10582_v31 = vrot.slane %v6004_v14, 6  ;;  %v10585_v56 = vrot.slane %v5960_v60, 5 }
 0x70d   : > { %v8145_v29 = vpop.f32.mrb[84].mxu0 }
 0x70e   : > { %v8146_v38 = vpop.f32.mrb[85].mxu0  ;;  %v5842_v8 = vor.u32 %v5841_v46, %v5838_v9 }
 0x70f   : > { %v8147_v33 = vadd.f32 %v8146_v38, %v8145_v29  ;;  %v8148_v30 = vpop.f32.mrb[86].mxu0  ;;  %v6073_v29 = vshll.u32 %v10576_v53, 16 }
 0x710   : > { %v8149_v37 = vpop.f32.mrb[87].mxu0 }
 0x711   : > { %v5685_v4 = vadd.f32 %v8147_v33, %v5637_v34  ;;  %v6070_v34 = vshrl.u32 %v10576_v53, 16 }
 0x720   : > { %v8473_v32 = vpop.f32.mrb[80].mxu1 }
 0x721   : > { %v5733_v27 = vadd.f32 %v8473_v32, %v5685_v4  ;;  %v5724_v57 = vpop.f32.mrb[81].mxu1 }
 0x722   : > { %v5725_v10 = vadd.f32 %v5724_v57, %v5677_v44  ;;  %v8474_v19 = vpop.f32.mrb[82].mxu1  ;;  %v10578_v44 = vrot.slane %v5842_v8, 4 }
 0x723   : > { %v5740_v12 = vmul.f32 0.2, %v5733_v27  ;;  %v5727_v51 = vpop.f32.mrb[83].mxu1 }
 0x724   : > { %v5738_v63 = vmul.f32 0.2, %v5725_v10  ;;  %v5728_v45 = vadd.f32 %v5727_v51, %v5680_v61  ;;  %v10587_v61 = vrot.slane %v6007_v40, 7 }
 0x725   : > { %v5743_v48 = vmax.f32 %v5733_v27, %v5740_v12 }
 0x726   : > { %v5741_v62 = vmax.f32 %v5725_v10, %v5738_v63  ;;  %v5739_v3 = vmul.f32 0.2, %v5728_v45 }
 0x727   : > { %v5746_v17 = vsel %vm9524_vm4, %v5743_v48, 0.0 }
 0x728   : > { %v5744_v54 = vsel %vm9491_vm11, %v5741_v62, 0.0  ;;  %v5742_v1 = vmax.f32 %v5728_v45, %v5739_v3 }
 0x729   : > { %v7646_v26 = vpack.c.bf16 %v5744_v54, %v5744_v54 }
 0x72a   : > { %v5745_v18 = vsel %vm9520_vm2, %v5742_v1, 0.0 }
 0x72b   : > { %5760 = vst [vmem:[#allocation5 + $0x4] sm:$0xf] %v7646_v26  ;;  %v7667_v47 = vpack.c.bf16 %v5746_v17, %v5745_v18 }
 0x72d   : > { %7672 = vst [vmem:[#allocation5 + $0x8] sm:$0xff] %v7667_v47  }
 0x732   : > { %v5764_v38 = vld [vmem:[#allocation5 + $0x4] sm:$0xf] }
 0x733   : > { %v5808_v33 = vld [vmem:[#allocation5 + $0x4] sm:$0xf]  ;;  %v5777_v37 = vshll.u32 %v5764_v38, 16  ;;  %v5781_v4 = vshrl.u32 %v5764_v38, 16 }
 0x734   : > { %v5832_v30 = vld [vmem:[#allocation5 + $0x4] sm:$0xf]  ;;  %v5817_v32 = vrot.slane %v5808_v33, 5  ;;  %v5765_v27 = vld [vmem:[#allocation5 + $0x8] sm:$0xf] }
 0x735   : > { %v5845_v39 = vshrl.u32 %v5832_v30, 16  ;;  %v5809_v57 = vld [vmem:[#allocation5 + $0x8] sm:$0xf]  ;;  %v5880_v58 = vld [vmem:[#allocation5 + $0x4] sm:$0xf]  ;;  %v5779_v10 = vrot.slane %v5777_v37, 5 }
 0x736   : > { %v5783_v19 = vrot.slane %v5781_v4, 4  ;;  %v5787_v12 = vshll.u32 %v5765_v27, 16  ;;  %v5791_v51 = vshrl.u32 %v5765_v27, 16  ;;  %v5833_v50 = vld [vmem:[#allocation5 + $0x8] sm:$0xf]  ;;  %v5818_v42 = vsel %vm9547_vm8, %v7513_v16, %v5817_v32 }
 0x737   : > { %v5819_v63 = vrot.slane %v5817_v32, 4  ;;  %v5820_v45 = vrot.slane %v5809_v57, 5  ;;  %v5847_v55 = vrot.slane %v5845_v39, 5  ;;  %v5881_v59 = vld [vmem:[#allocation5 + $0x8] sm:$0xf]  ;;  %v5780_v48 = vsel %vm9554_vm9, %v5775_v49, %v5779_v10 }
 0x738   : > { %v5784_v62 = vor.u32 %v5783_v19, %v5779_v10  ;;  %v5789_v3 = vrot.slane %v5787_v12, 5  ;;  %5828 = vst [vmem:[#allocation3 + $0x4] sm:$0xf] %v5818_v42  ;;  %v5848_v13 = vshll.u32 %v5832_v30, 16  ;;  %5804 = vst [vmem:[#allocation3] sm:$0xf] %v5780_v48 }
 0x739   : > { %v5821_v20 = vsel %vm9547_vm8, %v5819_v63, %v5820_v45  ;;  %v5855_v54 = vshrl.u32 %v5833_v50, 16  ;;  %v5858_v1 = vshll.u32 %v5833_v50, 16  ;;  %v5889_v9 = vshrl.u32 %v5880_v58, 16  ;;  %v5766_v46 = vld [vmem:[#allocation5 + $0xc] sm:$0x1] }
 0x73a   : > { %v5785_v26 = vrot.slane %v5784_v62, 4  ;;  %5829 = vst [vmem:[#allocation3 + $0x28] sm:$0xf] %v5821_v20  ;;  %v5850_v22 = vrot.slane %v5848_v13, 6  ;;  %v5892_v43 = vshll.u32 %v5880_v58, 16  ;;  %v5898_v17 = vshrl.u32 %v5881_v59, 16 }
 0x73b   : > { %v5920_v18 = vld [vmem:[#allocation5 + $0x4] sm:$0xf]  ;;  %v5857_v11 = vrot.slane %v5855_v54, 5  ;;  %v5860_v47 = vrot.slane %v5858_v1, 6  ;;  %v5891_v24 = vrot.slane %v5889_v9, 7  ;;  %v5901_v6 = vshll.u32 %v5881_v59, 16 }
 0x73c   : > { %v5921_v8 = vld [vmem:[#allocation5 + $0x8] sm:$0xf]  ;;  %5923 = vst [vmem:[#allocation3 + $0x10] sm:$0xf] %v5920_v18  ;;  %v5790_v21 = vsel %vm9554_vm9, %v5785_v26, %v5789_v3  ;;  %v5851_v14 = vor.u32 %v5850_v22, %v5847_v55  ;;  %v10599_v60 = vrot.slane %v5898_v17, 7  ;;  %v5793_v40 = vrot.slane %v5791_v51, 4 }
 0x73d   : > { %v5810_v49 = vld [vmem:[#allocation5 + $0xc] sm:$0x1]  ;;  %5924 = vst [vmem:[#allocation3 + $0x34] sm:$0xf] %v5921_v8  ;;  %5805 = vst [vmem:[#allocation3 + $0x24] sm:$0xf] %v5790_v21  ;;  %v5861_v16 = vor.u32 %v5860_v47, %v5857_v11  ;;  %v5894_v38 = vor.u32 %v5892_v43, %v5891_v24 }
 0x73e   : > { %v5896_v33 = vrot.slane %v5891_v24, 4  ;;  %v5797_v30 = vshll.u32 %v5766_v46, 16  ;;  %v5852_v37 = vsel %vm9565_vm10, %v10578_v44, %v5851_v14  ;;  %v5853_v4 = vrot.slane %v5851_v14, 4  ;;  %v5834_v27 = vld [vmem:[#allocation5 + $0xc] sm:$0x3]  ;;  %v8901_v14 = vld [vmem:[%s10805_s12 + $0x180] sm:$0xff]  }
 0x73f   : > { %v5903_v32 = vor.u32 %v5901_v6, %v10599_v60  ;;  %v5794_v39 = vor.u32 %v5793_v40, %v5789_v3  ;;  %v5882_v57 = vld [vmem:[#allocation5 + $0xc] sm:$0xf]  ;;  %5876 = vst [vmem:[#allocation3 + $0x8] sm:$0xf] %v5852_v37  ;;  %v5895_v58 = vsel %vm9575_vm12, %v10580_v52, %v5894_v38  ;;  %v5822_v19 = vrot.slane %v5820_v45, 4  ;;  %v8900_v3 = vld [vmem:[%s10805_s12 + $0x100] sm:$0xff]  }
 0x740   : > { %v5799_v10 = vrot.slane %v5797_v30, 5  ;;  %v5823_v12 = vrot.slane %v5810_v49, 5  ;;  %v5926_v51 = vld [vmem:[#allocation5 + $0x4] sm:$0xf]  ;;  %v5862_v50 = vsel %vm9565_vm10, %v5853_v4, %v5861_v16  ;;  %5917 = vst [vmem:[#allocation3 + $0xc] sm:$0xf] %v5895_v58 }
 0x741   : > { %v5904_v44 = vsel %vm9575_vm12, %v5896_v33, %v5903_v32  ;;  %v5795_v42 = vrot.slane %v5794_v39, 4  ;;  %v5863_v63 = vrot.slane %v5861_v16, 4  ;;  %v5927_v55 = vld [vmem:[#allocation5 + $0x8] sm:$0xf]  ;;  %5877 = vst [vmem:[#allocation3 + $0x2c] sm:$0xf] %v5862_v50 }
 0x742   : > { %5918 = vst [vmem:[#allocation3 + $0x30] sm:$0xf] %v5904_v44  ;;  %v5824_v59 = vsel %vm9547_vm8, %v5822_v19, %v5823_v12  ;;  %v5865_v52 = vshrl.u32 %v5834_v27, 16  ;;  %v5868_v48 = vshll.u32 %v5834_v27, 16  ;;  %v5905_v45 = vrot.slane %v10599_v60, 4  ;;  %v8904_v24 = vld [vmem:[%s10805_s12 + $0x148] sm:$0xff]  }
 0x743   : > { %v10615_v62 = vld [vmem:[#allocation5 + $0xc] sm:$0xf]  ;;  %v5800_v13 = vsel %vm9554_vm9, %v5795_v42, %v5799_v10  ;;  %5830 = vst [vmem:[#allocation3 + $0x4c] sm:$0xf] %v5824_v59  ;;  %v5907_v20 = vshrl.u32 %v5882_v57, 16  ;;  %v5910_v54 = vshll.u32 %v5882_v57, 16  ;;  %v6010_v12 = vor.u32 %v10587_v61, %v10582_v31 }
 0x744   : > { %v5931_v1 = vshrl.u32 %v5926_v51, 16  ;;  %v5922_v9 = vld [vmem:[#allocation5 + $0xc] sm:$0xf]  ;;  %5806 = vst [vmem:[#allocation3 + $0x48] sm:$0xf] %v5800_v13  ;;  %v5867_v2 = vrot.slane %v5865_v52, 5 }
 0x745   : > { %v5870_v46 = vrot.slane %v5868_v48, 6  ;;  %v5934_v26 = vshll.u32 %v5926_v51, 16  ;;  %v5940_v22 = vshll.u32 %v5927_v55, 16  ;;  %v5970_v43 = vld [vmem:[#allocation5 + $0x4] sm:$0xc]  ;;  %v5909_v11 = vrot.slane %v5907_v20, 7 }
 0x746   : > { %5925 = vst [vmem:[#allocation3 + $0x58] sm:$0xf] %v5922_v9  ;;  %v8892_v17 = vld [vmem:[#allocation3] ss:$36 sps:$4 sm:$0xff]   ;;  %v5933_v6 = vrot.slane %v5931_v1, 4  ;;  %v5944_v40 = vshrl.u32 %v5927_v55, 16 }
 0x747   : > { %v8894_v18 = vld [vmem:[#allocation3 + $0x4] ss:$36 sps:$4 sm:$0xff]   ;;  %v5871_v47 = vor.u32 %v5870_v46, %v5867_v2  ;;  %v5936_v8 = vrot.slane %v5934_v26, 5  ;;  %v5942_v21 = vrot.slane %v5940_v22, 5  ;;  %v5912_v60 = vor.u32 %v5910_v54, %v5909_v11  ;;  %v8905_v30 = vld [vmem:[%s10805_s12 + $0x1c8] sm:$0xff]   ;;  %v8908_v10 = vld [vmem:[%s10805_s12 + $0x150] sm:$0xff]  }
 0x748   : > { %6791 = vmatprep.mubr.bf16.mxu0 %v8894_v18  ;;  %v5950_v49 = vshll.u32 %v10615_v62, 16  ;;  %v5954_v16 = vshrl.u32 %v10615_v62, 16  ;;  %v5971_v38 = vld [vmem:[#allocation5 + $0x8] sm:$0xf]  ;;  %v8906_v37 = vld [vmem:[%s10805_s12 + $0x108] sm:$0xff]   ;;  %v5975_v39 = vshrl.u32 %v5970_v43, 16 }
 0x749   : > { %6792 = vmatmul.mubr.bf16.vlgmr.msra.gmra.mrb[88].mxu0 %v8892_v17  ;;  %v5872_v33 = vsel %vm9565_vm10, %v5863_v63, %v5871_v47  ;;  %v5937_v4 = vor.u32 %v5936_v8, %v5933_v6  ;;  %v5972_v32 = vld [vmem:[#allocation5 + $0xc] sm:$0xf]  ;;  %v5978_v27 = vshll.u32 %v5970_v43, 16  ;;  %v5913_v28 = vsel %vm9575_vm12, %v5905_v45, %v5912_v60  ;;  %v6018_v63 = vld [vmem:[#allocation5 + $0x4] sm:$0x8]  ;;  %v8912_v2 = vld [vmem:[%s10805_s12 + $0x110] sm:$0xff]  }
 0x74a   : > { %v8895_v57 = vld [vmem:[#allocation3 + $0x8] ss:$36 sps:$4 sm:$0xff]   ;;  %8218 = vmatpush3.bf16.msra.mxu0 %v8900_v3  ;;  %5878 = vst [vmem:[#allocation3 + $0x50] sm:$0xf] %v5872_v33  ;;  %v5946_v19 = vrot.slane %v5944_v40, 4  ;;  %v10645_v50 = vrot.slane %v5950_v49, 5 }
 0x74b   : > { %v8897_v58 = vld [vmem:[#allocation3 + $0xc] ss:$36 sps:$4 sm:$0xff]   ;;  %5919 = vst [vmem:[#allocation3 + $0x54] sm:$0xf] %v5913_v28  ;;  %8219 = vmatprep.subr.bf16.mxu0 %v8904_v24  ;;  %v5938_v51 = vrot.slane %v5937_v4, 4  ;;  %v5977_v44 = vrot.slane %v5975_v39, 6 }
 0x74c   : > { %v5980_v42 = vrot.slane %v5978_v27, 7  ;;  %6839 = vmatprep.mubr.bf16.mxu1 %v8897_v58  ;;  %v6093_v55 = vld [vmem:[#allocation3 + $0x48] sm:$0xff]  ;;  %v5947_v59 = vor.u32 %v5946_v19, %v5942_v21  ;;  %v5984_v52 = vshrl.u32 %v5971_v38, 16  ;;  %v5987_v48 = vshll.u32 %v5971_v38, 16  ;;  %v8909_v17 = vld [vmem:[%s10805_s12 + $0x1d0] sm:$0xff]  }
 0x74d   : > { %v5994_v45 = vshrl.u32 %v5972_v32, 16  ;;  %v6019_v62 = vld [vmem:[#allocation5 + $0x8] sm:$0xf]  ;;  %6840 = vmatmul.mubr.bf16.vlgmr.msra.gmra.mrb[84].mxu1 %v8895_v57  ;;  %v7528_v3 = vcombine.high %v6093_v55, %v6093_v55  ;;  %v7527_v13 = vcombine.low %v6093_v55, %v6093_v55  ;;  %v5943_v20 = vsel %vm9554_vm9, %v5938_v51, %v5942_v21  ;;  %v6020_v1 = vld [vmem:[#allocation5 + $0xc] sm:$0xf] }
 0x74e   : > { %v5981_v54 = vor.u32 %v5980_v42, %v5977_v44  ;;  %8246 = vmatpush3.bf16.msra.mxu1 %v8901_v14  ;;  %8220 = vmatpush3.bf16.msra.mxu0 %v8906_v37  ;;  %v8907_v9 = vld [vmem:[%s10805_s12 + $0x188] sm:$0xff]   ;;  %v5948_v46 = vrot.slane %v5947_v59, 4  ;;  %5967 = vst [vmem:[#allocation3 + $0x14] sm:$0xf] %v5943_v20  ;;  %v5986_v26 = vrot.slane %v5984_v52, 6  ;;  %v5989_v22 = vrot.slane %v5987_v48, 7 }
 0x74f   : > { %v5996_v43 = vrot.slane %v5994_v45, 6  ;;  %6799 = vmatprep.mubr.bf16.mxu0 %v7528_v3  ;;  %8247 = vmatprep.subr.bf16.mxu1 %v8905_v30  ;;  %v5997_v11 = vshll.u32 %v5972_v32, 16  ;;  %v7515_v47 = vrot.slane %v6018_v63, 11  ;;  %v6028_v24 = vrot.slane %v6019_v62, 7  ;;  %v8920_v14 = vld [vmem:[%s10805_s12 + $0x158] sm:$0xff]   ;;  %v8924_v51 = vld [vmem:[%s10805_s12 + $0x160] sm:$0xff]  }
 0x750   : > { %v5982_v18 = vrot.slane %v5981_v54, 4  ;;  %8221 = vmatprep.subr.bf16.mxu0 %v8908_v10  ;;  %v5953_v6 = vsel %vm9554_vm9, %v5948_v46, %v10645_v50  ;;  %v5990_v8 = vor.u32 %v5989_v22, %v5986_v26  ;;  %v6031_v21 = vrot.slane %v6020_v1, 7  ;;  %v6042_v40 = vld [vmem:[#allocation5 + $0x4] sm:$0x8]  ;;  %v6043_v30 = vld [vmem:[#allocation5 + $0x8] sm:$0xf] }
 0x751   : > { %v5956_v60 = vrot.slane %v5954_v16, 4  ;;  %6800 = vmatmul.mubr.bf16.gmra.mrb[92].mxu0 %v7527_v13  ;;  %5968 = vst [vmem:[#allocation3 + $0x38] sm:$0xf] %v5953_v6  ;;  %v5999_v49 = vrot.slane %v5997_v11, 7  ;;  %v6029_v38 = vsel %vm9632_vm1, %v7515_v47, %v6028_v24  ;;  %v6030_v33 = vrot.slane %v6028_v24, 4  ;;  %v8922_v16 = vld [vmem:[%s10805_s12 + $0x118] sm:$0xff]  }
 0x752   : > { %v6072_v37 = vrot.slane %v6070_v34, 7  ;;  %v6094_v4 = vld [vmem:[#allocation3 + $0x50] sm:$0xff]  ;;  %8248 = vmatpush3.bf16.msra.mxu1 %v8907_v9  ;;  %8222 = vmatpush3.bf16.msra.mxu0 %v8912_v2  ;;  %v5991_v32 = vsel %vm9640_vm3, %v5982_v18, %v5990_v8  ;;  %v5992_v39 = vrot.slane %v5990_v8, 4  ;;  %6039 = vst [vmem:[#allocation3 + $0x1c] sm:$0xf] %v6029_v38  ;;  %v6033_v57 = vrot.slane %v6031_v21, 4 }
 0x753   : > { %v5957_v27 = vor.u32 %v5956_v60, %v10645_v50  ;;  %v6044_v58 = vld [vmem:[#allocation5 + $0xc] sm:$0xf]  ;;  %v7530_v28 = vcombine.high %v6094_v4, %v6094_v4  ;;  %8249 = vmatprep.subr.bf16.mxu1 %v8909_v17  ;;  %v8913_v34 = vld [vmem:[%s10805_s12 + $0x190] sm:$0xff]   ;;  %v6000_v10 = vor.u32 %v5999_v49, %v5996_v43  ;;  %6015 = vst [vmem:[#allocation3 + $0x18] sm:$0xf] %v5991_v32  ;;  %v6047_v44 = vshrl.u32 %v6042_v40, 16 }
 0x754   : > { %v6032_v19 = vsel %vm9632_vm1, %v6030_v33, %v6031_v21  ;;  %v7529_v42 = vcombine.low %v6094_v4, %v6094_v4  ;;  %8223 = vmatprep.subr.bf16.mxu0 %v8920_v14  ;;  %v8921_v50 = vld [vmem:[%s10805_s12 + $0x1d8] sm:$0xff]   ;;  %v6035_v55 = vsel %vm9632_vm1, %v6033_v57, %v6034_v35  ;;  %v6052_v59 = vshrl.u32 %v6043_v30, 16  ;;  %v8926_v62 = vld [vmem:[%s10805_s12 + $0x120] sm:$0xff]   ;;  %v8928_v13 = vld [vmem:[%s10805_s12 + $0x168] sm:$0xff]  }
 0x755   : > { %6040 = vst [vmem:[#allocation3 + $0x40] sm:$0xf] %v6032_v19  ;;  %v5958_v63 = vrot.slane %v5957_v27, 4  ;;  %6847 = vmatprep.mubr.bf16.mxu1 %v7530_v28  ;;  %v6001_v52 = vsel %vm9640_vm3, %v5992_v39, %v6000_v10  ;;  %v6002_v48 = vrot.slane %v6000_v10, 4  ;;  %6041 = vst [vmem:[#allocation3 + $0x64] sm:$0xf] %v6035_v55  ;;  %v6075_v54 = vor.u32 %v6073_v29, %v6072_v37 }
 0x756   : > { %v6061_v45 = vshrl.u32 %v6044_v58, 16  ;;  %6848 = vmatmul.mubr.bf16.gmra.mrb[88].mxu1 %v7529_v42  ;;  %6016 = vst [vmem:[#allocation3 + $0x3c] sm:$0xf] %v6001_v52  ;;  %8224 = vmatpush3.bf16.msra.mxu0 %v8922_v16  ;;  %v6054_v7 = vrot.slane %v6052_v59, 7  ;;  %v6055_v35 = vshll.u32 %v6043_v30, 16  ;;  %v8923_v3 = vld [vmem:[%s10805_s12 + $0x198] sm:$0xff]  }
 0x757   : > { %v5963_v41 = vsel %vm9554_vm9, %v5958_v63, %v10585_v56  ;;  %8250 = vmatpush3.bf16.msra.mxu1 %v8913_v34  ;;  %8225 = vmatprep.subr.bf16.mxu0 %v8924_v51  ;;  %v6011_v15 = vsel %vm9640_vm3, %v6002_v48, %v6010_v12  ;;  %v6064_v20 = vshll.u32 %v6044_v58, 16  ;;  %v8925_v9 = vld [vmem:[%s10805_s12 + $0x1e0] sm:$0xff]   ;;  %v7516_v2 = vrot.slane %v6047_v44, 11  ;;  %v8929_v43 = vld [vmem:[%s10805_s12 + $0x1e8] sm:$0xff]   ;;  %v8932_v17 = vld [vmem:[%s10805_s12 + $0x170] sm:$0xff]  }
 0x758   : > { %5969 = vst [vmem:[#allocation3 + $0x5c] sm:$0xf] %v5963_v41  ;;  %v6063_v56 = vrot.slane %v6061_v45, 7  ;;  %v8916_v1 = vld [vmem:[#allocation3 + $0x14] ss:$36 sps:$4 sm:$0xff]   ;;  %8251 = vmatprep.subr.bf16.mxu1 %v8921_v50  ;;  %v6057_v46 = vor.u32 %v6055_v35, %v6054_v7  ;;  %v6059_v26 = vrot.slane %v6054_v7, 4 }
 0x759   : > { %6017 = vst [vmem:[#allocation3 + $0x60] sm:$0xf] %v6011_v15  ;;  %6887 = vmatprep.mubr.bf16.mxu0 %v8916_v1  ;;  %v8927_v61 = vld [vmem:[%s10805_s12 + $0x1a0] sm:$0xff]   ;;  %v8934_v11 = vld [vmem:[%s10805_s12 + $0x130] sm:$0xff]   ;;  %v8936_v47 = vld [vmem:[%s10805_s12 + $0x178] sm:$0xff]  }
 0x75a   : > { %v6066_v22 = vor.u32 %v6064_v20, %v6063_v56  ;;  %v6068_v31 = vrot.slane %v6063_v56, 4  ;;  %8226 = vmatpush3.bf16.msra.mxu0 %v8926_v62  ;;  %v6058_v53 = vsel %vm9575_vm12, %v7516_v2, %v6057_v46  ;;  %v8933_v24 = vld [vmem:[%s10805_s12 + $0x1f0] sm:$0xff]   ;;  %v8938_v8 = vld [vmem:[%s10805_s12 + $0x138] sm:$0xff]   ;;  %v8940_v21 = vld [vmem:[%s10805_s12 + $0x200] sm:$0xff]  }
 0x75b   : > { %8252 = vmatpush3.bf16.msra.mxu1 %v8923_v3  ;;  %8227 = vmatprep.subr.bf16.mxu0 %v8928_v13  ;;  %6080 = vst [vmem:[#allocation3 + $0x20] sm:$0xf] %v6058_v53  ;;  %v8935_v6 = vld [vmem:[%s10805_s12 + $0x1b0] sm:$0xff]   ;;  %v8937_v14 = vld [vmem:[%s10805_s12 + $0x1f8] sm:$0xff]   ;;  %v8943_v38 = vld [vmem:[%s10805_s12 + $0x208] sm:$0xff]  }
 0x75c   : > { %v6067_v29 = vsel %vm9575_vm12, %v6059_v26, %v6066_v22  ;;  %v6076_v12 = vsel %vm9575_vm12, %v6068_v31, %v6075_v54  ;;  %8253 = vmatprep.subr.bf16.mxu1 %v8925_v9  ;;  %v8919_v18 = vld [vmem:[#allocation3 + $0x1c] ss:$36 sps:$4 sm:$0xff]   ;;  %v8914_v40 = vld [vmem:[#allocation3 + $0x10] ss:$36 sps:$4 sm:$0xff]   ;;  %v8949_v57 = vld [vmem:[%s10805_s12 + $0x220] sm:$0xff]  }
 0x75d   : > { %6081 = vst [vmem:[#allocation3 + $0x44] sm:$0xf] %v6067_v29  ;;  %6082 = vst [vmem:[#allocation3 + $0x68] sm:$0xf] %v6076_v12  ;;  %6935 = vmatprep.mubr.bf16.mxu1 %v8919_v18  ;;  %v8939_v49 = vld [vmem:[%s10805_s12 + $0x1b8] sm:$0xff]   ;;  %v8946_v37 = vld [vmem:[%s10805_s12 + $0x210] sm:$0xff]  }
 0x75e   : > { %8228 = vmatpush3.bf16.msra.mxu0 %v8930_v5  ;;  %v8917_v4 = vld [vmem:[#allocation3 + $0x18] ss:$36 sps:$4 sm:$0xff]   ;;  %v8950_v28 = vld [vmem:[%s10805_s12 + $0x228] sm:$0xff]   ;;  %v7517_v44 = vld [vmem:[%s10806_s13] ss:$0 sm:$0xff] }
 0x75f   : > { %8254 = vmatpush3.bf16.msra.mxu1 %v8927_v61  ;;  %8229 = vmatprep.subr.bf16.mxu0 %v8932_v17  ;;  %v6095_v60 = vld [vmem:[#allocation3 + $0x58] sm:$0xff] }
 0x760   : > { %8255 = vmatprep.subr.bf16.mxu1 %v8929_v43  ;;  %v7532_v33 = vcombine.high %v6095_v60, %v6095_v60  ;;  %v6096_v30 = vld [vmem:[#allocation3 + $0x60] sm:$0xff]  ;;  %v7531_v39 = vcombine.low %v6095_v60, %v6095_v60  ;;  %v8951_v34 = vld [vmem:[%s10805_s12 + $0x230] sm:$0xff]  }
 0x761   : > { %v7534_v32 = vcombine.high %v6096_v30, %v6096_v30  ;;  %v8948_v16 = vld [vmem:[%s10805_s12 + $0x218] sm:$0xff]   ;;  %v7533_v58 = vcombine.low %v6096_v30, %v6096_v30 }
 0x762   : > { %8230 = vmatpush3.bf16.msra.mxu0 %v8934_v11  ;;  %v8952_v10 = vld [vmem:[%s10805_s12 + $0x238] sm:$0xff]  }
 0x763   : > { %8256 = vmatpush3.bf16.msra.mxu1 %v8931_v36  ;;  %8231 = vmatprep.subr.bf16.mxu0 %v8936_v47 }
 0x764   : > { %8257 = vmatprep.subr.bf16.mxu1 %v8933_v24  ;;  %v8947_v27 = vld [vmem:[#allocation3 + $0x20] ss:$36 sps:$4 sm:$0xff]   ;;  %v8953_v19 = vld [vmem:[#allocation3 + $0x68] ss:$0 sps:$4 sm:$0xff]  }
 0x766   : > { %8232 = vmatpush3.bf16.msra.mxu0 %v8938_v8 }
 0x767   : > { %8258 = vmatpush3.bf16.msra.mxu1 %v8935_v6  ;;  %8475 = vmatprep.subr.bf16.mxu0 %v8940_v21 }
 0x768   : > { %8259 = vmatprep.subr.bf16.mxu1 %v8937_v14 }
 0x769   : > { %6888 = vmatmul.mubr.bf16.vlgmr.msra.gmra.mrb[96].mxu0 %v8914_v40 }
 0x76a   : > { %6895 = vmatprep.mubr.bf16.mxu0 %v7532_v33  ;;  %8476 = vmatpush3.bf16.msra.mxu0 %v8940_v21 }
 0x76b   : > { %8260 = vmatpush3.bf16.msra.mxu1 %v8939_v49  ;;  %8477 = vmatprep.subr.bf16.mxu0 %v8943_v38 }
 0x76e   : > { %6936 = vmatmul.mubr.bf16.vlgmr.msra.gmra.mrb[92].mxu1 %v8917_v4  ;;  %8478 = vmatpush3.bf16.msra.mxu0 %v8943_v38 }
 0x76f   : > { %6943 = vmatprep.mubr.bf16.mxu1 %v7534_v32  ;;  %8479 = vmatprep.subr.bf16.mxu0 %v8946_v37 }
 0x771   : > { %6896 = vmatmul.mubr.bf16.gmra.mrb[100].mxu0 %v7531_v39 }
 0x772   : > { %8480 = vmatpush3.bf16.msra.mxu0 %v8946_v37  ;;  %8491 = vmatprep.mubr.bf16.mxu0 %v8947_v27 }
 0x773   : > { %8481 = vmatprep.subr.bf16.mxu0 %v8948_v16 }
 0x776   : > { %6944 = vmatmul.mubr.bf16.gmra.mrb[96].mxu1 %v7533_v58  ;;  %8482 = vmatpush3.bf16.msra.mxu0 %v8948_v16 }
 0x777   : > { %8483 = vmatprep.subr.bf16.mxu0 %v8949_v57 }
 0x77a   : > { %8484 = vmatpush3.bf16.msra.mxu0 %v8949_v57 }
 0x77b   : > { %8485 = vmatprep.subr.bf16.mxu0 %v8950_v28 }
 0x77e   : > { %8486 = vmatpush3.bf16.msra.mxu0 %v8950_v28 }
 0x77f   : > { %8487 = vmatprep.subr.bf16.mxu0 %v8951_v34 }
 0x782   : > { %8488 = vmatpush3.bf16.msra.mxu0 %v8951_v34 }
 0x783   : > { %8489 = vmatprep.subr.bf16.mxu0 %v8952_v10 }
 0x786   : > { %8490 = vmatpush3.bf16.msra.mxu0 %v8952_v10 }
 0x789   : > { %8492 = vmatmul.mubr.bf16.vlgmr.msra.gmra.mrb[104].mxu0 %v8953_v19 }
 0x81c   : > { %v8177_v51 = vpop.f32.mrb[88].mxu0 }
 0x81d   : > { %v8178_v42 = vpop.f32.mrb[89].mxu0 }
 0x81e   : > { %v8179_v50 = vadd.f32 %v8178_v42, %v8177_v51  ;;  %v8180_v63 = vpop.f32.mrb[90].mxu0 }
 0x81f   : > { %v8181_v55 = vpop.f32.mrb[91].mxu0 }
 0x820   : > { %v8205_v59 = vpop.f32.mrb[84].mxu1  ;;  %v6794_v52 = vadd.f32 %v8179_v50, %v7517_v44  ;;  %v8182_v48 = vadd.f32 %v8181_v55, %v8180_v63 }
 0x821   : > { %v8206_v45 = vpop.f32.mrb[85].mxu1 }
 0x822   : > { %v8207_v62 = vadd.f32 %v8206_v45, %v8205_v59  ;;  %v8208_v41 = vpop.f32.mrb[86].mxu1  ;;  %v6797_v7 = vadd.f32 %v8182_v48, %v7517_v44 }
 0x823   : > { %v8209_v35 = vpop.f32.mrb[87].mxu1 }
 0x824   : > { %v6842_v3 = vadd.f32 %v8207_v62, %v6794_v52  ;;  %v8210_v13 = vadd.f32 %v8209_v35, %v8208_v41  ;;  %v8183_v15 = vpop.f32.mrb[92].mxu0 }
 0x825   : > { %v8184_v56 = vpop.f32.mrb[93].mxu0 }
 0x826   : > { %v6845_v20 = vadd.f32 %v8210_v13, %v6797_v7  ;;  %v8185_v54 = vadd.f32 %v8184_v56, %v8183_v15  ;;  %v8186_v1 = vpop.f32.mrb[94].mxu0 }
 0x827   : > { %v8187_v9 = vpop.f32.mrb[95].mxu0 }
 0x828   : > { %v6802_v46 = vadd.f32 %v8185_v54, %v7517_v44 }
 0x829   : > { %v8211_v2 = vpop.f32.mrb[88].mxu1 }
 0x82a   : > { %v8212_v26 = vpop.f32.mrb[89].mxu1 }
 0x82b   : > { %v8213_v22 = vadd.f32 %v8212_v26, %v8211_v2  ;;  %v8214_v31 = vpop.f32.mrb[90].mxu1 }
 0x82c   : > { %v8215_v5 = vpop.f32.mrb[91].mxu1 }
 0x82d   : > { %v6850_v53 = vadd.f32 %v8213_v22, %v6802_v46 }
 0x83c   : > { %v8233_v61 = vpop.f32.mrb[96].mxu0 }
 0x83d   : > { %v8234_v29 = vpop.f32.mrb[97].mxu0 }
 0x83e   : > { %v8235_v12 = vadd.f32 %v8234_v29, %v8233_v61  ;;  %v8236_v43 = vpop.f32.mrb[98].mxu0 }
 0x83f   : > { %v8237_v17 = vpop.f32.mrb[99].mxu0 }
 0x840   : > { %v6890_v18 = vadd.f32 %v8235_v12, %v6842_v3  ;;  %v8238_v11 = vadd.f32 %v8237_v17, %v8236_v43 }
 0x841   : > { %v8261_v36 = vpop.f32.mrb[92].mxu1 }
 0x842   : > { %v8262_v47 = vpop.f32.mrb[93].mxu1  ;;  %v6893_v24 = vadd.f32 %v8238_v11, %v6845_v20 }
 0x843   : > { %v8263_v6 = vadd.f32 %v8262_v47, %v8261_v36  ;;  %v8264_v8 = vpop.f32.mrb[94].mxu1 }
 0x844   : > { %v8265_v21 = vpop.f32.mrb[95].mxu1  ;;  %v8239_v14 = vpop.f32.mrb[100].mxu0 }
 0x845   : > { %v8266_v60 = vadd.f32 %v8265_v21, %v8264_v8  ;;  %v8240_v40 = vpop.f32.mrb[101].mxu0  ;;  %v6938_v49 = vadd.f32 %v8263_v6, %v6890_v18 }
 0x846   : > { %v8241_v38 = vadd.f32 %v8240_v40, %v8239_v14  ;;  %v8242_v33 = vpop.f32.mrb[102].mxu0 }
 0x847   : > { %v8243_v30 = vpop.f32.mrb[103].mxu0  ;;  %v6941_v37 = vadd.f32 %v8266_v60, %v6893_v24 }
 0x848   : > { %v6898_v4 = vadd.f32 %v8241_v38, %v6850_v53 }
 0x849   : > { %v8267_v32 = vpop.f32.mrb[96].mxu1 }
 0x84a   : > { %v8268_v39 = vpop.f32.mrb[97].mxu1 }
 0x84b   : > { %v8269_v16 = vadd.f32 %v8268_v39, %v8267_v32  ;;  %v8270_v27 = vpop.f32.mrb[98].mxu1 }
 0x84c   : > { %v8271_v57 = vpop.f32.mrb[99].mxu1 }
 0x84d   : > { %v6946_v58 = vadd.f32 %v8269_v16, %v6898_v4 }
 0x85c   : > { %v8493_v28 = vpop.f32.mrb[104].mxu0 }
 0x85d   : > { %v6994_v34 = vadd.f32 %v8493_v28, %v6946_v58  ;;  %v6985_v10 = vpop.f32.mrb[105].mxu0 }
 0x85e   : > { %v6986_v19 = vadd.f32 %v6985_v10, %v6938_v49  ;;  %v8494_v51 = vpop.f32.mrb[106].mxu0 }
 0x85f   : > { %v7001_v44 = vadd.f32 %v6994_v34, %v10229_v25  ;;  %v6988_v42 = vpop.f32.mrb[107].mxu0 }
 0x860   : > { %v6999_v50 = vadd.f32 %v6986_v19, %v10232_v0  ;;  %v6989_v63 = vadd.f32 %v6988_v42, %v6941_v37 }
 0x861   : > { %7004 = vst [vmem:[%s469_s28 + $0x10] sm:$0xff] %v7001_v44 }
 0x862   : > { %7002 = vst [vmem:[%s469_s28] sm:$0xff] %v6999_v50  ;;  %v7000_v55 = vadd.f32 %v6989_v63, %v10238_v23 }
 0x864   : > { %7003 = vst [vmem:[%s469_s28 + $0x8] sm:$0xff] %v7000_v55 }
 0x865 PF: > { %s24_s29 = sadd.s32 1, %s8960_s29  }
 0x866   : > { %p21_p5 = scmp.ge.s32.totalorder %s24_s29, 4  }
 0x868   :  { %23 = sbr.rel (!%p21_p5) target bundleno = 1 (0x1), region = 114 }

</bundles_post_ra>
